<compile_context>
chip_gen: v5e
topology: v5e:2x2
jax: 0.10.0
libtpu: 0.0.40
codegen_flags: <defaults>
</compile_context>

<pallas_src>
import functools

import jax
import jax.numpy as jnp
from jax.experimental import pallas as pl
from jax.experimental.pallas import tpu as pltpu

EPS = 1e-5                      # PyTorch BatchNorm default eps
VMEM_LIMIT = 48 * 1024 * 1024   # scoped-VMEM budget (<=48 MiB: safe on v7x too)


def _elu(z):
    return jnp.where(z > 0, z, jnp.exp(jnp.minimum(z, 0.0)) - 1.0)


# ---------------------------------------------------------------------------
# Pallas kernels
# ---------------------------------------------------------------------------
def _mm_stats_simple_kernel(p_ref, w_ref, b_ref, y_ref, s_ref, q_ref):
    """Down conv as one matmul + bias (K fits in a single block).
    Emits per-row-tile partial BN sums from the f32 accumulator."""
    y = jnp.dot(p_ref[...], w_ref[...], preferred_element_type=jnp.float32)
    y = y + b_ref[...]
    y_ref[...] = y.astype(y_ref.dtype)
    s_ref[...] = jnp.sum(y, axis=0, keepdims=True)
    q_ref[...] = jnp.sum(y * y, axis=0, keepdims=True)


def _mm_stats_ktiled_kernel(p_ref, w_ref, b_ref, y_ref, s_ref, q_ref, acc_ref):
    """K-tiled fallback for large K (reduction axis last, f32 scratch)."""
    k = pl.program_id(1)

    @pl.when(k == 0)
    def _():
        acc_ref[...] = jnp.zeros_like(acc_ref)

    acc_ref[...] += jnp.dot(p_ref[...], w_ref[...],
                            preferred_element_type=jnp.float32)

    @pl.when(k == pl.num_programs(1) - 1)
    def _():
        y = acc_ref[...] + b_ref[...]
        y_ref[...] = y.astype(y_ref.dtype)
        s_ref[...] = jnp.sum(y, axis=0, keepdims=True)
        q_ref[...] = jnp.sum(y * y, axis=0, keepdims=True)


def _luconv_kernel(x0, x1, x2, x3, x4, w_ref, m_ref, b_ref,
                   y_ref, s_ref, q_ref, *, Wp, Ci, Co, HWp):
    """k=5 pad=2 conv for one (n, d_out) step.

    The five x refs are the padded depth slabs d+0..d+4 (shape (HpWp, Ci),
    bf16).  For each (kd, kh) we do ONE (HWp+4, Ci) x (Ci, 5*Co) bf16 MXU dot
    against the contiguous weight block whose columns are the 5 kw taps
    (kw packed into the matmul N dimension), accumulating in an SSA f32 value.
    The kw shift-and-add is applied once at the end with 5 static slices.
    Halo columns (w >= SW) are garbage; they are masked out of the BN sums
    and sliced away by the caller."""
    xs = (x0, x1, x2, x3, x4)
    acc = jnp.zeros((HWp + 4, 5 * Co), jnp.float32)
    for kd in range(5):
        x = xs[kd][...]                               # (HpWp, Ci) bf16, 1 load
        for kh in range(5):
            lhs = x[kh * Wp: kh * Wp + HWp + 4, :]    # (HWp+4, Ci)
            off = (kd * 5 + kh) * Ci                  # static, 8-aligned
            acc = acc + jnp.dot(lhs, w_ref[off: off + Ci, :],
                                preferred_element_type=jnp.float32)

    y = acc[0:HWp, 0:Co]
    for kw in range(1, 5):
        y = y + acc[kw: kw + HWp, kw * Co:(kw + 1) * Co]
    y = y + b_ref[...]

    y_ref[...] = y.astype(y_ref.dtype)
    ym = y * m_ref[...]                               # mask out halo columns
    s_ref[...] = jnp.sum(ym, axis=0, keepdims=True)
    q_ref[...] = jnp.sum(ym * y, axis=0, keepdims=True)


def _bn_elu_kernel(y_ref, sc_ref, sh_ref, o_ref):
    y = y_ref[...].astype(jnp.float32)
    o_ref[...] = _elu(y * sc_ref[...] + sh_ref[...]).astype(o_ref.dtype)


def _bn_elu_res_kernel(y_ref, r_ref, sc_ref, sh_ref, o_ref):
    """Fused:  ELU( ELU(BN(y)) + residual )  -- inner ELU is the bug fix."""
    y = y_ref[...].astype(jnp.float32)
    r = r_ref[...].astype(jnp.float32)
    inner = _elu(y * sc_ref[...] + sh_ref[...])
    o_ref[...] = _elu(inner + r).astype(o_ref.dtype)


# ---------------------------------------------------------------------------
# Pallas wrappers
# ---------------------------------------------------------------------------
def _conv_matmul_stats(patches, w, b, *, tm=512, tk_max=512):
    """patches (M, K) @ w (K, Co) + b (bf16 MXU, f32 acc) plus batch-stat
    partial sums.  Rows are zero-padded to a tile multiple; the padded-row
    contribution to the stats (exactly b per row) is subtracted analytically."""
    M, K = patches.shape
    Co = w.shape[1]
    mpad = (M + tm - 1) // tm * tm
    npad = mpad - M
    mt = mpad // tm
    b2 = b.reshape(1, Co).astype(jnp.float32)

    out_shape = (jax.ShapeDtypeStruct((mpad, Co), jnp.bfloat16),
                 jax.ShapeDtypeStruct((mt, 1, Co), jnp.float32),
                 jax.ShapeDtypeStruct((mt, 1, Co), jnp.float32))

    if K <= tk_max:
        # Common case: no K grid axis, no scratch, no pl.when.
        p = jnp.pad(patches, ((0, npad), (0, 0))).astype(jnp.bfloat16)
        wz = w.astype(jnp.bfloat16)
        y, s, q = pl.pallas_call(
            _mm_stats_simple_kernel,
            out_shape=out_shape,
            grid_spec=pltpu.PrefetchScalarGridSpec(
                num_scalar_prefetch=0,
                grid=(mt,),
                in_specs=[pl.BlockSpec((tm, K), lambda i: (i, 0)),
                          pl.BlockSpec((K, Co), lambda i: (0, 0)),
                          pl.BlockSpec((1, Co), lambda i: (0, 0))],
                out_specs=(pl.BlockSpec((tm, Co), lambda i: (i, 0)),
                           pl.BlockSpec((None, 1, Co), lambda i: (i, 0, 0)),
                           pl.BlockSpec((None, 1, Co), lambda i: (i, 0, 0)))),
            compiler_params=pltpu.CompilerParams(
                dimension_semantics=("parallel",),
                vmem_limit_bytes=VMEM_LIMIT),
        )(p, wz, b2)
    else:
        tk = tk_max
        kpad = (K + tk - 1) // tk * tk
        kt = kpad // tk
        p = jnp.pad(patches, ((0, npad), (0, kpad - K))).astype(jnp.bfloat16)
        wz = jnp.pad(w, ((0, kpad - K), (0, 0))).astype(jnp.bfloat16)
        y, s, q = pl.pallas_call(
            _mm_stats_ktiled_kernel,
            out_shape=out_shape,
            grid_spec=pltpu.PrefetchScalarGridSpec(
                num_scalar_prefetch=0,
                grid=(mt, kt),
                in_specs=[pl.BlockSpec((tm, tk), lambda i, k: (i, k)),
                          pl.BlockSpec((tk, Co), lambda i, k: (k, 0)),
                          pl.BlockSpec((1, Co), lambda i, k: (0, 0))],
                out_specs=(pl.BlockSpec((tm, Co), lambda i, k: (i, 0)),
                           pl.BlockSpec((None, 1, Co), lambda i, k: (i, 0, 0)),
                           pl.BlockSpec((None, 1, Co), lambda i, k: (i, 0, 0))),
                scratch_shapes=[pltpu.VMEM((tm, Co), jnp.float32)]),
            compiler_params=pltpu.CompilerParams(
                dimension_semantics=("parallel", "arbitrary"),
                vmem_limit_bytes=VMEM_LIMIT),
        )(p, wz, b2)

    total_s = jnp.sum(s[:, 0, :], axis=0) - npad * b
    total_q = jnp.sum(q[:, 0, :], axis=0) - npad * (b * b)
    mean = total_s / M
    var = jnp.maximum(total_q / M - mean * mean, 0.0)
    return y[:M], mean, var


def _luconv_conv(xp, wk, b, row_mask, *, N, SD, HWp, HpWp, Wp, Ci, Co,
                 valid_count):
    """xp: (N, Dp, Hp*Wp, Ci) bf16 padded slabs; wk: (25*Ci, 5*Co) bf16 with
    row = (kd*5+kh)*Ci + ci and col = kw*Co + co.  Returns y (N, SD, SH*Wp, Co)
    bf16 (halo columns garbage) and masked BN mean/var over valid positions."""
    kernel = functools.partial(_luconv_kernel, Wp=Wp, Ci=Ci, Co=Co, HWp=HWp)
    x_specs = [
        pl.BlockSpec((None, None, HpWp, Ci),
                     lambda n, d, kd=kd: (n, d + kd, 0, 0))
        for kd in range(5)
    ]
    y, s, q = pl.pallas_call(
        kernel,
        out_shape=(jax.ShapeDtypeStruct((N, SD, HWp, Co), jnp.bfloat16),
                   jax.ShapeDtypeStruct((N, SD, 1, Co), jnp.float32),
                   jax.ShapeDtypeStruct((N, SD, 1, Co), jnp.float32)),
        grid_spec=pltpu.PrefetchScalarGridSpec(
            num_scalar_prefetch=0,
            grid=(N, SD),
            in_specs=x_specs + [
                pl.BlockSpec((25 * Ci, 5 * Co), lambda n, d: (0, 0)),
                pl.BlockSpec((HWp, 1), lambda n, d: (0, 0)),
                pl.BlockSpec((1, Co), lambda n, d: (0, 0)),
            ],
            out_specs=(
                pl.BlockSpec((None, None, HWp, Co), lambda n, d: (n, d, 0, 0)),
                pl.BlockSpec((None, None, 1, Co), lambda n, d: (n, d, 0, 0)),
                pl.BlockSpec((None, None, 1, Co), lambda n, d: (n, d, 0, 0)),
            )),
        compiler_params=pltpu.CompilerParams(
            dimension_semantics=("parallel", "parallel"),
            vmem_limit_bytes=VMEM_LIMIT),
    )(xp, xp, xp, xp, xp, wk, row_mask, b.reshape(1, Co).astype(jnp.float32))

    total_s = jnp.sum(s[:, :, 0, :], axis=(0, 1))
    total_q = jnp.sum(q[:, :, 0, :], axis=(0, 1))
    mean = total_s / valid_count
    var = jnp.maximum(total_q / valid_count - mean * mean, 0.0)
    return y, mean, var


def _bn_affine(mean, var, gamma, beta):
    inv = gamma * jax.lax.rsqrt(var + EPS)
    return inv, beta - mean * inv


def _choose_row_tile(rows, width, max_bytes=4 * 1024 * 1024):
    """Largest divisor of `rows` that is a multiple of 8 and fits the budget.
    Falls back to the full extent (block == array dims is always legal)."""
    for cand in range(min(rows, 4096), 7, -1):
        if rows % cand == 0 and cand % 8 == 0 and cand * width * 4 <= max_bytes:
            return cand
    return rows


def bn_elu_apply(y, scale, shift, residual=None, out_dtype=jnp.float32):
    """ELU(y*scale + shift)  or  ELU(ELU(y*scale + shift) + residual),
    with lane-dense packing ((M, C) -> (M/k, k*C), k*C = 128); math in f32."""
    M, Co = y.shape
    k = 1
    if Co < 128 and (128 % Co == 0) and (M % (128 // Co) == 0):
        k = 128 // Co
    rows, width = M // k, k * Co
    y2 = y.reshape(rows, width)
    sc = jnp.tile(scale.astype(jnp.float32), k).reshape(1, width)
    sh = jnp.tile(shift.astype(jnp.float32), k).reshape(1, width)
    tr = _choose_row_tile(rows, width)

    ins = [y2]
    specs = [pl.BlockSpec((tr, width), lambda i: (i, 0))]
    if residual is not None:
        ins.append(residual.reshape(rows, width))
        specs.append(pl.BlockSpec((tr, width), lambda i: (i, 0)))
    ins += [sc, sh]
    specs += [pl.BlockSpec((1, width), lambda i: (0, 0)),
              pl.BlockSpec((1, width), lambda i: (0, 0))]
    kern = _bn_elu_res_kernel if residual is not None else _bn_elu_kernel

    out = pl.pallas_call(
        kern,
        out_shape=jax.ShapeDtypeStruct((rows, width), out_dtype),
        grid_spec=pltpu.PrefetchScalarGridSpec(
            num_scalar_prefetch=0,
            grid=(rows // tr,),
            in_specs=specs,
            out_specs=pl.BlockSpec((tr, width), lambda i: (i, 0)),
        ),
        compiler_params=pltpu.CompilerParams(
            dimension_semantics=("parallel",),
            vmem_limit_bytes=VMEM_LIMIT),
    )(*ins)
    return out.reshape(M, Co)


# ---------------------------------------------------------------------------
# Layout glue (plain JAX)
# ---------------------------------------------------------------------------
def downsample_patches(x):
    """x (N, D, H, W, C) -> (M, 8*C), column order (kd, kh, kw, c).
    k=2 s=2 conv has no overlap, so this is a pure reshape/transpose."""
    N, D, H, W, C = x.shape
    x = x.reshape(N, D // 2, 2, H // 2, 2, W // 2, 2, C)
    x = x.transpose(0, 1, 3, 5, 2, 4, 6, 7)
    return x.reshape(N * (D // 2) * (H // 2) * (W // 2), 8 * C)


def down_transition_forward(x_ncdhw, params):
    """x_ncdhw: (N, inC, D, H, W) f32 -> (N, 2*inC, D/2, H/2, W/2) f32."""
    N, Ci, D, H, W = x_ncdhw.shape
    Co = 2 * Ci
    SD, SH, SW = D // 2, H // 2, W // 2

    x = jnp.transpose(x_ncdhw, (0, 2, 3, 4, 1))              # channels-last

    # ---- down conv (k=2, s=2) + BN + ELU ----------------------------------
    p = downsample_patches(x)
    wd = params['down_w'].transpose(2, 3, 4, 1, 0).reshape(8 * Ci, Co)
    y, mean, var = _conv_matmul_stats(p, wd, params['down_b'])
    scale, shift = _bn_affine(mean, var, params['down_gamma'],
                              params['down_beta'])
    down = bn_elu_apply(y, scale, shift, out_dtype=jnp.bfloat16)   # (M, Co)
    down5 = down.reshape(N, SD, SH, SW, Co)

    luconvs = params['luconvs']
    if len(luconvs) == 0:                                    # out = ELU(2*down)
        two = jnp.full((Co,), 2.0, jnp.float32)
        zeros = jnp.zeros((Co,), jnp.float32)
        out = bn_elu_apply(down, two, zeros, out_dtype=jnp.float32)
        return out.reshape(N, SD, SH, SW, Co).transpose(0, 4, 1, 2, 3)

    # ---- nConvs x LUConv (k=5, pad=2) --------------------------------------
    # Halo padding: W is padded (2,2) -> Wp; H gets one extra bottom row (2,3)
    # so the flattened shifted slices never run out of bounds for the garbage
    # halo columns (which are masked from the BN stats and sliced off later).
    Dp, Hp, Wp = SD + 4, SH + 5, SW + 4
    HpWp, HWp = Hp * Wp, SH * Wp
    valid_count = N * SD * SH * SW
    row_mask = ((jnp.arange(HWp) % Wp) < SW).astype(jnp.float32).reshape(HWp, 1)

    a = down5                                                # bf16
    out_p = None
    for li, lp in enumerate(luconvs):
        xp = jnp.pad(a, ((0, 0), (2, 2), (2, 3), (2, 2), (0, 0)))
        xp = xp.reshape(N, Dp, HpWp, Co).astype(jnp.bfloat16)
        # weight packed as (kd, kh, ci) rows x (kw, co) cols  -> (25*Ci, 5*Co)
        wk = lp['w'].transpose(2, 3, 1, 4, 0).reshape(25 * Co, 5 * Co)
        wk = wk.astype(jnp.bfloat16)
        yb, mean, var = _luconv_conv(
            xp, wk, lp['b'], row_mask,
            N=N, SD=SD, HWp=HWp, HpWp=HpWp, Wp=Wp, Ci=Co, Co=Co,
            valid_count=valid_count)
        scale, shift = _bn_affine(mean, var, lp['gamma'], lp['beta'])
        y2 = yb.reshape(N * SD * HWp, Co)
        if li == len(luconvs) - 1:
            # fuse inner ELU + residual add + outer ELU into one pass
            down_pad = jnp.pad(down5,
                               ((0, 0), (0, 0), (0, 0), (0, Wp - SW), (0, 0)))
            out_p = bn_elu_apply(y2, scale, shift,
                                 residual=down_pad.reshape(N * SD * HWp, Co),
                                 out_dtype=jnp.float32)
        else:
            act = bn_elu_apply(y2, scale, shift, out_dtype=jnp.bfloat16)
            a = act.reshape(N, SD, SH, Wp, Co)[:, :, :, :SW, :]

    out = out_p.reshape(N, SD, SH, Wp, Co)[:, :, :, :SW, :]
    return out.transpose(0, 4, 1, 2, 3)


# ---------------------------------------------------------------------------
# Deterministic parameter init (shapes from the PyTorch __init__)
# ---------------------------------------------------------------------------
def init_params(key, in_chans, n_convs):
    co = 2 * in_chans
    keys = iter(jax.random.split(key, 4 * (n_convs + 1)))

    def conv_w(k, shape):
        fan_in = shape[1] * shape[2] * shape[3] * shape[4]
        return jax.random.normal(k, shape, jnp.float32) / jnp.sqrt(fan_in)

    params = {
        'down_w': conv_w(next(keys), (co, in_chans, 2, 2, 2)),
        'down_b': 0.1 * jax.random.normal(next(keys), (co,), jnp.float32),
        'down_gamma': 1.0 + 0.1 * jax.random.normal(next(keys), (co,), jnp.float32),
        'down_beta': 0.1 * jax.random.normal(next(keys), (co,), jnp.float32),
        'luconvs': [],
    }
    for _ in range(n_convs):
        params['luconvs'].append({
            'w': conv_w(next(keys), (co, co, 5, 5, 5)),
            'b': 0.1 * jax.random.normal(next(keys), (co,), jnp.float32),
            'gamma': 1.0 + 0.1 * jax.random.normal(next(keys), (co,), jnp.float32),
            'beta': 0.1 * jax.random.normal(next(keys), (co,), jnp.float32),
        })
    return params


# ---------------------------------------------------------------------------
# Pure-JAX reference (sanity check)
# ---------------------------------------------------------------------------
def reference_forward(x, params):
    def conv3d(x, w, b, stride, pad):
        y = jax.lax.conv_general_dilated(
            x, w, window_strides=(stride,) * 3, padding=[(pad, pad)] * 3,
            dimension_numbers=('NCDHW', 'OIDHW', 'NCDHW'))
        return y + b[None, :, None, None, None]

    def bn_elu(x, gamma, beta):
        mean = jnp.mean(x, axis=(0, 2, 3, 4), keepdims=True)
        var = jnp.mean((x - mean) ** 2, axis=(0, 2, 3, 4), keepdims=True)
        z = (x - mean) / jnp.sqrt(var + EPS)
        z = z * gamma[None, :, None, None, None] + beta[None, :, None, None, None]
        return jnp.where(z > 0, z, jnp.exp(jnp.minimum(z, 0.0)) - 1.0)

    down = bn_elu(conv3d(x, params['down_w'], params['down_b'], 2, 0),
                  params['down_gamma'], params['down_beta'])
    out = down
    for lp in params['luconvs']:
        out = bn_elu(conv3d(out, lp['w'], lp['b'], 1, 2), lp['gamma'], lp['beta'])
    z = out + down
    return jnp.where(z > 0, z, jnp.exp(jnp.minimum(z, 0.0)) - 1.0)


# ---------------------------------------------------------------------------
if __name__ == "__main__":
    key = jax.random.PRNGKey(0)
    kx, kp = jax.random.split(key)

    in_chans, n_convs = 4, 2
    x = jax.random.normal(kx, (2, in_chans, 16, 16, 16), jnp.float32)
    params = init_params(kp, in_chans, n_convs)

    fwd = jax.jit(down_transition_forward)
    out = jax.block_until_ready(fwd(x, params))
    assert out.shape == (2, 2 * in_chans, 8, 8, 8), out.shape

    ref = jax.jit(reference_forward)(x, params)
    max_err = float(jnp.max(jnp.abs(out - ref)))
    assert bool(jnp.allclose(out, ref, rtol=5e-2, atol=1e-1)), max_err

    print("KERNEL_OK")
</pallas_src>

<mosaic_0001>
module attributes {stable_mosaic.version = 11 : i64} {
  func.func @_mm_stats_simple_kernel(%arg0: i32, %arg1: memref<512x32xbf16, #tpu.memory_space<vmem>>, %arg2: memref<32x8xbf16, #tpu.memory_space<vmem>>, %arg3: memref<1x8xf32, #tpu.memory_space<vmem>>, %arg4: memref<512x8xbf16, #tpu.memory_space<vmem>>, %arg5: memref<1x1x8xf32, #tpu.memory_space<vmem>>, %arg6: memref<1x1x8xf32, #tpu.memory_space<vmem>>) attributes {dimension_semantics = [#tpu.dimension_semantics<parallel>], iteration_bounds = array<i64: 2>, scalar_prefetch = 0 : i64, scratch_operands = 0 : i64, tpu.core_type = #tpu.core_type<tc>, window_params = [{transform_indices = @transform_0, window_bounds = array<i64: 512, 32>}, {pipeline_mode = #tpu.pipeline_mode<synchronous>, transform_indices = @transform_1, window_bounds = array<i64: 32, 8>}, {pipeline_mode = #tpu.pipeline_mode<synchronous>, transform_indices = @transform_2, window_bounds = array<i64: 1, 8>}, {transform_indices = @transform_3, window_bounds = array<i64: 512, 8>}, {transform_indices = @transform_4, window_bounds = array<i64: 1, 1, 8>}, {transform_indices = @transform_5, window_bounds = array<i64: 1, 1, 8>}]} {
    %c0 = arith.constant 0 : index
    %c0_0 = arith.constant 0 : index
    %0 = vector.load %arg1[%c0, %c0_0] : memref<512x32xbf16, #tpu.memory_space<vmem>>, vector<512x32xbf16>
    %c0_1 = arith.constant 0 : index
    %c0_2 = arith.constant 0 : index
    %1 = vector.load %arg2[%c0_1, %c0_2] : memref<32x8xbf16, #tpu.memory_space<vmem>>, vector<32x8xbf16>
    %cst = arith.constant dense<0.000000e+00> : vector<512x8xf32>
    %2 = tpu.matmul %0, %1, %cst {dimension_numbers = #tpu.dot_dimension_numbers<[1], [0], [0], [1], [0, 0, 1, 1], [], []>} : vector<512x32xbf16>, vector<32x8xbf16>, vector<512x8xf32> -> vector<512x8xf32>
    %c0_3 = arith.constant 0 : index
    %c0_4 = arith.constant 0 : index
    %3 = vector.load %arg3[%c0_3, %c0_4] : memref<1x8xf32, #tpu.memory_space<vmem>>, vector<1x8xf32>
    %4 = vector.broadcast %3 : vector<1x8xf32> to vector<512x8xf32>
    %5 = arith.addf %2, %4 : vector<512x8xf32>
    %6 = arith.truncf %5 : vector<512x8xf32> to vector<512x8xbf16>
    %c0_5 = arith.constant 0 : index
    %c0_6 = arith.constant 0 : index
    %7 = vector.load %arg4[%c0_5, %c0_6] : memref<512x8xbf16, #tpu.memory_space<vmem>>, vector<512x8xbf16>
    tpu.vector_store %arg4[%c0_5, %c0_6], %6 {strides = array<i32>} : memref<512x8xbf16, #tpu.memory_space<vmem>>, vector<512x8xbf16>,
    %cst_7 = arith.constant dense<0.000000e+00> : vector<8xf32>
    %8 = vector.multi_reduction <add>, %5, %cst_7 [0] : vector<512x8xf32> to vector<8xf32>
    %9 = vector.shape_cast %8 : vector<8xf32> to vector<1x8xf32>
    %c0_8 = arith.constant 0 : index
    %c0_9 = arith.constant 0 : index
    %c0_10 = arith.constant 0 : index
    %10 = vector.load %arg5[%c0_8, %c0_9, %c0_10] : memref<1x1x8xf32, #tpu.memory_space<vmem>>, vector<1x1x8xf32>
    %11 = vector.shape_cast %10 : vector<1x1x8xf32> to vector<1x8xf32>
    %12 = vector.shape_cast %9 : vector<1x8xf32> to vector<1x1x8xf32>
    tpu.vector_store %arg5[%c0_8, %c0_9, %c0_10], %12 {strides = array<i32>} : memref<1x1x8xf32, #tpu.memory_space<vmem>>, vector<1x1x8xf32>,
    %13 = arith.mulf %5, %5 : vector<512x8xf32>
    %cst_11 = arith.constant dense<0.000000e+00> : vector<8xf32>
    %14 = vector.multi_reduction <add>, %13, %cst_11 [0] : vector<512x8xf32> to vector<8xf32>
    %15 = vector.shape_cast %14 : vector<8xf32> to vector<1x8xf32>
    %c0_12 = arith.constant 0 : index
    %c0_13 = arith.constant 0 : index
    %c0_14 = arith.constant 0 : index
    %16 = vector.load %arg6[%c0_12, %c0_13, %c0_14] : memref<1x1x8xf32, #tpu.memory_space<vmem>>, vector<1x1x8xf32>
    %17 = vector.shape_cast %16 : vector<1x1x8xf32> to vector<1x8xf32>
    %18 = vector.shape_cast %15 : vector<1x8xf32> to vector<1x1x8xf32>
    tpu.vector_store %arg6[%c0_12, %c0_13, %c0_14], %18 {strides = array<i32>} : memref<1x1x8xf32, #tpu.memory_space<vmem>>, vector<1x1x8xf32>,
    return
  }
  func.func @transform_0(%arg0: i32) -> (i32, i32) {
    %c0_i32 = arith.constant 0 : i32
    %c0_i32_0 = arith.constant 0 : i32
    return %arg0, %c0_i32 : i32, i32
  }
  func.func @transform_1(%arg0: i32) -> (i32, i32) {
    %c0_i32 = arith.constant 0 : i32
    %c0_i32_0 = arith.constant 0 : i32
    %c0_i32_1 = arith.constant 0 : i32
    return %c0_i32, %c0_i32_0 : i32, i32
  }
  func.func @transform_2(%arg0: i32) -> (i32, i32) {
    %c0_i32 = arith.constant 0 : i32
    %c0_i32_0 = arith.constant 0 : i32
    %c0_i32_1 = arith.constant 0 : i32
    return %c0_i32, %c0_i32_0 : i32, i32
  }
  func.func @transform_3(%arg0: i32) -> (i32, i32) {
    %c0_i32 = arith.constant 0 : i32
    %c0_i32_0 = arith.constant 0 : i32
    return %arg0, %c0_i32 : i32, i32
  }
  func.func @transform_4(%arg0: i32) -> (i32, i32, i32) {
    %c0_i32 = arith.constant 0 : i32
    %c0_i32_0 = arith.constant 0 : i32
    %c0_i32_1 = arith.constant 0 : i32
    return %arg0, %c0_i32, %c0_i32_0 : i32, i32, i32
  }
  func.func @transform_5(%arg0: i32) -> (i32, i32, i32) {
    %c0_i32 = arith.constant 0 : i32
    %c0_i32_0 = arith.constant 0 : i32
    %c0_i32_1 = arith.constant 0 : i32
    return %arg0, %c0_i32, %c0_i32_0 : i32, i32, i32
  }
}

module attributes {stable_mosaic.version = 11 : i64} {
  func.func @_bn_elu_kernel(%arg0: i32, %arg1: memref<64x128xbf16, #tpu.memory_space<vmem>>, %arg2: memref<1x128xf32, #tpu.memory_space<vmem>>, %arg3: memref<1x128xf32, #tpu.memory_space<vmem>>, %arg4: memref<64x128xbf16, #tpu.memory_space<vmem>>) attributes {dimension_semantics = [#tpu.dimension_semantics<parallel>], iteration_bounds = array<i64: 1>, scalar_prefetch = 0 : i64, scratch_operands = 0 : i64, tpu.core_type = #tpu.core_type<tc>, window_params = [{transform_indices = @transform_0, window_bounds = array<i64: 64, 128>}, {pipeline_mode = #tpu.pipeline_mode<synchronous>, transform_indices = @transform_1, window_bounds = array<i64: 1, 128>}, {pipeline_mode = #tpu.pipeline_mode<synchronous>, transform_indices = @transform_2, window_bounds = array<i64: 1, 128>}, {transform_indices = @transform_3, window_bounds = array<i64: 64, 128>}]} {
    %c0 = arith.constant 0 : index
    %c0_0 = arith.constant 0 : index
    %0 = vector.load %arg1[%c0, %c0_0] : memref<64x128xbf16, #tpu.memory_space<vmem>>, vector<64x128xbf16>
    %1 = arith.extf %0 : vector<64x128xbf16> to vector<64x128xf32>
    %c0_1 = arith.constant 0 : index
    %c0_2 = arith.constant 0 : index
    %2 = vector.load %arg2[%c0_1, %c0_2] : memref<1x128xf32, #tpu.memory_space<vmem>>, vector<1x128xf32>
    %3 = vector.broadcast %2 : vector<1x128xf32> to vector<64x128xf32>
    %4 = arith.mulf %1, %3 : vector<64x128xf32>
    %c0_3 = arith.constant 0 : index
    %c0_4 = arith.constant 0 : index
    %5 = vector.load %arg3[%c0_3, %c0_4] : memref<1x128xf32, #tpu.memory_space<vmem>>, vector<1x128xf32>
    %6 = vector.broadcast %5 : vector<1x128xf32> to vector<64x128xf32>
    %7 = arith.addf %4, %6 : vector<64x128xf32>
    %cst = arith.constant 0.000000e+00 : f32
    %8 = vector.broadcast %cst : f32 to vector<64x128xf32>
    %9 = arith.cmpf ogt, %7, %8 : vector<64x128xf32>
    %cst_5 = arith.constant 0.000000e+00 : f32
    %10 = vector.broadcast %cst_5 : f32 to vector<64x128xf32>
    %11 = arith.minimumf %7, %10 : vector<64x128xf32>
    %12 = math.exp %11 : vector<64x128xf32>
    %cst_6 = arith.constant 1.000000e+00 : f32
    %13 = vector.broadcast %cst_6 : f32 to vector<64x128xf32>
    %14 = arith.subf %12, %13 : vector<64x128xf32>
    %15 = arith.select %9, %7, %14 : vector<64x128xi1>, vector<64x128xf32>
    %16 = arith.truncf %15 : vector<64x128xf32> to vector<64x128xbf16>
    %c0_7 = arith.constant 0 : index
    %c0_8 = arith.constant 0 : index
    %17 = vector.load %arg4[%c0_7, %c0_8] : memref<64x128xbf16, #tpu.memory_space<vmem>>, vector<64x128xbf16>
    tpu.vector_store %arg4[%c0_7, %c0_8], %16 {strides = array<i32>} : memref<64x128xbf16, #tpu.memory_space<vmem>>, vector<64x128xbf16>,
    return
  }
  func.func @transform_0(%arg0: i32) -> (i32, i32) {
    %c0_i32 = arith.constant 0 : i32
    %c0_i32_0 = arith.constant 0 : i32
    return %arg0, %c0_i32 : i32, i32
  }
  func.func @transform_1(%arg0: i32) -> (i32, i32) {
    %c0_i32 = arith.constant 0 : i32
    %c0_i32_0 = arith.constant 0 : i32
    %c0_i32_1 = arith.constant 0 : i32
    return %c0_i32, %c0_i32_0 : i32, i32
  }
  func.func @transform_2(%arg0: i32) -> (i32, i32) {
    %c0_i32 = arith.constant 0 : i32
    %c0_i32_0 = arith.constant 0 : i32
    %c0_i32_1 = arith.constant 0 : i32
    return %c0_i32, %c0_i32_0 : i32, i32
  }
  func.func @transform_3(%arg0: i32) -> (i32, i32) {
    %c0_i32 = arith.constant 0 : i32
    %c0_i32_0 = arith.constant 0 : i32
    return %arg0, %c0_i32 : i32, i32
  }
}

module attributes {stable_mosaic.version = 11 : i64} {
  func.func @_luconv_kernel(%arg0: i32, %arg1: i32, %arg2: memref<1x1x156x8xbf16, #tpu.memory_space<vmem>>, %arg3: memref<1x1x156x8xbf16, #tpu.memory_space<vmem>>, %arg4: memref<1x1x156x8xbf16, #tpu.memory_space<vmem>>, %arg5: memref<1x1x156x8xbf16, #tpu.memory_space<vmem>>, %arg6: memref<1x1x156x8xbf16, #tpu.memory_space<vmem>>, %arg7: memref<200x40xbf16, #tpu.memory_space<vmem>>, %arg8: memref<96x1xf32, #tpu.memory_space<vmem>>, %arg9: memref<1x8xf32, #tpu.memory_space<vmem>>, %arg10: memref<1x1x96x8xbf16, #tpu.memory_space<vmem>>, %arg11: memref<1x1x1x8xf32, #tpu.memory_space<vmem>>, %arg12: memref<1x1x1x8xf32, #tpu.memory_space<vmem>>) attributes {dimension_semantics = [#tpu.dimension_semantics<parallel>, #tpu.dimension_semantics<parallel>], iteration_bounds = array<i64: 2, 8>, scalar_prefetch = 0 : i64, scratch_operands = 0 : i64, tpu.core_type = #tpu.core_type<tc>, window_params = [{transform_indices = @transform_0, window_bounds = array<i64: 1, 1, 156, 8>}, {transform_indices = @transform_1, window_bounds = array<i64: 1, 1, 156, 8>}, {transform_indices = @transform_2, window_bounds = array<i64: 1, 1, 156, 8>}, {transform_indices = @transform_3, window_bounds = array<i64: 1, 1, 156, 8>}, {transform_indices = @transform_4, window_bounds = array<i64: 1, 1, 156, 8>}, {pipeline_mode = #tpu.pipeline_mode<synchronous>, transform_indices = @transform_5, window_bounds = array<i64: 200, 40>}, {pipeline_mode = #tpu.pipeline_mode<synchronous>, transform_indices = @transform_6, window_bounds = array<i64: 96, 1>}, {pipeline_mode = #tpu.pipeline_mode<synchronous>, transform_indices = @transform_7, window_bounds = array<i64: 1, 8>}, {transform_indices = @transform_8, window_bounds = array<i64: 1, 1, 96, 8>}, {transform_indices = @transform_9, window_bounds = array<i64: 1, 1, 1, 8>}, {transform_indices = @transform_10, window_bounds = array<i64: 1, 1, 1, 8>}]} {
    %cst = arith.constant 0.000000e+00 : f32
    %0 = vector.broadcast %cst : f32 to vector<100x40xf32>
    %c0 = arith.constant 0 : index
    %c0_0 = arith.constant 0 : index
    %c0_1 = arith.constant 0 : index
    %c0_2 = arith.constant 0 : index
    %1 = vector.load %arg2[%c0, %c0_0, %c0_1, %c0_2] : memref<1x1x156x8xbf16, #tpu.memory_space<vmem>>, vector<1x1x156x8xbf16>
    %2 = vector.shape_cast %1 : vector<1x1x156x8xbf16> to vector<156x8xbf16>
    %3 = vector.extract_strided_slice %2 {offsets = [0, 0], sizes = [100, 8], strides = [1, 1]} : vector<156x8xbf16> to vector<100x8xbf16>
    %c0_3 = arith.constant 0 : index
    %c0_4 = arith.constant 0 : index
    %4 = vector.load %arg7[%c0_3, %c0_4] : memref<200x40xbf16, #tpu.memory_space<vmem>>, vector<8x40xbf16>
    %cst_5 = arith.constant dense<0.000000e+00> : vector<100x40xf32>
    %5 = tpu.matmul %3, %4, %cst_5 {dimension_numbers = #tpu.dot_dimension_numbers<[1], [0], [0], [1], [0, 0, 1, 1], [], []>} : vector<100x8xbf16>, vector<8x40xbf16>, vector<100x40xf32> -> vector<100x40xf32>
    %6 = arith.addf %0, %5 : vector<100x40xf32>
    %7 = vector.extract_strided_slice %2 {offsets = [12, 0], sizes = [100, 8], strides = [1, 1]} : vector<156x8xbf16> to vector<100x8xbf16>
    %c8 = arith.constant 8 : index
    %c0_6 = arith.constant 0 : index
    %8 = vector.load %arg7[%c8, %c0_6] : memref<200x40xbf16, #tpu.memory_space<vmem>>, vector<8x40xbf16>
    %cst_7 = arith.constant dense<0.000000e+00> : vector<100x40xf32>
    %9 = tpu.matmul %7, %8, %cst_7 {dimension_numbers = #tpu.dot_dimension_numbers<[1], [0], [0], [1], [0, 0, 1, 1], [], []>} : vector<100x8xbf16>, vector<8x40xbf16>, vector<100x40xf32> -> vector<100x40xf32>
    %10 = arith.addf %6, %9 : vector<100x40xf32>
    %11 = vector.extract_strided_slice %2 {offsets = [24, 0], sizes = [100, 8], strides = [1, 1]} : vector<156x8xbf16> to vector<100x8xbf16>
    %c16 = arith.constant 16 : index
    %c0_8 = arith.constant 0 : index
    %12 = vector.load %arg7[%c16, %c0_8] : memref<200x40xbf16, #tpu.memory_space<vmem>>, vector<8x40xbf16>
    %cst_9 = arith.constant dense<0.000000e+00> : vector<100x40xf32>
    %13 = tpu.matmul %11, %12, %cst_9 {dimension_numbers = #tpu.dot_dimension_numbers<[1], [0], [0], [1], [0, 0, 1, 1], [], []>} : vector<100x8xbf16>, vector<8x40xbf16>, vector<100x40xf32> -> vector<100x40xf32>
    %14 = arith.addf %10, %13 : vector<100x40xf32>
    %15 = vector.extract_strided_slice %2 {offsets = [36, 0], sizes = [100, 8], strides = [1, 1]} : vector<156x8xbf16> to vector<100x8xbf16>
    %c24 = arith.constant 24 : index
    %c0_10 = arith.constant 0 : index
    %16 = vector.load %arg7[%c24, %c0_10] : memref<200x40xbf16, #tpu.memory_space<vmem>>, vector<8x40xbf16>
    %cst_11 = arith.constant dense<0.000000e+00> : vector<100x40xf32>
    %17 = tpu.matmul %15, %16, %cst_11 {dimension_numbers = #tpu.dot_dimension_numbers<[1], [0], [0], [1], [0, 0, 1, 1], [], []>} : vector<100x8xbf16>, vector<8x40xbf16>, vector<100x40xf32> -> vector<100x40xf32>
    %18 = arith.addf %14, %17 : vector<100x40xf32>
    %19 = vector.extract_strided_slice %2 {offsets = [48, 0], sizes = [100, 8], strides = [1, 1]} : vector<156x8xbf16> to vector<100x8xbf16>
    %c32 = arith.constant 32 : index
    %c0_12 = arith.constant 0 : index
    %20 = vector.load %arg7[%c32, %c0_12] : memref<200x40xbf16, #tpu.memory_space<vmem>>, vector<8x40xbf16>
    %cst_13 = arith.constant dense<0.000000e+00> : vector<100x40xf32>
    %21 = tpu.matmul %19, %20, %cst_13 {dimension_numbers = #tpu.dot_dimension_numbers<[1], [0], [0], [1], [0, 0, 1, 1], [], []>} : vector<100x8xbf16>, vector<8x40xbf16>, vector<100x40xf32> -> vector<100x40xf32>
    %22 = arith.addf %18, %21 : vector<100x40xf32>
    %c0_14 = arith.constant 0 : index
    %c0_15 = arith.constant 0 : index
    %c0_16 = arith.constant 0 : index
    %c0_17 = arith.constant 0 : index
    %23 = vector.load %arg3[%c0_14, %c0_15, %c0_16, %c0_17] : memref<1x1x156x8xbf16, #tpu.memory_space<vmem>>, vector<1x1x156x8xbf16>
    %24 = vector.shape_cast %23 : vector<1x1x156x8xbf16> to vector<156x8xbf16>
    %25 = vector.extract_strided_slice %24 {offsets = [0, 0], sizes = [100, 8], strides = [1, 1]} : vector<156x8xbf16> to vector<100x8xbf16>
    %c40 = arith.constant 40 : index
    %c0_18 = arith.constant 0 : index
    %26 = vector.load %arg7[%c40, %c0_18] : memref<200x40xbf16, #tpu.memory_space<vmem>>, vector<8x40xbf16>
    %cst_19 = arith.constant dense<0.000000e+00> : vector<100x40xf32>
    %27 = tpu.matmul %25, %26, %cst_19 {dimension_numbers = #tpu.dot_dimension_numbers<[1], [0], [0], [1], [0, 0, 1, 1], [], []>} : vector<100x8xbf16>, vector<8x40xbf16>, vector<100x40xf32> -> vector<100x40xf32>
    %28 = arith.addf %22, %27 : vector<100x40xf32>
    %29 = vector.extract_strided_slice %24 {offsets = [12, 0], sizes = [100, 8], strides = [1, 1]} : vector<156x8xbf16> to vector<100x8xbf16>
    %c48 = arith.constant 48 : index
    %c0_20 = arith.constant 0 : index
    %30 = vector.load %arg7[%c48, %c0_20] : memref<200x40xbf16, #tpu.memory_space<vmem>>, vector<8x40xbf16>
    %cst_21 = arith.constant dense<0.000000e+00> : vector<100x40xf32>
    %31 = tpu.matmul %29, %30, %cst_21 {dimension_numbers = #tpu.dot_dimension_numbers<[1], [0], [0], [1], [0, 0, 1, 1], [], []>} : vector<100x8xbf16>, vector<8x40xbf16>, vector<100x40xf32> -> vector<100x40xf32>
    %32 = arith.addf %28, %31 : vector<100x40xf32>
    %33 = vector.extract_strided_slice %24 {offsets = [24, 0], sizes = [100, 8], strides = [1, 1]} : vector<156x8xbf16> to vector<100x8xbf16>
    %c56 = arith.constant 56 : index
    %c0_22 = arith.constant 0 : index
    %34 = vector.load %arg7[%c56, %c0_22] : memref<200x40xbf16, #tpu.memory_space<vmem>>, vector<8x40xbf16>
    %cst_23 = arith.constant dense<0.000000e+00> : vector<100x40xf32>
    %35 = tpu.matmul %33, %34, %cst_23 {dimension_numbers = #tpu.dot_dimension_numbers<[1], [0], [0], [1], [0, 0, 1, 1], [], []>} : vector<100x8xbf16>, vector<8x40xbf16>, vector<100x40xf32> -> vector<100x40xf32>
    %36 = arith.addf %32, %35 : vector<100x40xf32>
    %37 = vector.extract_strided_slice %24 {offsets = [36, 0], sizes = [100, 8], strides = [1, 1]} : vector<156x8xbf16> to vector<100x8xbf16>
    %c64 = arith.constant 64 : index
    %c0_24 = arith.constant 0 : index
    %38 = vector.load %arg7[%c64, %c0_24] : memref<200x40xbf16, #tpu.memory_space<vmem>>, vector<8x40xbf16>
    %cst_25 = arith.constant dense<0.000000e+00> : vector<100x40xf32>
    %39 = tpu.matmul %37, %38, %cst_25 {dimension_numbers = #tpu.dot_dimension_numbers<[1], [0], [0], [1], [0, 0, 1, 1], [], []>} : vector<100x8xbf16>, vector<8x40xbf16>, vector<100x40xf32> -> vector<100x40xf32>
    %40 = arith.addf %36, %39 : vector<100x40xf32>
    %41 = vector.extract_strided_slice %24 {offsets = [48, 0], sizes = [100, 8], strides = [1, 1]} : vector<156x8xbf16> to vector<100x8xbf16>
    %c72 = arith.constant 72 : index
    %c0_26 = arith.constant 0 : index
    %42 = vector.load %arg7[%c72, %c0_26] : memref<200x40xbf16, #tpu.memory_space<vmem>>, vector<8x40xbf16>
    %cst_27 = arith.constant dense<0.000000e+00> : vector<100x40xf32>
    %43 = tpu.matmul %41, %42, %cst_27 {dimension_numbers = #tpu.dot_dimension_numbers<[1], [0], [0], [1], [0, 0, 1, 1], [], []>} : vector<100x8xbf16>, vector<8x40xbf16>, vector<100x40xf32> -> vector<100x40xf32>
    %44 = arith.addf %40, %43 : vector<100x40xf32>
    %c0_28 = arith.constant 0 : index
    %c0_29 = arith.constant 0 : index
    %c0_30 = arith.constant 0 : index
    %c0_31 = arith.constant 0 : index
    %45 = vector.load %arg4[%c0_28, %c0_29, %c0_30, %c0_31] : memref<1x1x156x8xbf16, #tpu.memory_space<vmem>>, vector<1x1x156x8xbf16>
    %46 = vector.shape_cast %45 : vector<1x1x156x8xbf16> to vector<156x8xbf16>
    %47 = vector.extract_strided_slice %46 {offsets = [0, 0], sizes = [100, 8], strides = [1, 1]} : vector<156x8xbf16> to vector<100x8xbf16>
    %c80 = arith.constant 80 : index
    %c0_32 = arith.constant 0 : index
    %48 = vector.load %arg7[%c80, %c0_32] : memref<200x40xbf16, #tpu.memory_space<vmem>>, vector<8x40xbf16>
    %cst_33 = arith.constant dense<0.000000e+00> : vector<100x40xf32>
    %49 = tpu.matmul %47, %48, %cst_33 {dimension_numbers = #tpu.dot_dimension_numbers<[1], [0], [0], [1], [0, 0, 1, 1], [], []>} : vector<100x8xbf16>, vector<8x40xbf16>, vector<100x40xf32> -> vector<100x40xf32>
    %50 = arith.addf %44, %49 : vector<100x40xf32>
    %51 = vector.extract_strided_slice %46 {offsets = [12, 0], sizes = [100, 8], strides = [1, 1]} : vector<156x8xbf16> to vector<100x8xbf16>
    %c88 = arith.constant 88 : index
    %c0_34 = arith.constant 0 : index
    %52 = vector.load %arg7[%c88, %c0_34] : memref<200x40xbf16, #tpu.memory_space<vmem>>, vector<8x40xbf16>
    %cst_35 = arith.constant dense<0.000000e+00> : vector<100x40xf32>
    %53 = tpu.matmul %51, %52, %cst_35 {dimension_numbers = #tpu.dot_dimension_numbers<[1], [0], [0], [1], [0, 0, 1, 1], [], []>} : vector<100x8xbf16>, vector<8x40xbf16>, vector<100x40xf32> -> vector<100x40xf32>
    %54 = arith.addf %50, %53 : vector<100x40xf32>
    %55 = vector.extract_strided_slice %46 {offsets = [24, 0], sizes = [100, 8], strides = [1, 1]} : vector<156x8xbf16> to vector<100x8xbf16>
    %c96 = arith.constant 96 : index
    %c0_36 = arith.constant 0 : index
    %56 = vector.load %arg7[%c96, %c0_36] : memref<200x40xbf16, #tpu.memory_space<vmem>>, vector<8x40xbf16>
    %cst_37 = arith.constant dense<0.000000e+00> : vector<100x40xf32>
    %57 = tpu.matmul %55, %56, %cst_37 {dimension_numbers = #tpu.dot_dimension_numbers<[1], [0], [0], [1], [0, 0, 1, 1], [], []>} : vector<100x8xbf16>, vector<8x40xbf16>, vector<100x40xf32> -> vector<100x40xf32>
    %58 = arith.addf %54, %57 : vector<100x40xf32>
    %59 = vector.extract_strided_slice %46 {offsets = [36, 0], sizes = [100, 8], strides = [1, 1]} : vector<156x8xbf16> to vector<100x8xbf16>
    %c104 = arith.constant 104 : index
    %c0_38 = arith.constant 0 : index
    %60 = vector.load %arg7[%c104, %c0_38] : memref<200x40xbf16, #tpu.memory_space<vmem>>, vector<8x40xbf16>
    %cst_39 = arith.constant dense<0.000000e+00> : vector<100x40xf32>
    %61 = tpu.matmul %59, %60, %cst_39 {dimension_numbers = #tpu.dot_dimension_numbers<[1], [0], [0], [1], [0, 0, 1, 1], [], []>} : vector<100x8xbf16>, vector<8x40xbf16>, vector<100x40xf32> -> vector<100x40xf32>
    %62 = arith.addf %58, %61 : vector<100x40xf32>
    %63 = vector.extract_strided_slice %46 {offsets = [48, 0], sizes = [100, 8], strides = [1, 1]} : vector<156x8xbf16> to vector<100x8xbf16>
    %c112 = arith.constant 112 : index
    %c0_40 = arith.constant 0 : index
    %64 = vector.load %arg7[%c112, %c0_40] : memref<200x40xbf16, #tpu.memory_space<vmem>>, vector<8x40xbf16>
    %cst_41 = arith.constant dense<0.000000e+00> : vector<100x40xf32>
    %65 = tpu.matmul %63, %64, %cst_41 {dimension_numbers = #tpu.dot_dimension_numbers<[1], [0], [0], [1], [0, 0, 1, 1], [], []>} : vector<100x8xbf16>, vector<8x40xbf16>, vector<100x40xf32> -> vector<100x40xf32>
    %66 = arith.addf %62, %65 : vector<100x40xf32>
    %c0_42 = arith.constant 0 : index
    %c0_43 = arith.constant 0 : index
    %c0_44 = arith.constant 0 : index
    %c0_45 = arith.constant 0 : index
    %67 = vector.load %arg5[%c0_42, %c0_43, %c0_44, %c0_45] : memref<1x1x156x8xbf16, #tpu.memory_space<vmem>>, vector<1x1x156x8xbf16>
    %68 = vector.shape_cast %67 : vector<1x1x156x8xbf16> to vector<156x8xbf16>
    %69 = vector.extract_strided_slice %68 {offsets = [0, 0], sizes = [100, 8], strides = [1, 1]} : vector<156x8xbf16> to vector<100x8xbf16>
    %c120 = arith.constant 120 : index
    %c0_46 = arith.constant 0 : index
    %70 = vector.load %arg7[%c120, %c0_46] : memref<200x40xbf16, #tpu.memory_space<vmem>>, vector<8x40xbf16>
    %cst_47 = arith.constant dense<0.000000e+00> : vector<100x40xf32>
    %71 = tpu.matmul %69, %70, %cst_47 {dimension_numbers = #tpu.dot_dimension_numbers<[1], [0], [0], [1], [0, 0, 1, 1], [], []>} : vector<100x8xbf16>, vector<8x40xbf16>, vector<100x40xf32> -> vector<100x40xf32>
    %72 = arith.addf %66, %71 : vector<100x40xf32>
    %73 = vector.extract_strided_slice %68 {offsets = [12, 0], sizes = [100, 8], strides = [1, 1]} : vector<156x8xbf16> to vector<100x8xbf16>
    %c128 = arith.constant 128 : index
    %c0_48 = arith.constant 0 : index
    %74 = vector.load %arg7[%c128, %c0_48] : memref<200x40xbf16, #tpu.memory_space<vmem>>, vector<8x40xbf16>
    %cst_49 = arith.constant dense<0.000000e+00> : vector<100x40xf32>
    %75 = tpu.matmul %73, %74, %cst_49 {dimension_numbers = #tpu.dot_dimension_numbers<[1], [0], [0], [1], [0, 0, 1, 1], [], []>} : vector<100x8xbf16>, vector<8x40xbf16>, vector<100x40xf32> -> vector<100x40xf32>
    %76 = arith.addf %72, %75 : vector<100x40xf32>
    %77 = vector.extract_strided_slice %68 {offsets = [24, 0], sizes = [100, 8], strides = [1, 1]} : vector<156x8xbf16> to vector<100x8xbf16>
    %c136 = arith.constant 136 : index
    %c0_50 = arith.constant 0 : index
    %78 = vector.load %arg7[%c136, %c0_50] : memref<200x40xbf16, #tpu.memory_space<vmem>>, vector<8x40xbf16>
    %cst_51 = arith.constant dense<0.000000e+00> : vector<100x40xf32>
    %79 = tpu.matmul %77, %78, %cst_51 {dimension_numbers = #tpu.dot_dimension_numbers<[1], [0], [0], [1], [0, 0, 1, 1], [], []>} : vector<100x8xbf16>, vector<8x40xbf16>, vector<100x40xf32> -> vector<100x40xf32>
    %80 = arith.addf %76, %79 : vector<100x40xf32>
    %81 = vector.extract_strided_slice %68 {offsets = [36, 0], sizes = [100, 8], strides = [1, 1]} : vector<156x8xbf16> to vector<100x8xbf16>
    %c144 = arith.constant 144 : index
    %c0_52 = arith.constant 0 : index
    %82 = vector.load %arg7[%c144, %c0_52] : memref<200x40xbf16, #tpu.memory_space<vmem>>, vector<8x40xbf16>
    %cst_53 = arith.constant dense<0.000000e+00> : vector<100x40xf32>
    %83 = tpu.matmul %81, %82, %cst_53 {dimension_numbers = #tpu.dot_dimension_numbers<[1], [0], [0], [1], [0, 0, 1, 1], [], []>} : vector<100x8xbf16>, vector<8x40xbf16>, vector<100x40xf32> -> vector<100x40xf32>
    %84 = arith.addf %80, %83 : vector<100x40xf32>
    %85 = vector.extract_strided_slice %68 {offsets = [48, 0], sizes = [100, 8], strides = [1, 1]} : vector<156x8xbf16> to vector<100x8xbf16>
    %c152 = arith.constant 152 : index
    %c0_54 = arith.constant 0 : index
    %86 = vector.load %arg7[%c152, %c0_54] : memref<200x40xbf16, #tpu.memory_space<vmem>>, vector<8x40xbf16>
    %cst_55 = arith.constant dense<0.000000e+00> : vector<100x40xf32>
    %87 = tpu.matmul %85, %86, %cst_55 {dimension_numbers = #tpu.dot_dimension_numbers<[1], [0], [0], [1], [0, 0, 1, 1], [], []>} : vector<100x8xbf16>, vector<8x40xbf16>, vector<100x40xf32> -> vector<100x40xf32>
    %88 = arith.addf %84, %87 : vector<100x40xf32>
    %c0_56 = arith.constant 0 : index
    %c0_57 = arith.constant 0 : index
    %c0_58 = arith.constant 0 : index
    %c0_59 = arith.constant 0 : index
    %89 = vector.load %arg6[%c0_56, %c0_57, %c0_58, %c0_59] : memref<1x1x156x8xbf16, #tpu.memory_space<vmem>>, vector<1x1x156x8xbf16>
    %90 = vector.shape_cast %89 : vector<1x1x156x8xbf16> to vector<156x8xbf16>
    %91 = vector.extract_strided_slice %90 {offsets = [0, 0], sizes = [100, 8], strides = [1, 1]} : vector<156x8xbf16> to vector<100x8xbf16>
    %c160 = arith.constant 160 : index
    %c0_60 = arith.constant 0 : index
    %92 = vector.load %arg7[%c160, %c0_60] : memref<200x40xbf16, #tpu.memory_space<vmem>>, vector<8x40xbf16>
    %cst_61 = arith.constant dense<0.000000e+00> : vector<100x40xf32>
    %93 = tpu.matmul %91, %92, %cst_61 {dimension_numbers = #tpu.dot_dimension_numbers<[1], [0], [0], [1], [0, 0, 1, 1], [], []>} : vector<100x8xbf16>, vector<8x40xbf16>, vector<100x40xf32> -> vector<100x40xf32>
    %94 = arith.addf %88, %93 : vector<100x40xf32>
    %95 = vector.extract_strided_slice %90 {offsets = [12, 0], sizes = [100, 8], strides = [1, 1]} : vector<156x8xbf16> to vector<100x8xbf16>
    %c168 = arith.constant 168 : index
    %c0_62 = arith.constant 0 : index
    %96 = vector.load %arg7[%c168, %c0_62] : memref<200x40xbf16, #tpu.memory_space<vmem>>, vector<8x40xbf16>
    %cst_63 = arith.constant dense<0.000000e+00> : vector<100x40xf32>
    %97 = tpu.matmul %95, %96, %cst_63 {dimension_numbers = #tpu.dot_dimension_numbers<[1], [0], [0], [1], [0, 0, 1, 1], [], []>} : vector<100x8xbf16>, vector<8x40xbf16>, vector<100x40xf32> -> vector<100x40xf32>
    %98 = arith.addf %94, %97 : vector<100x40xf32>
    %99 = vector.extract_strided_slice %90 {offsets = [24, 0], sizes = [100, 8], strides = [1, 1]} : vector<156x8xbf16> to vector<100x8xbf16>
    %c176 = arith.constant 176 : index
    %c0_64 = arith.constant 0 : index
    %100 = vector.load %arg7[%c176, %c0_64] : memref<200x40xbf16, #tpu.memory_space<vmem>>, vector<8x40xbf16>
    %cst_65 = arith.constant dense<0.000000e+00> : vector<100x40xf32>
    %101 = tpu.matmul %99, %100, %cst_65 {dimension_numbers = #tpu.dot_dimension_numbers<[1], [0], [0], [1], [0, 0, 1, 1], [], []>} : vector<100x8xbf16>, vector<8x40xbf16>, vector<100x40xf32> -> vector<100x40xf32>
    %102 = arith.addf %98, %101 : vector<100x40xf32>
    %103 = vector.extract_strided_slice %90 {offsets = [36, 0], sizes = [100, 8], strides = [1, 1]} : vector<156x8xbf16> to vector<100x8xbf16>
    %c184 = arith.constant 184 : index
    %c0_66 = arith.constant 0 : index
    %104 = vector.load %arg7[%c184, %c0_66] : memref<200x40xbf16, #tpu.memory_space<vmem>>, vector<8x40xbf16>
    %cst_67 = arith.constant dense<0.000000e+00> : vector<100x40xf32>
    %105 = tpu.matmul %103, %104, %cst_67 {dimension_numbers = #tpu.dot_dimension_numbers<[1], [0], [0], [1], [0, 0, 1, 1], [], []>} : vector<100x8xbf16>, vector<8x40xbf16>, vector<100x40xf32> -> vector<100x40xf32>
    %106 = arith.addf %102, %105 : vector<100x40xf32>
    %107 = vector.extract_strided_slice %90 {offsets = [48, 0], sizes = [100, 8], strides = [1, 1]} : vector<156x8xbf16> to vector<100x8xbf16>
    %c192 = arith.constant 192 : index
    %c0_68 = arith.constant 0 : index
    %108 = vector.load %arg7[%c192, %c0_68] : memref<200x40xbf16, #tpu.memory_space<vmem>>, vector<8x40xbf16>
    %cst_69 = arith.constant dense<0.000000e+00> : vector<100x40xf32>
    %109 = tpu.matmul %107, %108, %cst_69 {dimension_numbers = #tpu.dot_dimension_numbers<[1], [0], [0], [1], [0, 0, 1, 1], [], []>} : vector<100x8xbf16>, vector<8x40xbf16>, vector<100x40xf32> -> vector<100x40xf32>
    %110 = arith.addf %106, %109 : vector<100x40xf32>
    %111 = vector.extract_strided_slice %110 {offsets = [0, 0], sizes = [96, 8], strides = [1, 1]} : vector<100x40xf32> to vector<96x8xf32>
    %112 = vector.extract_strided_slice %110 {offsets = [1, 8], sizes = [96, 8], strides = [1, 1]} : vector<100x40xf32> to vector<96x8xf32>
    %113 = arith.addf %111, %112 : vector<96x8xf32>
    %114 = vector.extract_strided_slice %110 {offsets = [2, 16], sizes = [96, 8], strides = [1, 1]} : vector<100x40xf32> to vector<96x8xf32>
    %115 = arith.addf %113, %114 : vector<96x8xf32>
    %116 = vector.extract_strided_slice %110 {offsets = [3, 24], sizes = [96, 8], strides = [1, 1]} : vector<100x40xf32> to vector<96x8xf32>
    %117 = arith.addf %115, %116 : vector<96x8xf32>
    %118 = vector.extract_strided_slice %110 {offsets = [4, 32], sizes = [96, 8], strides = [1, 1]} : vector<100x40xf32> to vector<96x8xf32>
    %119 = arith.addf %117, %118 : vector<96x8xf32>
    %c0_70 = arith.constant 0 : index
    %c0_71 = arith.constant 0 : index
    %120 = vector.load %arg9[%c0_70, %c0_71] : memref<1x8xf32, #tpu.memory_space<vmem>>, vector<1x8xf32>
    %121 = vector.broadcast %120 : vector<1x8xf32> to vector<96x8xf32>
    %122 = arith.addf %119, %121 : vector<96x8xf32>
    %123 = arith.truncf %122 : vector<96x8xf32> to vector<96x8xbf16>
    %c0_72 = arith.constant 0 : index
    %c0_73 = arith.constant 0 : index
    %c0_74 = arith.constant 0 : index
    %c0_75 = arith.constant 0 : index
    %124 = vector.load %arg10[%c0_72, %c0_73, %c0_74, %c0_75] : memref<1x1x96x8xbf16, #tpu.memory_space<vmem>>, vector<1x1x96x8xbf16>
    %125 = vector.shape_cast %124 : vector<1x1x96x8xbf16> to vector<96x8xbf16>
    %126 = vector.shape_cast %123 : vector<96x8xbf16> to vector<1x1x96x8xbf16>
    tpu.vector_store %arg10[%c0_72, %c0_73, %c0_74, %c0_75], %126 {strides = array<i32>} : memref<1x1x96x8xbf16, #tpu.memory_space<vmem>>, vector<1x1x96x8xbf16>,
    %c0_76 = arith.constant 0 : index
    %c0_77 = arith.constant 0 : index
    %127 = vector.load %arg8[%c0_76, %c0_77] : memref<96x1xf32, #tpu.memory_space<vmem>>, vector<96x1xf32>
    %128 = vector.broadcast %127 : vector<96x1xf32> to vector<96x8xf32>
    %129 = arith.mulf %122, %128 : vector<96x8xf32>
    %cst_78 = arith.constant dense<0.000000e+00> : vector<8xf32>
    %130 = vector.multi_reduction <add>, %129, %cst_78 [0] : vector<96x8xf32> to vector<8xf32>
    %131 = vector.shape_cast %130 : vector<8xf32> to vector<1x8xf32>
    %c0_79 = arith.constant 0 : index
    %c0_80 = arith.constant 0 : index
    %c0_81 = arith.constant 0 : index
    %c0_82 = arith.constant 0 : index
    %132 = vector.load %arg11[%c0_79, %c0_80, %c0_81, %c0_82] : memref<1x1x1x8xf32, #tpu.memory_space<vmem>>, vector<1x1x1x8xf32>
    %133 = vector.shape_cast %132 : vector<1x1x1x8xf32> to vector<1x8xf32>
    %134 = vector.shape_cast %131 : vector<1x8xf32> to vector<1x1x1x8xf32>
    tpu.vector_store %arg11[%c0_79, %c0_80, %c0_81, %c0_82], %134 {strides = array<i32>} : memref<1x1x1x8xf32, #tpu.memory_space<vmem>>, vector<1x1x1x8xf32>,
    %135 = arith.mulf %129, %122 : vector<96x8xf32>
    %cst_83 = arith.constant dense<0.000000e+00> : vector<8xf32>
    %136 = vector.multi_reduction <add>, %135, %cst_83 [0] : vector<96x8xf32> to vector<8xf32>
    %137 = vector.shape_cast %136 : vector<8xf32> to vector<1x8xf32>
    %c0_84 = arith.constant 0 : index
    %c0_85 = arith.constant 0 : index
    %c0_86 = arith.constant 0 : index
    %c0_87 = arith.constant 0 : index
    %138 = vector.load %arg12[%c0_84, %c0_85, %c0_86, %c0_87] : memref<1x1x1x8xf32, #tpu.memory_space<vmem>>, vector<1x1x1x8xf32>
    %139 = vector.shape_cast %138 : vector<1x1x1x8xf32> to vector<1x8xf32>
    %140 = vector.shape_cast %137 : vector<1x8xf32> to vector<1x1x1x8xf32>
    tpu.vector_store %arg12[%c0_84, %c0_85, %c0_86, %c0_87], %140 {strides = array<i32>} : memref<1x1x1x8xf32, #tpu.memory_space<vmem>>, vector<1x1x1x8xf32>,
    return
  }
  func.func @transform_0(%arg0: i32, %arg1: i32) -> (i32, i32, i32, i32) {
    %c0_i32 = arith.constant 0 : i32
    %0 = arith.addi %arg1, %c0_i32 : i32
    %c0_i32_0 = arith.constant 0 : i32
    %c0_i32_1 = arith.constant 0 : i32
    %c0_i32_2 = arith.constant 0 : i32
    return %arg0, %0, %c0_i32_0, %c0_i32_1 : i32, i32, i32, i32
  }
  func.func @transform_1(%arg0: i32, %arg1: i32) -> (i32, i32, i32, i32) {
    %c1_i32 = arith.constant 1 : i32
    %0 = arith.addi %arg1, %c1_i32 : i32
    %c0_i32 = arith.constant 0 : i32
    %c0_i32_0 = arith.constant 0 : i32
    %c0_i32_1 = arith.constant 0 : i32
    return %arg0, %0, %c0_i32, %c0_i32_0 : i32, i32, i32, i32
  }
  func.func @transform_2(%arg0: i32, %arg1: i32) -> (i32, i32, i32, i32) {
    %c2_i32 = arith.constant 2 : i32
    %0 = arith.addi %arg1, %c2_i32 : i32
    %c0_i32 = arith.constant 0 : i32
    %c0_i32_0 = arith.constant 0 : i32
    %c0_i32_1 = arith.constant 0 : i32
    return %arg0, %0, %c0_i32, %c0_i32_0 : i32, i32, i32, i32
  }
  func.func @transform_3(%arg0: i32, %arg1: i32) -> (i32, i32, i32, i32) {
    %c3_i32 = arith.constant 3 : i32
    %0 = arith.addi %arg1, %c3_i32 : i32
    %c0_i32 = arith.constant 0 : i32
    %c0_i32_0 = arith.constant 0 : i32
    %c0_i32_1 = arith.constant 0 : i32
    return %arg0, %0, %c0_i32, %c0_i32_0 : i32, i32, i32, i32
  }
  func.func @transform_4(%arg0: i32, %arg1: i32) -> (i32, i32, i32, i32) {
    %c4_i32 = arith.constant 4 : i32
    %0 = arith.addi %arg1, %c4_i32 : i32
    %c0_i32 = arith.constant 0 : i32
    %c0_i32_0 = arith.constant 0 : i32
    %c0_i32_1 = arith.constant 0 : i32
    return %arg0, %0, %c0_i32, %c0_i32_0 : i32, i32, i32, i32
  }
  func.func @transform_5(%arg0: i32, %arg1: i32) -> (i32, i32) {
    %c0_i32 = arith.constant 0 : i32
    %c0_i32_0 = arith.constant 0 : i32
    %c0_i32_1 = arith.constant 0 : i32
    return %c0_i32, %c0_i32_0 : i32, i32
  }
  func.func @transform_6(%arg0: i32, %arg1: i32) -> (i32, i32) {
    %c0_i32 = arith.constant 0 : i32
    %c0_i32_0 = arith.constant 0 : i32
    %c0_i32_1 = arith.constant 0 : i32
    return %c0_i32, %c0_i32_0 : i32, i32
  }
  func.func @transform_7(%arg0: i32, %arg1: i32) -> (i32, i32) {
    %c0_i32 = arith.constant 0 : i32
    %c0_i32_0 = arith.constant 0 : i32
    %c0_i32_1 = arith.constant 0 : i32
    return %c0_i32, %c0_i32_0 : i32, i32
  }
  func.func @transform_8(%arg0: i32, %arg1: i32) -> (i32, i32, i32, i32) {
    %c0_i32 = arith.constant 0 : i32
    %c0_i32_0 = arith.constant 0 : i32
    %c0_i32_1 = arith.constant 0 : i32
    return %arg0, %arg1, %c0_i32, %c0_i32_0 : i32, i32, i32, i32
  }
  func.func @transform_9(%arg0: i32, %arg1: i32) -> (i32, i32, i32, i32) {
    %c0_i32 = arith.constant 0 : i32
    %c0_i32_0 = arith.constant 0 : i32
    %c0_i32_1 = arith.constant 0 : i32
    return %arg0, %arg1, %c0_i32, %c0_i32_0 : i32, i32, i32, i32
  }
  func.func @transform_10(%arg0: i32, %arg1: i32) -> (i32, i32, i32, i32) {
    %c0_i32 = arith.constant 0 : i32
    %c0_i32_0 = arith.constant 0 : i32
    %c0_i32_1 = arith.constant 0 : i32
    return %arg0, %arg1, %c0_i32, %c0_i32_0 : i32, i32, i32, i32
  }
}

module attributes {stable_mosaic.version = 11 : i64} {
  func.func @_bn_elu_kernel(%arg0: i32, %arg1: memref<96x128xbf16, #tpu.memory_space<vmem>>, %arg2: memref<1x128xf32, #tpu.memory_space<vmem>>, %arg3: memref<1x128xf32, #tpu.memory_space<vmem>>, %arg4: memref<96x128xbf16, #tpu.memory_space<vmem>>) attributes {dimension_semantics = [#tpu.dimension_semantics<parallel>], iteration_bounds = array<i64: 1>, scalar_prefetch = 0 : i64, scratch_operands = 0 : i64, tpu.core_type = #tpu.core_type<tc>, window_params = [{transform_indices = @transform_0, window_bounds = array<i64: 96, 128>}, {pipeline_mode = #tpu.pipeline_mode<synchronous>, transform_indices = @transform_1, window_bounds = array<i64: 1, 128>}, {pipeline_mode = #tpu.pipeline_mode<synchronous>, transform_indices = @transform_2, window_bounds = array<i64: 1, 128>}, {transform_indices = @transform_3, window_bounds = array<i64: 96, 128>}]} {
    %c0 = arith.constant 0 : index
    %c0_0 = arith.constant 0 : index
    %0 = vector.load %arg1[%c0, %c0_0] : memref<96x128xbf16, #tpu.memory_space<vmem>>, vector<96x128xbf16>
    %1 = arith.extf %0 : vector<96x128xbf16> to vector<96x128xf32>
    %c0_1 = arith.constant 0 : index
    %c0_2 = arith.constant 0 : index
    %2 = vector.load %arg2[%c0_1, %c0_2] : memref<1x128xf32, #tpu.memory_space<vmem>>, vector<1x128xf32>
    %3 = vector.broadcast %2 : vector<1x128xf32> to vector<96x128xf32>
    %4 = arith.mulf %1, %3 : vector<96x128xf32>
    %c0_3 = arith.constant 0 : index
    %c0_4 = arith.constant 0 : index
    %5 = vector.load %arg3[%c0_3, %c0_4] : memref<1x128xf32, #tpu.memory_space<vmem>>, vector<1x128xf32>
    %6 = vector.broadcast %5 : vector<1x128xf32> to vector<96x128xf32>
    %7 = arith.addf %4, %6 : vector<96x128xf32>
    %cst = arith.constant 0.000000e+00 : f32
    %8 = vector.broadcast %cst : f32 to vector<96x128xf32>
    %9 = arith.cmpf ogt, %7, %8 : vector<96x128xf32>
    %cst_5 = arith.constant 0.000000e+00 : f32
    %10 = vector.broadcast %cst_5 : f32 to vector<96x128xf32>
    %11 = arith.minimumf %7, %10 : vector<96x128xf32>
    %12 = math.exp %11 : vector<96x128xf32>
    %cst_6 = arith.constant 1.000000e+00 : f32
    %13 = vector.broadcast %cst_6 : f32 to vector<96x128xf32>
    %14 = arith.subf %12, %13 : vector<96x128xf32>
    %15 = arith.select %9, %7, %14 : vector<96x128xi1>, vector<96x128xf32>
    %16 = arith.truncf %15 : vector<96x128xf32> to vector<96x128xbf16>
    %c0_7 = arith.constant 0 : index
    %c0_8 = arith.constant 0 : index
    %17 = vector.load %arg4[%c0_7, %c0_8] : memref<96x128xbf16, #tpu.memory_space<vmem>>, vector<96x128xbf16>
    tpu.vector_store %arg4[%c0_7, %c0_8], %16 {strides = array<i32>} : memref<96x128xbf16, #tpu.memory_space<vmem>>, vector<96x128xbf16>,
    return
  }
  func.func @transform_0(%arg0: i32) -> (i32, i32) {
    %c0_i32 = arith.constant 0 : i32
    %c0_i32_0 = arith.constant 0 : i32
    return %arg0, %c0_i32 : i32, i32
  }
  func.func @transform_1(%arg0: i32) -> (i32, i32) {
    %c0_i32 = arith.constant 0 : i32
    %c0_i32_0 = arith.constant 0 : i32
    %c0_i32_1 = arith.constant 0 : i32
    return %c0_i32, %c0_i32_0 : i32, i32
  }
  func.func @transform_2(%arg0: i32) -> (i32, i32) {
    %c0_i32 = arith.constant 0 : i32
    %c0_i32_0 = arith.constant 0 : i32
    %c0_i32_1 = arith.constant 0 : i32
    return %c0_i32, %c0_i32_0 : i32, i32
  }
  func.func @transform_3(%arg0: i32) -> (i32, i32) {
    %c0_i32 = arith.constant 0 : i32
    %c0_i32_0 = arith.constant 0 : i32
    return %arg0, %c0_i32 : i32, i32
  }
}

module attributes {stable_mosaic.version = 11 : i64} {
  func.func @_bn_elu_res_kernel(%arg0: i32, %arg1: memref<96x128xbf16, #tpu.memory_space<vmem>>, %arg2: memref<96x128xbf16, #tpu.memory_space<vmem>>, %arg3: memref<1x128xf32, #tpu.memory_space<vmem>>, %arg4: memref<1x128xf32, #tpu.memory_space<vmem>>, %arg5: memref<96x128xf32, #tpu.memory_space<vmem>>) attributes {dimension_semantics = [#tpu.dimension_semantics<parallel>], iteration_bounds = array<i64: 1>, scalar_prefetch = 0 : i64, scratch_operands = 0 : i64, tpu.core_type = #tpu.core_type<tc>, window_params = [{transform_indices = @transform_0, window_bounds = array<i64: 96, 128>}, {transform_indices = @transform_1, window_bounds = array<i64: 96, 128>}, {pipeline_mode = #tpu.pipeline_mode<synchronous>, transform_indices = @transform_2, window_bounds = array<i64: 1, 128>}, {pipeline_mode = #tpu.pipeline_mode<synchronous>, transform_indices = @transform_3, window_bounds = array<i64: 1, 128>}, {transform_indices = @transform_4, window_bounds = array<i64: 96, 128>}]} {
    %c0 = arith.constant 0 : index
    %c0_0 = arith.constant 0 : index
    %0 = vector.load %arg1[%c0, %c0_0] : memref<96x128xbf16, #tpu.memory_space<vmem>>, vector<96x128xbf16>
    %1 = arith.extf %0 : vector<96x128xbf16> to vector<96x128xf32>
    %c0_1 = arith.constant 0 : index
    %c0_2 = arith.constant 0 : index
    %2 = vector.load %arg2[%c0_1, %c0_2] : memref<96x128xbf16, #tpu.memory_space<vmem>>, vector<96x128xbf16>
    %3 = arith.extf %2 : vector<96x128xbf16> to vector<96x128xf32>
    %c0_3 = arith.constant 0 : index
    %c0_4 = arith.constant 0 : index
    %4 = vector.load %arg3[%c0_3, %c0_4] : memref<1x128xf32, #tpu.memory_space<vmem>>, vector<1x128xf32>
    %5 = vector.broadcast %4 : vector<1x128xf32> to vector<96x128xf32>
    %6 = arith.mulf %1, %5 : vector<96x128xf32>
    %c0_5 = arith.constant 0 : index
    %c0_6 = arith.constant 0 : index
    %7 = vector.load %arg4[%c0_5, %c0_6] : memref<1x128xf32, #tpu.memory_space<vmem>>, vector<1x128xf32>
    %8 = vector.broadcast %7 : vector<1x128xf32> to vector<96x128xf32>
    %9 = arith.addf %6, %8 : vector<96x128xf32>
    %cst = arith.constant 0.000000e+00 : f32
    %10 = vector.broadcast %cst : f32 to vector<96x128xf32>
    %11 = arith.cmpf ogt, %9, %10 : vector<96x128xf32>
    %cst_7 = arith.constant 0.000000e+00 : f32
    %12 = vector.broadcast %cst_7 : f32 to vector<96x128xf32>
    %13 = arith.minimumf %9, %12 : vector<96x128xf32>
    %14 = math.exp %13 : vector<96x128xf32>
    %cst_8 = arith.constant 1.000000e+00 : f32
    %15 = vector.broadcast %cst_8 : f32 to vector<96x128xf32>
    %16 = arith.subf %14, %15 : vector<96x128xf32>
    %17 = arith.select %11, %9, %16 : vector<96x128xi1>, vector<96x128xf32>
    %18 = arith.addf %17, %3 : vector<96x128xf32>
    %cst_9 = arith.constant 0.000000e+00 : f32
    %19 = vector.broadcast %cst_9 : f32 to vector<96x128xf32>
    %20 = arith.cmpf ogt, %18, %19 : vector<96x128xf32>
    %cst_10 = arith.constant 0.000000e+00 : f32
    %21 = vector.broadcast %cst_10 : f32 to vector<96x128xf32>
    %22 = arith.minimumf %18, %21 : vector<96x128xf32>
    %23 = math.exp %22 : vector<96x128xf32>
    %cst_11 = arith.constant 1.000000e+00 : f32
    %24 = vector.broadcast %cst_11 : f32 to vector<96x128xf32>
    %25 = arith.subf %23, %24 : vector<96x128xf32>
    %26 = arith.select %20, %18, %25 : vector<96x128xi1>, vector<96x128xf32>
    %c0_12 = arith.constant 0 : index
    %c0_13 = arith.constant 0 : index
    %27 = vector.load %arg5[%c0_12, %c0_13] : memref<96x128xf32, #tpu.memory_space<vmem>>, vector<96x128xf32>
    tpu.vector_store %arg5[%c0_12, %c0_13], %26 {strides = array<i32>} : memref<96x128xf32, #tpu.memory_space<vmem>>, vector<96x128xf32>,
    return
  }
  func.func @transform_0(%arg0: i32) -> (i32, i32) {
    %c0_i32 = arith.constant 0 : i32
    %c0_i32_0 = arith.constant 0 : i32
    return %arg0, %c0_i32 : i32, i32
  }
  func.func @transform_1(%arg0: i32) -> (i32, i32) {
    %c0_i32 = arith.constant 0 : i32
    %c0_i32_0 = arith.constant 0 : i32
    return %arg0, %c0_i32 : i32, i32
  }
  func.func @transform_2(%arg0: i32) -> (i32, i32) {
    %c0_i32 = arith.constant 0 : i32
    %c0_i32_0 = arith.constant 0 : i32
    %c0_i32_1 = arith.constant 0 : i32
    return %c0_i32, %c0_i32_0 : i32, i32
  }
  func.func @transform_3(%arg0: i32) -> (i32, i32) {
    %c0_i32 = arith.constant 0 : i32
    %c0_i32_0 = arith.constant 0 : i32
    %c0_i32_1 = arith.constant 0 : i32
    return %c0_i32, %c0_i32_0 : i32, i32
  }
  func.func @transform_4(%arg0: i32) -> (i32, i32) {
    %c0_i32 = arith.constant 0 : i32
    %c0_i32_0 = arith.constant 0 : i32
    return %arg0, %c0_i32 : i32, i32
  }
}

</mosaic_0001>

<bundles_post_ra>
// kernel: tile.33
= control target key start
LH: loop header
LB: loop body
LE: loop exit
PB: predicated region body
PF: predicated region fallthrough
CT: control target
= control target key end

     0   :  { %s28_s0 = inlined_call_operand.vmem [shape: f32[8], index: 0, kind: input, shape index: {}]   ;;  %s29_s1 = inlined_call_operand.vmem [shape: f32[16,8], index: 1, kind: output, shape index: {}]  }
   0x1   :  { %v4_v0 = vld [vmem:[%s28_s0] ss:$0 sm:$0xff] }
   0x2   :  { %5 = vst [vmem:[%s29_s1] sm:$0xff] %v4_v0 }
   0x3   :  { %8 = vst [vmem:[%s29_s1 + $0x8] sm:$0xff] %v4_v0 }

// kernel: tile.34
= control target key start
LH: loop header
LB: loop body
LE: loop exit
PB: predicated region body
PF: predicated region fallthrough
CT: control target
= control target key end

     0   :  { %s131_s10 = smov 120   ;;  %s132_s11 = smov 104   ;;  %vm3_vm0 = vcmask 64512   ;;  %vm9_vm1 = vcmask 1048512   ;;  %vm15_vm2 = vcmask 982912   ;;  %vm21_vm3 = vcmask 917312   ;;  %s207_s0 = inlined_call_operand.vmem [shape: f32[16,8], index: 0, kind: input, shape index: {}]   ;;  %s208_s1 = inlined_call_operand.vmem [shape: f32[1,128], index: 1, kind: output, shape index: {}]  }
   0x1   :  { %v101_v0 = vld [vmem:[%s207_s0 + $0xf] sm:$0x1]   ;;  %v103_v1 = vld [vmem:[%s207_s0 + $0xd] sm:$0x1]   ;;  %v105_v2 = vld [vmem:[%s207_s0 + $0xb] sm:$0x1]  }
   0x2   :  { %7 = vrot.lane.b32.xlu0 %v101_v0, %s131_s10  ;;  %19 = vrot.lane.b32.xlu1 %v103_v1, %s132_s11  ;;  %s133_s14 = smov 88   ;;  %v102_v3 = vld [vmem:[%s207_s0 + $0xe] sm:$0x1]   ;;  %v104_v4 = vld [vmem:[%s207_s0 + $0xc] sm:$0x1]   ;;  %s134_s19 = smov 112  }
   0x3   :  { %31 = vrot.lane.b32.xlu2 %v105_v2, %s133_s14  ;;  %s135_s20 = smov 96   ;;  %v106_v5 = vld [vmem:[%s207_s0 + $0xa] sm:$0x1]   ;;  %s136_s23 = smov 80   ;;  %v107_v6 = vld [vmem:[%s207_s0 + $0x9] sm:$0x1]  }
   0x4   :  { %v108_v7 = vld [vmem:[%s207_s0 + $0x8] sm:$0x1]   ;;  %s137_s28 = smov 72   ;;  %s138_s29 = smov 64   ;;  %v109_v8 = vld [vmem:[%s207_s0 + $0x7] sm:$0x1]  }
   0x5   :  { %s139_s3 = smov 56   ;;  %v110_v9 = vld [vmem:[%s207_s0 + $0x6] sm:$0x1]   ;;  %v111_v10 = vld [vmem:[%s207_s0 + $0x5] sm:$0x1]   ;;  %s140_s8 = smov 48  }
   0x6   :  { %s141_s9 = smov 40   ;;  %v112_v11 = vld [vmem:[%s207_s0 + $0x4] sm:$0x1]   ;;  %s142_s12 = smov 32   ;;  %v113_v12 = vld [vmem:[%s207_s0 + $0x3] sm:$0x1]  }
   0x7   :  { %v114_v13 = vld [vmem:[%s207_s0 + $0x2] sm:$0x1]   ;;  %s143_s17 = smov 24   ;;  %s144_s18 = smov 16   ;;  %v115_v14 = vld [vmem:[%s207_s0 + $0x1] sm:$0x1]  }
   0x8   :  { %s145_s21 = smov 8   ;;  %v2_v15 = vld [vmem:[%s207_s0] sm:$0x1]   ;;  %vm27_vm4 = vcmask 851712   ;;  %vm33_vm5 = vcmask 786112   ;;  %vm39_vm6 = vcmask 720512  }
   0x9   :  { %4 = vst.msk [vmem:[#allocation0] sm:$0x1] %vm3_vm0, %v2_v15   ;;  %vm45_vm7 = vcmask 654912   ;;  %vm51_vm8 = vcmask 589312   ;;  %vm57_vm9 = vcmask 523712   ;;  %vm63_vm10 = vcmask 458112  }
   0xa   :  { %13 = vrot.lane.b32.xlu0 %v102_v3, %s134_s19  ;;  %25 = vrot.lane.b32.xlu1 %v104_v4, %s135_s20  ;;  %vm69_vm11 = vcmask 392512   ;;  %vm75_vm12 = vcmask 326912   ;;  %vm81_vm13 = vcmask 261312   ;;  %vm87_vm14 = vcmask 195712  }
   0xb   :  { %37 = vrot.lane.b32.xlu2 %v106_v5, %s136_s23  ;;  %vm93_vm15 = vcmask 130112  }
  0x12   :  { %43 = vrot.lane.b32.xlu0 %v107_v6, %s137_s28  ;;  %49 = vrot.lane.b32.xlu1 %v108_v7, %s138_s29 }
  0x13   :  { %55 = vrot.lane.b32.xlu2 %v109_v8, %s139_s3 }
  0x1a   :  { %61 = vrot.lane.b32.xlu0 %v110_v9, %s140_s8  ;;  %67 = vrot.lane.b32.xlu1 %v111_v10, %s141_s9 }
  0x1b   :  { %73 = vrot.lane.b32.xlu2 %v112_v11, %s142_s12 }
  0x22   :  { %79 = vrot.lane.b32.xlu0 %v113_v12, %s143_s17  ;;  %85 = vrot.lane.b32.xlu1 %v114_v13, %s144_s18 }
  0x23   :  { %91 = vrot.lane.b32.xlu2 %v115_v14, %s145_s21 }
  0x5d   :  { %v32_v16 = vpop.permute.xlu2 %31  }
  0x65   :  { %v38_v17 = vpop.permute.xlu2 %37  }
  0x6d   :  { %v56_v18 = vpop.permute.xlu2 %55  }
  0x74   :  { %v8_v19 = vpop.permute.xlu0 %7   ;;  %v20_v20 = vpop.permute.xlu1 %19  }
  0x75   :  { %10 = vst.msk [vmem:[#allocation0] sm:$0x1] %vm9_vm1, %v8_v19   ;;  %v74_v21 = vpop.permute.xlu2 %73  }
  0x7c   :  { %v14_v22 = vpop.permute.xlu0 %13   ;;  %v26_v23 = vpop.permute.xlu1 %25  }
  0x7d   :  { %16 = vst.msk [vmem:[#allocation0] sm:$0x1] %vm15_vm2, %v14_v22   ;;  %v92_v24 = vpop.permute.xlu2 %91  }
  0x7e   :  { %22 = vst.msk [vmem:[#allocation0] sm:$0x1] %vm21_vm3, %v20_v20  }
  0x7f   :  { %28 = vst.msk [vmem:[#allocation0] sm:$0x1] %vm27_vm4, %v26_v23  }
  0x80   :  { %34 = vst.msk [vmem:[#allocation0] sm:$0x1] %vm33_vm5, %v32_v16  }
  0x81   :  { %40 = vst.msk [vmem:[#allocation0] sm:$0x1] %vm39_vm6, %v38_v17  }
  0x84   :  { %v44_v25 = vpop.permute.xlu0 %43   ;;  %v50_v26 = vpop.permute.xlu1 %49  }
  0x85   :  { %46 = vst.msk [vmem:[#allocation0] sm:$0x1] %vm45_vm7, %v44_v25  }
  0x86   :  { %52 = vst.msk [vmem:[#allocation0] sm:$0x1] %vm51_vm8, %v50_v26  }
  0x87   :  { %58 = vst.msk [vmem:[#allocation0] sm:$0x1] %vm57_vm9, %v56_v18  }
  0x8c   :  { %v62_v27 = vpop.permute.xlu0 %61   ;;  %v68_v28 = vpop.permute.xlu1 %67  }
  0x8d   :  { %64 = vst.msk [vmem:[#allocation0] sm:$0x1] %vm63_vm10, %v62_v27  }
  0x8e   :  { %70 = vst.msk [vmem:[#allocation0] sm:$0x1] %vm69_vm11, %v68_v28  }
  0x8f   :  { %76 = vst.msk [vmem:[#allocation0] sm:$0x1] %vm75_vm12, %v74_v21  }
  0x94   :  { %v80_v29 = vpop.permute.xlu0 %79   ;;  %v86_v30 = vpop.permute.xlu1 %85  }
  0x95   :  { %82 = vst.msk [vmem:[#allocation0] sm:$0x1] %vm81_vm13, %v80_v29  }
  0x96   :  { %88 = vst.msk [vmem:[#allocation0] sm:$0x1] %vm87_vm14, %v86_v30  }
  0x97   :  { %94 = vst.msk [vmem:[#allocation0] sm:$0x1] %vm93_vm15, %v92_v24  }
  0x9e   :  { %v97_v31 = vld [vmem:[#allocation0] sm:$0x1] }
  0x9f   :  { %100 = vst [vmem:[%s208_s1] sm:$0x1] %v97_v31 }

// kernel: down_transition_forward.6
= control target key start
LH: loop header
LB: loop body
LE: loop exit
PB: predicated region body
PF: predicated region fallthrough
CT: control target
= control target key end

     0   :  { %s1591_s18 = smov 0   ;;  %s2423_s0 = inlined_call_operand.vmem [shape: bf16[1024,32], index: 0, kind: input, shape index: {}]   ;;  %s2424_s1 = inlined_call_operand.vmem [shape: bf16[32,8], index: 1, kind: input, shape index: {}]   ;;  %s2425_s2 = inlined_call_operand.vmem [shape: f32[1,8], index: 2, kind: input, shape index: {}]   ;;  %s2426_s3 = inlined_call_operand.vmem [shape: bf16[1024,8], index: 3, kind: output, shape index: {0}]   ;;  %s2427_s4 = inlined_call_operand.vmem [shape: f32[2,1,8], index: 4, kind: output, shape index: {1}]   ;;  %s2428_s5 = inlined_call_operand.vmem [shape: f32[2,1,8], index: 5, kind: output, shape index: {2}]  }
   0x1 LB: > { %s1597_s19 = sadd.s32 4294967295, %s1559_s18   ;;  %p1329_p0 = scmp.ge.s32.totalorder %s1559_s18, 1  ;;  %s1559_s18 = sphi %s1591_s18, %s16_s18  }
   0x2   : > { %p193_p1 = scmp.lt.s32.totalorder %s1559_s18, 3 }
   0x4   : > { %p194_p2 = pnand %p1329_p0, %p193_p1 }
   0x5   : > { %s1330_s22 = sshll.u32 (!%p194_p2), %s1597_s19, 6  ;;  %p239_p4 = scmp.lt.s32.totalorder (!%p194_p2), %s1597_s19, 1 }
   0x6   : > { %197 = sbr.rel (%p194_p2) target bundleno = 381 (0x17d), region = 32  ;;  %p228_p3 = scmp.lt.s32.totalorder (!%p194_p2), %s1330_s22, 127 }
   0xb   : > { %v1537_v0 = vld [vmem:[%s2424_s1 + $0x8] sm:$0xff]  ;;  %v1536_v1 = vld [vmem:[%s2424_s1] sm:$0xff]  ;;  %s2430_s22 = smov (!%p228_p3, %s1330_s22), 127  ;;  %vm490_vm0 = vcmask 261120   ;;  %vm820_vm1 = vcmask 60416   ;;  %vm885_vm2 = vcmask 64512  }
   0xc   : > { %593 = vmatpush.bf16.msra.mxu0 %v1537_v0  ;;  %1538 = vmatpush.bf16.msra.mxu1 %v1537_v0  ;;  %s1331_s25 = sshll.u32 %s2430_s22, 2  ;;  %v1677_v30 = vld [vmem:[%s2425_s2] ss:$0 sm:$0xff]  ;;  %s2432_s19 = smov (!%p239_p4, %s1597_s19), 1  ;;  %vm1019_vm3 = vcmask 57344  }
   0xd   : > { %1539 = vmatpush.bf16.msra.mxu2 %v1537_v0  ;;  %1540 = vmatpush.bf16.msra.mxu3 %v1537_v0  ;;  %s1616_s28 = scalar_lea.vmem %s2423_s0, %s1331_s25  ;;  %s1688_s8 = scalar_lea.vmem %s2426_s3, %s1331_s25 }
   0xe   : > { %v1504_v2 = vld [vmem:[%s1616_s28] sm:$0xff]  ;;  %v1505_v4 = vld [vmem:[%s1616_s28 + $0x8] sm:$0xff]  ;;  %v1506_v7 = vld [vmem:[%s1616_s28 + $0x10] sm:$0xff]  ;;  %s241_s11 = scalar_lea.vmem %s2427_s4, %s2432_s19  ;;  %s244_s14 = scalar_lea.vmem %s2428_s5, %s2432_s19 }
   0xf   : > { %v1512_v3 = vld [vmem:[%s1616_s28 + $0x40] sm:$0xff]  ;;  %v1513_v5 = vld [vmem:[%s1616_s28 + $0x48] sm:$0xff]  ;;  %v1514_v8 = vld [vmem:[%s1616_s28 + $0x50] sm:$0xff] }
  0x10   : > { %594 = vmatpush.bf16.msra.mxu0 %v1536_v1  ;;  %1541 = vmatpush.bf16.msra.mxu1 %v1536_v1  ;;  %v1520_v6 = vld [vmem:[%s1616_s28 + $0x80] sm:$0xff]  ;;  %v1521_v9 = vld [vmem:[%s1616_s28 + $0x88] sm:$0xff]  ;;  %v1507_v10 = vld [vmem:[%s1616_s28 + $0x18] sm:$0xff] }
  0x11   : > { %1542 = vmatpush.bf16.msra.mxu2 %v1536_v1  ;;  %1543 = vmatpush.bf16.msra.mxu3 %v1536_v1  ;;  %v1515_v11 = vld [vmem:[%s1616_s28 + $0x58] sm:$0xff]  ;;  %v1522_v12 = vld [vmem:[%s1616_s28 + $0x90] sm:$0xff]  ;;  %v1528_v13 = vld [vmem:[%s1616_s28 + $0xc0] sm:$0xff] }
  0x12   : > { %v1508_v14 = vld [vmem:[%s1616_s28 + $0x20] sm:$0xff]  ;;  %v1523_v16 = vld [vmem:[%s1616_s28 + $0x98] sm:$0xff]  ;;  %v1529_v17 = vld [vmem:[%s1616_s28 + $0xc8] sm:$0xff] }
  0x13   : > { %1470 = vmatmul.msk.bf16.vlgmr.msra.gmra.mxu0 %vm490_vm0, %v1504_v2  ;;  %1478 = vmatmul.msk.bf16.vlgmr.msra.gmra.mxu1 %vm490_vm0, %v1512_v3  ;;  %v1516_v15 = vld [vmem:[%s1616_s28 + $0x60] sm:$0xff]  ;;  %v1509_v18 = vld [vmem:[%s1616_s28 + $0x28] sm:$0xff]  ;;  %v1530_v21 = vld [vmem:[%s1616_s28 + $0xd0] sm:$0xff] }
  0x14   : > { %1486 = vmatmul.msk.bf16.vlgmr.msra.gmra.mxu2 %vm490_vm0, %v1520_v6  ;;  %1494 = vmatmul.msk.bf16.vlgmr.msra.gmra.mxu3 %vm490_vm0, %v1528_v13  ;;  %v1517_v19 = vld [vmem:[%s1616_s28 + $0x68] sm:$0xff]  ;;  %v1524_v20 = vld [vmem:[%s1616_s28 + $0xa0] sm:$0xff]  ;;  %v1510_v22 = vld [vmem:[%s1616_s28 + $0x30] sm:$0xff] }
  0x15   : > { %v1518_v23 = vld [vmem:[%s1616_s28 + $0x70] sm:$0xff]  ;;  %v1525_v24 = vld [vmem:[%s1616_s28 + $0xa8] sm:$0xff]  ;;  %v1531_v25 = vld [vmem:[%s1616_s28 + $0xd8] sm:$0xff] }
  0x16   : > { %v1511_v26 = vld [vmem:[%s1616_s28 + $0x38] sm:$0xff]  ;;  %v1526_v28 = vld [vmem:[%s1616_s28 + $0xb0] sm:$0xff]  ;;  %v1532_v29 = vld [vmem:[%s1616_s28 + $0xe0] sm:$0xff] }
  0x17   : > { %v1519_v27 = vld [vmem:[%s1616_s28 + $0x78] sm:$0xff]  ;;  %v1533_v38 = vld [vmem:[%s1616_s28 + $0xe8] sm:$0xff]  ;;  %v1534_v61 = vld [vmem:[%s1616_s28 + $0xf0] sm:$0xff] }
  0x18   : > { %v1527_v37 = vld [vmem:[%s1616_s28 + $0xb8] sm:$0xff] }
  0x23   : > { %1471 = vmatmul.msk.bf16.gmra.mxu0 %vm490_vm0, %v1505_v4  ;;  %1479 = vmatmul.msk.bf16.gmra.mxu1 %vm490_vm0, %v1513_v5 }
  0x24   : > { %1487 = vmatmul.msk.bf16.gmra.mxu2 %vm490_vm0, %v1521_v9  ;;  %1495 = vmatmul.msk.bf16.gmra.mxu3 %vm490_vm0, %v1529_v17 }
  0x33   : > { %1472 = vmatmul.msk.bf16.gmra.mxu0 %vm490_vm0, %v1506_v7  ;;  %1480 = vmatmul.msk.bf16.gmra.mxu1 %vm490_vm0, %v1514_v8 }
  0x34   : > { %1488 = vmatmul.msk.bf16.gmra.mxu2 %vm490_vm0, %v1522_v12  ;;  %1496 = vmatmul.msk.bf16.gmra.mxu3 %vm490_vm0, %v1530_v21 }
  0x43   : > { %1473 = vmatmul.msk.bf16.gmra.mxu0 %vm490_vm0, %v1507_v10  ;;  %1481 = vmatmul.msk.bf16.gmra.mxu1 %vm490_vm0, %v1515_v11 }
  0x44   : > { %1489 = vmatmul.msk.bf16.gmra.mxu2 %vm490_vm0, %v1523_v16  ;;  %1497 = vmatmul.msk.bf16.gmra.mxu3 %vm490_vm0, %v1531_v25  ;;  %v1535_v25 = vld [vmem:[%s1616_s28 + $0xf8] sm:$0xff] }
  0x53   : > { %1474 = vmatmul.msk.bf16.gmra.mxu0 %vm490_vm0, %v1508_v14  ;;  %1482 = vmatmul.msk.bf16.gmra.mxu1 %vm490_vm0, %v1516_v15 }
  0x54   : > { %1490 = vmatmul.msk.bf16.gmra.mxu2 %vm490_vm0, %v1524_v20  ;;  %1498 = vmatmul.msk.bf16.gmra.mxu3 %vm490_vm0, %v1532_v29 }
  0x63   : > { %1475 = vmatmul.msk.bf16.gmra.mxu0 %vm490_vm0, %v1509_v18  ;;  %1483 = vmatmul.msk.bf16.gmra.mxu1 %vm490_vm0, %v1517_v19 }
  0x64   : > { %1491 = vmatmul.msk.bf16.gmra.mxu2 %vm490_vm0, %v1525_v24  ;;  %1499 = vmatmul.msk.bf16.gmra.mxu3 %vm490_vm0, %v1533_v38 }
  0x73   : > { %1476 = vmatmul.msk.bf16.gmra.mxu0 %vm490_vm0, %v1510_v22  ;;  %1484 = vmatmul.msk.bf16.gmra.mxu1 %vm490_vm0, %v1518_v23 }
  0x74   : > { %1492 = vmatmul.msk.bf16.gmra.mxu2 %vm490_vm0, %v1526_v28  ;;  %1500 = vmatmul.msk.bf16.gmra.mxu3 %vm490_vm0, %v1534_v61 }
  0x83   : > { %1477 = vmatmul.msk.bf16.gmra.mxu0 %vm490_vm0, %v1511_v26  ;;  %1485 = vmatmul.msk.bf16.gmra.mxu1 %vm490_vm0, %v1519_v27 }
  0x84   : > { %1493 = vmatmul.msk.bf16.gmra.mxu2 %vm490_vm0, %v1527_v37  ;;  %1501 = vmatmul.msk.bf16.gmra.mxu3 %vm490_vm0, %v1535_v25 }
  0x90   : > { %v596_v31 = vpop.f32.mrf.mxu0  ;;  %v636_v32 = vpop.f32.mrf.mxu1 }
  0x91   : > { %v597_v33 = vadd.f32 %v1677_v30, %v596_v31  ;;  %v1681_v34 = vadd.f32 %v1677_v30, %v636_v32 }
  0x93   : > { %v756_v35 = vpack.c.bf16 %v597_v33, %v597_v33  ;;  %v772_v36 = vpack.c.bf16 %v1681_v34, %v1681_v34  ;;  %v1021_v41 = vmul.f32 %v597_v33, %v597_v33  ;;  %v886_v44 = vsel %vm885_vm2, %v597_v33, 0.0 }
  0x95   : > { %821 = vst.msk [vmem:[%s1688_s8] sm:$0xf] %vm820_vm1, %v756_v35  ;;  %v1085_v50 = vsel %vm885_vm2, %v1021_v41, 0.0 }
  0x96   : > { %837 = vst.msk [vmem:[%s1688_s8 + $0x40] sm:$0xf] %vm820_vm1, %v772_v36 }
  0x97   : > { %v676_v5 = vpop.f32.mrf.mxu2 }
  0x98   : > { %v598_v39 = vpop.f32.mrf.mxu0  ;;  %v638_v40 = vpop.f32.mrf.mxu1  ;;  %v1741_v13 = vadd.f32 %v1677_v30, %v676_v5 }
  0x99   : > { %v599_v42 = vadd.f32 %v1677_v30, %v598_v39  ;;  %v1702_v43 = vadd.f32 %v1677_v30, %v638_v40 }
  0x9a   : > { %v788_v16 = vpack.c.bf16 %v1741_v13, %v1741_v13 }
  0x9b   : > { %v757_v45 = vpack.c.bf16 %v599_v42, %v599_v42  ;;  %v887_v46 = vsel %vm885_vm2, %v599_v42, 0.0  ;;  %v1022_v47 = vmul.f32 %v599_v42, %v599_v42  ;;  %v773_v48 = vpack.c.bf16 %v1702_v43, %v1702_v43 }
  0x9c   : > { %v888_v49 = vadd.f32 %v887_v46, %v886_v44  ;;  %853 = vst.msk [vmem:[%s1688_s8 + $0x80] sm:$0xf] %vm820_vm1, %v788_v16 }
  0x9d   : > { %822 = vst.msk [vmem:[%s1688_s8 + $0x4] sm:$0xf] %vm820_vm1, %v757_v45  ;;  %v1086_v51 = vsel %vm885_vm2, %v1022_v47, 0.0 }
  0x9e   : > { %v1087_v52 = vadd.f32 %v1086_v51, %v1085_v50  ;;  %838 = vst.msk [vmem:[%s1688_s8 + $0x44] sm:$0xf] %vm820_vm1, %v773_v48 }
  0x9f   : > { %v678_v19 = vpop.f32.mrf.mxu2 }
  0xa0   : > { %v601_v53 = vpop.f32.mrf.mxu0  ;;  %v641_v54 = vpop.f32.mrf.mxu1  ;;  %v1752_v20 = vadd.f32 %v1677_v30, %v678_v19 }
  0xa1   : > { %v602_v55 = vadd.f32 %v1677_v30, %v601_v53  ;;  %v1716_v56 = vadd.f32 %v1677_v30, %v641_v54 }
  0xa2   : > { %v789_v27 = vpack.c.bf16 %v1752_v20, %v1752_v20 }
  0xa3   : > { %v758_v57 = vpack.c.bf16 %v602_v55, %v602_v55  ;;  %v889_v58 = vsel %vm885_vm2, %v602_v55, 0.0  ;;  %v1023_v59 = vmul.f32 %v602_v55, %v602_v55  ;;  %v774_v60 = vpack.c.bf16 %v1716_v56, %v1716_v56 }
  0xa4   : > { %v890_v62 = vadd.f32 %v889_v58, %v888_v49  ;;  %854 = vst.msk [vmem:[%s1688_s8 + $0x84] sm:$0xf] %vm820_vm1, %v789_v27 }
  0xa5   : > { %823 = vst.msk [vmem:[%s1688_s8 + $0x8] sm:$0xf] %vm820_vm1, %v758_v57  ;;  %v1088_v63 = vsel %vm885_vm2, %v1023_v59, 0.0  ;;  %v716_v57 = vpop.f32.mrf.mxu3 }
  0xa6   : > { %v1089_v0 = vadd.f32 %v1088_v63, %v1087_v52  ;;  %839 = vst.msk [vmem:[%s1688_s8 + $0x48] sm:$0xf] %vm820_vm1, %v774_v60  ;;  %v1832_v61 = vadd.f32 %v1677_v30, %v716_v57 }
  0xa7   : > { %v681_v36 = vpop.f32.mrf.mxu2 }
  0xa8   : > { %v603_v1 = vpop.f32.mrf.mxu0  ;;  %v643_v2 = vpop.f32.mrf.mxu1  ;;  %v1787_v39 = vadd.f32 %v1677_v30, %v681_v36 }
  0xa9   : > { %v604_v3 = vadd.f32 %v1677_v30, %v603_v1  ;;  %v1730_v4 = vadd.f32 %v1677_v30, %v643_v2  ;;  %v804_v1 = vpack.c.bf16 %v1832_v61, %v1832_v61 }
  0xaa   : > { %v790_v42 = vpack.c.bf16 %v1787_v39, %v1787_v39 }
  0xab   : > { %v759_v6 = vpack.c.bf16 %v604_v3, %v604_v3  ;;  %v891_v7 = vsel %vm885_vm2, %v604_v3, 0.0  ;;  %v1024_v8 = vmul.f32 %v604_v3, %v604_v3  ;;  %v775_v9 = vpack.c.bf16 %v1730_v4, %v1730_v4  ;;  %869 = vst.msk [vmem:[%s1688_s8 + $0xc0] sm:$0xf] %vm820_vm1, %v804_v1 }
  0xac   : > { %v892_v10 = vadd.f32 %v891_v7, %v890_v62  ;;  %855 = vst.msk [vmem:[%s1688_s8 + $0x88] sm:$0xf] %vm820_vm1, %v790_v42 }
  0xad   : > { %824 = vst.msk [vmem:[%s1688_s8 + $0xc] sm:$0xf] %vm820_vm1, %v759_v6  ;;  %v1090_v11 = vsel %vm885_vm2, %v1024_v8, 0.0  ;;  %v718_v6 = vpop.f32.mrf.mxu3 }
  0xae   : > { %v1091_v12 = vadd.f32 %v1090_v11, %v1089_v0  ;;  %840 = vst.msk [vmem:[%s1688_s8 + $0x4c] sm:$0xf] %vm820_vm1, %v775_v9  ;;  %v1850_v8 = vadd.f32 %v1677_v30, %v718_v6 }
  0xaf   : > { %v683_v46 = vpop.f32.mrf.mxu2 }
  0xb0   : > { %v606_v14 = vpop.f32.mrf.mxu0  ;;  %v646_v15 = vpop.f32.mrf.mxu1  ;;  %v1800_v47 = vadd.f32 %v1677_v30, %v683_v46 }
  0xb1   : > { %v607_v17 = vadd.f32 %v1677_v30, %v606_v14  ;;  %v1747_v18 = vadd.f32 %v1677_v30, %v646_v15 }
  0xb2   : > { %v791_v50 = vpack.c.bf16 %v1800_v47, %v1800_v47 }
  0xb3   : > { %v760_v21 = vpack.c.bf16 %v607_v17, %v607_v17  ;;  %v893_v22 = vsel %vm885_vm2, %v607_v17, 0.0  ;;  %v1025_v23 = vmul.f32 %v607_v17, %v607_v17  ;;  %v776_v24 = vpack.c.bf16 %v1747_v18, %v1747_v18 }
  0xb4   : > { %v1758_v26 = vadd.f32 %v893_v22, %v892_v10  ;;  %856 = vst.msk [vmem:[%s1688_s8 + $0x8c] sm:$0xf] %vm820_vm1, %v791_v50 }
  0xb5   : > { %825 = vst.msk [vmem:[%s1688_s8 + $0x10] sm:$0xf] %vm820_vm1, %v760_v21  ;;  %v1092_v28 = vsel %vm885_vm2, %v1025_v23, 0.0  ;;  %v721_v21 = vpop.f32.mrf.mxu3 }
  0xb6   : > { %v1766_v29 = vadd.f32 %v1092_v28, %v1091_v12  ;;  %841 = vst.msk [vmem:[%s1688_s8 + $0x50] sm:$0xf] %vm820_vm1, %v776_v24  ;;  %v805_v12 = vpack.c.bf16 %v1850_v8, %v1850_v8  ;;  %v1888_v25 = vadd.f32 %v1677_v30, %v721_v21 }
  0xb7   : > { %v686_v55 = vpop.f32.mrf.mxu2 }
  0xb8   : > { %v608_v31 = vpop.f32.mrf.mxu0  ;;  %v648_v32 = vpop.f32.mrf.mxu1  ;;  %v1829_v60 = vadd.f32 %v1677_v30, %v686_v55  ;;  %870 = vst.msk [vmem:[%s1688_s8 + $0xc4] sm:$0xf] %vm820_vm1, %v805_v12 }
  0xb9   : > { %v1773_v33 = vadd.f32 %v1677_v30, %v608_v31  ;;  %v1776_v35 = vadd.f32 %v1677_v30, %v648_v32  ;;  %v806_v32 = vpack.c.bf16 %v1888_v25, %v1888_v25 }
  0xba   : > { %v792_v0 = vpack.c.bf16 %v1829_v60, %v1829_v60 }
  0xbb   : > { %v761_v37 = vpack.c.bf16 %v1773_v33, %v1773_v33  ;;  %v777_v38 = vpack.c.bf16 %v1776_v35, %v1776_v35  ;;  %871 = vst.msk [vmem:[%s1688_s8 + $0xc8] sm:$0xf] %vm820_vm1, %v806_v32 }
  0xbc   : > { %857 = vst.msk [vmem:[%s1688_s8 + $0x90] sm:$0xf] %vm820_vm1, %v792_v0  ;;  %v1026_v0 = vmul.f32 %v1773_v33, %v1773_v33 }
  0xbd   : > { %826 = vst.msk [vmem:[%s1688_s8 + $0x14] sm:$0xf] %vm820_vm1, %v761_v37 }
  0xbe   : > { %842 = vst.msk [vmem:[%s1688_s8 + $0x54] sm:$0xf] %vm820_vm1, %v777_v38 }
  0xbf   : > { %v688_v5 = vpop.f32.mrf.mxu2 }
  0xc0   : > { %v611_v40 = vpop.f32.mrf.mxu0  ;;  %v651_v41 = vpop.f32.mrf.mxu1  ;;  %v1847_v7 = vadd.f32 %v1677_v30, %v688_v5 }
  0xc1   : > { %v1792_v44 = vadd.f32 %v1677_v30, %v611_v40  ;;  %v1795_v45 = vadd.f32 %v1677_v30, %v651_v41  ;;  %v723_v40 = vpop.f32.mrf.mxu3 }
  0xc2   : > { %v793_v11 = vpack.c.bf16 %v1847_v7, %v1847_v7  ;;  %v1906_v42 = vadd.f32 %v1677_v30, %v723_v40 }
  0xc3   : > { %v762_v48 = vpack.c.bf16 %v1792_v44, %v1792_v44  ;;  %v778_v49 = vpack.c.bf16 %v1795_v45, %v1795_v45  ;;  %v897_v40 = vsel %vm885_vm2, %v1792_v44, 0.0 }
  0xc4   : > { %858 = vst.msk [vmem:[%s1688_s8 + $0x94] sm:$0xf] %vm820_vm1, %v793_v11  ;;  %v807_v50 = vpack.c.bf16 %v1906_v42, %v1906_v42 }
  0xc5   : > { %827 = vst.msk [vmem:[%s1688_s8 + $0x18] sm:$0xf] %vm820_vm1, %v762_v48 }
  0xc6   : > { %843 = vst.msk [vmem:[%s1688_s8 + $0x58] sm:$0xf] %vm820_vm1, %v778_v49 }
  0xc7   : > { %v691_v19 = vpop.f32.mrf.mxu2  ;;  %872 = vst.msk [vmem:[%s1688_s8 + $0xcc] sm:$0xf] %vm820_vm1, %v807_v50 }
  0xc8   : > { %v613_v51 = vpop.f32.mrf.mxu0  ;;  %v653_v52 = vpop.f32.mrf.mxu1  ;;  %v1885_v24 = vadd.f32 %v1677_v30, %v691_v19 }
  0xc9   : > { %v1815_v53 = vadd.f32 %v1677_v30, %v613_v51  ;;  %v1818_v54 = vadd.f32 %v1677_v30, %v653_v52 }
  0xca   : > { %v794_v31 = vpack.c.bf16 %v1885_v24, %v1885_v24 }
  0xcb   : > { %v763_v58 = vpack.c.bf16 %v1815_v53, %v1815_v53  ;;  %v779_v59 = vpack.c.bf16 %v1818_v54, %v1818_v54 }
  0xcc   : > { %859 = vst.msk [vmem:[%s1688_s8 + $0x98] sm:$0xf] %vm820_vm1, %v794_v31  ;;  %v1094_v31 = vsel %vm885_vm2, %v1026_v0, 0.0 }
  0xcd   : > { %828 = vst.msk [vmem:[%s1688_s8 + $0x1c] sm:$0xf] %vm820_vm1, %v763_v58 }
  0xce   : > { %844 = vst.msk [vmem:[%s1688_s8 + $0x5c] sm:$0xf] %vm820_vm1, %v779_v59  ;;  %v726_v59 = vpop.f32.mrf.mxu3 }
  0xcf   : > { %v693_v38 = vpop.f32.mrf.mxu2  ;;  %v1952_v11 = vadd.f32 %v1677_v30, %v726_v59 }
  0xd0   : > { %v616_v62 = vpop.f32.mrf.mxu0  ;;  %v656_v63 = vpop.f32.mrf.mxu1  ;;  %v1903_v41 = vadd.f32 %v1677_v30, %v693_v38  ;;  %v1028_v38 = vmul.f32 %v1815_v53, %v1815_v53 }
  0xd1   : > { %v1839_v2 = vadd.f32 %v1677_v30, %v616_v62  ;;  %v1842_v3 = vadd.f32 %v1677_v30, %v656_v63  ;;  %v808_v32 = vpack.c.bf16 %v1952_v11, %v1952_v11 }
  0xd2   : > { %v795_v49 = vpack.c.bf16 %v1903_v41, %v1903_v41 }
  0xd3   : > { %v764_v9 = vpack.c.bf16 %v1839_v2, %v1839_v2  ;;  %v780_v10 = vpack.c.bf16 %v1842_v3, %v1842_v3  ;;  %v1029_v50 = vmul.f32 %v1839_v2, %v1839_v2  ;;  %873 = vst.msk [vmem:[%s1688_s8 + $0xd0] sm:$0xf] %vm820_vm1, %v808_v32 }
  0xd4   : > { %860 = vst.msk [vmem:[%s1688_s8 + $0x9c] sm:$0xf] %vm820_vm1, %v795_v49  ;;  %v1095_v49 = vadd.f32 %v1094_v31, %v1766_v29 }
  0xd5   : > { %829 = vst.msk [vmem:[%s1688_s8 + $0x20] sm:$0xf] %vm820_vm1, %v764_v9 }
  0xd6   : > { %845 = vst.msk [vmem:[%s1688_s8 + $0x60] sm:$0xf] %vm820_vm1, %v780_v10 }
  0xd7   : > { %v696_v58 = vpop.f32.mrf.mxu2 }
  0xd8   : > { %v618_v14 = vpop.f32.mrf.mxu0  ;;  %v658_v15 = vpop.f32.mrf.mxu1  ;;  %v1949_v10 = vadd.f32 %v1677_v30, %v696_v58  ;;  %v899_v58 = vsel %vm885_vm2, %v1815_v53, 0.0  ;;  %v901_v53 = vsel %vm885_vm2, %v1839_v2, 0.0 }
  0xd9   : > { %v1871_v16 = vadd.f32 %v1677_v30, %v618_v14  ;;  %v1874_v17 = vadd.f32 %v1677_v30, %v658_v15  ;;  %v728_v14 = vpop.f32.mrf.mxu3  ;;  %v1027_v15 = vmul.f32 %v1792_v44, %v1792_v44 }
  0xdb   : > { %v765_v22 = vpack.c.bf16 %v1871_v16, %v1871_v16  ;;  %v781_v23 = vpack.c.bf16 %v1874_v17, %v1874_v17 }
  0xdd   : > { %830 = vst.msk [vmem:[%s1688_s8 + $0x24] sm:$0xf] %vm820_vm1, %v765_v22 }
  0xde   : > { %846 = vst.msk [vmem:[%s1688_s8 + $0x64] sm:$0xf] %vm820_vm1, %v781_v23  ;;  %v796_v23 = vpack.c.bf16 %v1949_v10, %v1949_v10 }
  0xdf   : > { %v698_v12 = vpop.f32.mrf.mxu2 }
  0xe0   : > { %v621_v27 = vpop.f32.mrf.mxu0  ;;  %v661_v28 = vpop.f32.mrf.mxu1  ;;  %v1961_v22 = vadd.f32 %v1677_v30, %v698_v12  ;;  %861 = vst.msk [vmem:[%s1688_s8 + $0xa0] sm:$0xf] %vm820_vm1, %v796_v23 }
  0xe1   : > { %v1895_v36 = vadd.f32 %v1677_v30, %v621_v27  ;;  %v1898_v37 = vadd.f32 %v1677_v30, %v661_v28  ;;  %v1966_v27 = vadd.f32 %v1677_v30, %v728_v14  ;;  %v895_v28 = vsel %vm885_vm2, %v1773_v33, 0.0 }
  0xe2   : > { %v797_v33 = vpack.c.bf16 %v1961_v22, %v1961_v22 }
  0xe3   : > { %v766_v46 = vpack.c.bf16 %v1895_v36, %v1895_v36  ;;  %v782_v48 = vpack.c.bf16 %v1898_v37, %v1898_v37  ;;  %v809_v44 = vpack.c.bf16 %v1966_v27, %v1966_v27 }
  0xe4   : > { %862 = vst.msk [vmem:[%s1688_s8 + $0xa4] sm:$0xf] %vm820_vm1, %v797_v33 }
  0xe5   : > { %831 = vst.msk [vmem:[%s1688_s8 + $0x28] sm:$0xf] %vm820_vm1, %v766_v46  ;;  %v1096_v46 = vsel %vm885_vm2, %v1027_v15, 0.0 }
  0xe6   : > { %847 = vst.msk [vmem:[%s1688_s8 + $0x68] sm:$0xf] %vm820_vm1, %v782_v48  ;;  %v896_v48 = vadd.f32 %v895_v28, %v1758_v26  ;;  %v1097_v0 = vadd.f32 %v1096_v46, %v1095_v49  ;;  %v903_v28 = vsel %vm885_vm2, %v1871_v16, 0.0 }
  0xe7   : > { %v701_v29 = vpop.f32.mrf.mxu2  ;;  %874 = vst.msk [vmem:[%s1688_s8 + $0xd4] sm:$0xf] %vm820_vm1, %v809_v44 }
  0xe8   : > { %v623_v51 = vpop.f32.mrf.mxu0  ;;  %v663_v52 = vpop.f32.mrf.mxu1  ;;  %v2035_v44 = vadd.f32 %v1677_v30, %v701_v29 }
  0xe9   : > { %v1927_v55 = vadd.f32 %v1677_v30, %v623_v51  ;;  %v1930_v57 = vadd.f32 %v1677_v30, %v663_v52 }
  0xeb   : > { %v767_v62 = vpack.c.bf16 %v1927_v55, %v1927_v55  ;;  %v783_v63 = vpack.c.bf16 %v1930_v57, %v1930_v57  ;;  %v1032_v31 = vmul.f32 %v1927_v55, %v1927_v55 }
  0xed   : > { %832 = vst.msk [vmem:[%s1688_s8 + $0x2c] sm:$0xf] %vm820_vm1, %v767_v62  ;;  %v731_v62 = vpop.f32.mrf.mxu3 }
  0xee   : > { %848 = vst.msk [vmem:[%s1688_s8 + $0x6c] sm:$0xf] %vm820_vm1, %v783_v63  ;;  %v898_v63 = vadd.f32 %v897_v40, %v896_v48  ;;  %v905_v40 = vsel %vm885_vm2, %v1895_v36, 0.0 }
  0xf0   : > { %v626_v1 = vpop.f32.mrf.mxu0  ;;  %v666_v5 = vpop.f32.mrf.mxu1  ;;  %v900_v15 = vadd.f32 %v899_v58, %v898_v63 }
  0xf1   : > { %v1943_v6 = vadd.f32 %v1677_v30, %v626_v1  ;;  %v1946_v9 = vadd.f32 %v1677_v30, %v666_v5  ;;  %v1098_v1 = vsel %vm885_vm2, %v1028_v38, 0.0  ;;  %v1030_v5 = vmul.f32 %v1871_v16, %v1871_v16  ;;  %v703_v58 = vpop.f32.mrf.mxu2 }
  0xf2   : > { %v1099_v23 = vadd.f32 %v1098_v1, %v1097_v0  ;;  %v902_v2 = vadd.f32 %v901_v53, %v900_v15  ;;  %v907_v16 = vsel %vm885_vm2, %v1927_v55, 0.0  ;;  %v1106_v1 = vsel %vm885_vm2, %v1032_v31, 0.0 }
  0xf3   : > { %v768_v19 = vpack.c.bf16 %v1943_v6, %v1943_v6  ;;  %v784_v21 = vpack.c.bf16 %v1946_v9, %v1946_v9  ;;  %v1102_v38 = vsel %vm885_vm2, %v1030_v5, 0.0  ;;  %v1033_v48 = vmul.f32 %v1943_v6, %v1943_v6 }
  0xf4   : > { %v904_v46 = vadd.f32 %v903_v28, %v902_v2  ;;  %v909_v53 = vsel %vm885_vm2, %v1943_v6, 0.0 }
  0xf5   : > { %833 = vst.msk [vmem:[%s1688_s8 + $0x30] sm:$0xf] %vm820_vm1, %v768_v19  ;;  %v1100_v19 = vsel %vm885_vm2, %v1029_v50, 0.0  ;;  %v733_v63 = vpop.f32.mrf.mxu3  ;;  %v1108_v6 = vsel %vm885_vm2, %v1033_v48, 0.0 }
  0xf6   : > { %849 = vst.msk [vmem:[%s1688_s8 + $0x70] sm:$0xf] %vm820_vm1, %v784_v21  ;;  %v1031_v21 = vmul.f32 %v1895_v36, %v1895_v36  ;;  %v1101_v32 = vadd.f32 %v1100_v19, %v1099_v23  ;;  %v2038_v36 = vadd.f32 %v1677_v30, %v731_v62  ;;  %v906_v0 = vadd.f32 %v905_v40, %v904_v46 }
  0xf7   : > { %v2046_v62 = vadd.f32 %v1677_v30, %v703_v58  ;;  %v798_v19 = vpack.c.bf16 %v2035_v44, %v2035_v44 }
  0xf8   : > { %v628_v51 = vpop.f32.mrf.mxu0  ;;  %v668_v52 = vpop.f32.mrf.mxu1  ;;  %v1104_v33 = vsel %vm885_vm2, %v1031_v21, 0.0  ;;  %v1103_v55 = vadd.f32 %v1102_v38, %v1101_v32  ;;  %v908_v15 = vadd.f32 %v907_v16, %v906_v0  ;;  %v2051_v21 = vadd.f32 %v1677_v30, %v733_v63 }
  0xf9   : > { %v629_v59 = vadd.f32 %v1677_v30, %v628_v51  ;;  %v1998_v26 = vadd.f32 %v1677_v30, %v668_v52  ;;  %v810_v2 = vpack.c.bf16 %v2038_v36, %v2038_v36  ;;  %863 = vst.msk [vmem:[%s1688_s8 + $0xa8] sm:$0xf] %vm820_vm1, %v798_v19  ;;  %v706_v63 = vpop.f32.mrf.mxu2  ;;  %v1037_v0 = vmul.f32 %v1681_v34, %v1681_v34 }
  0xfa   : > { %v910_v32 = vadd.f32 %v909_v53, %v908_v15  ;;  %v1038_v15 = vmul.f32 %v1702_v43, %v1702_v43 }
  0xfb   : > { %v769_v12 = vpack.c.bf16 %v629_v59, %v629_v59  ;;  %v785_v14 = vpack.c.bf16 %v1998_v26, %v1998_v26  ;;  %v1034_v5 = vmul.f32 %v629_v59, %v629_v59  ;;  %v911_v23 = vsel %vm885_vm2, %v629_v59, 0.0  ;;  %875 = vst.msk [vmem:[%s1688_s8 + $0xd8] sm:$0xf] %vm820_vm1, %v810_v2 }
  0xfc   : > { %v799_v59 = vpack.c.bf16 %v2046_v62, %v2046_v62 }
  0xfd   : > { %834 = vst.msk [vmem:[%s1688_s8 + $0x34] sm:$0xf] %vm820_vm1, %v769_v12  ;;  %v1110_v38 = vsel %vm885_vm2, %v1034_v5, 0.0 }
  0xfe   : > { %850 = vst.msk [vmem:[%s1688_s8 + $0x74] sm:$0xf] %vm820_vm1, %v785_v14  ;;  %v1105_v14 = vadd.f32 %v1104_v33, %v1103_v55  ;;  %v912_v33 = vadd.f32 %v911_v23, %v910_v32  ;;  %v736_v55 = vpop.f32.mrf.mxu3  ;;  %v917_v23 = vsel %vm885_vm2, %v1681_v34, 0.0  ;;  %v921_v34 = vsel %vm885_vm2, %v1716_v56, 0.0 }
  0xff   : > { %864 = vst.msk [vmem:[%s1688_s8 + $0xac] sm:$0xf] %vm820_vm1, %v799_v59  ;;  %v1118_v59 = vsel %vm885_vm2, %v1038_v15, 0.0 }
 0x100   : > { %v631_v49 = vpop.f32.mrf.mxu0  ;;  %v671_v50 = vpop.f32.mrf.mxu1  ;;  %v1107_v31 = vadd.f32 %v1106_v1, %v1105_v14 }
 0x101   : > { %v632_v51 = vadd.f32 %v1677_v30, %v631_v49  ;;  %v2032_v52 = vadd.f32 %v1677_v30, %v671_v50  ;;  %v811_v49 = vpack.c.bf16 %v2051_v21, %v2051_v21 }
 0x102   : > { %v1109_v46 = vadd.f32 %v1108_v6, %v1107_v31 }
 0x103   : > { %v770_v12 = vpack.c.bf16 %v632_v51, %v632_v51  ;;  %v786_v29 = vpack.c.bf16 %v2032_v52, %v2032_v52  ;;  %v1035_v28 = vmul.f32 %v632_v51, %v632_v51  ;;  %v913_v40 = vsel %vm885_vm2, %v632_v51, 0.0  ;;  %876 = vst.msk [vmem:[%s1688_s8 + $0xdc] sm:$0xf] %vm820_vm1, %v811_v49 }
 0x104   : > { %v1111_v1 = vadd.f32 %v1110_v38, %v1109_v46  ;;  %v914_v53 = vadd.f32 %v913_v40, %v912_v33  ;;  %v1116_v38 = vsel %vm885_vm2, %v1037_v0, 0.0  ;;  %v919_v40 = vsel %vm885_vm2, %v1702_v43, 0.0  ;;  %v708_v43 = vpop.f32.mrf.mxu2 }
 0x105   : > { %835 = vst.msk [vmem:[%s1688_s8 + $0x38] sm:$0xf] %vm820_vm1, %v770_v12  ;;  %v1112_v50 = vsel %vm885_vm2, %v1035_v28, 0.0  ;;  %v1039_v28 = vmul.f32 %v1716_v56, %v1716_v56  ;;  %v2106_v49 = vadd.f32 %v1677_v30, %v706_v63  ;;  %v2112_v56 = vadd.f32 %v1677_v30, %v708_v43 }
 0x106   : > { %851 = vst.msk [vmem:[%s1688_s8 + $0x78] sm:$0xf] %vm820_vm1, %v786_v29  ;;  %v1113_v19 = vadd.f32 %v1112_v50, %v1111_v1  ;;  %v2109_v50 = vadd.f32 %v1677_v30, %v736_v55  ;;  %v1041_v63 = vmul.f32 %v1747_v18, %v1747_v18 }
 0x107   : > { %v800_v55 = vpack.c.bf16 %v2106_v49, %v2106_v49 }
 0x108   : > { %v633_v16 = vpop.f32.mrf.mxu0  ;;  %v673_v48 = vpop.f32.mrf.mxu1 }
 0x109   : > { %v634_v58 = vadd.f32 %v1677_v30, %v633_v16  ;;  %v2074_v51 = vadd.f32 %v1677_v30, %v673_v48  ;;  %v1120_v16 = vsel %vm885_vm2, %v1039_v28, 0.0  ;;  %v1040_v48 = vmul.f32 %v1730_v4, %v1730_v4  ;;  %865 = vst.msk [vmem:[%s1688_s8 + $0xb0] sm:$0xf] %vm820_vm1, %v800_v55 }
 0x10a   : > { %v933_v55 = vsel %vm885_vm2, %v1842_v3, 0.0 }
 0x10b   : > { %v771_v5 = vpack.c.bf16 %v634_v58, %v634_v58  ;;  %v915_v12 = vsel %vm885_vm2, %v634_v58, 0.0  ;;  %v1036_v29 = vmul.f32 %v634_v58, %v634_v58  ;;  %v787_v14 = vpack.c.bf16 %v2074_v51, %v2074_v51  ;;  %v738_v58 = vpop.f32.mrf.mxu3 }
 0x10c   : > { %v916_v6 = vadd.f32 %v915_v12, %v914_v53  ;;  %v2115_v53 = vadd.f32 %v1677_v30, %v738_v58  ;;  %v812_v12 = vpack.c.bf16 %v2109_v50, %v2109_v50  ;;  %v1122_v15 = vsel %vm885_vm2, %v1040_v48, 0.0 }
 0x10d   : > { %836 = vst.msk [vmem:[%s1688_s8 + $0x3c] sm:$0xf] %vm820_vm1, %v771_v5  ;;  %v1114_v2 = vsel %vm885_vm2, %v1036_v29, 0.0  ;;  %v923_v5 = vsel %vm885_vm2, %v1730_v4, 0.0  ;;  %v1042_v4 = vmul.f32 %v1776_v35, %v1776_v35  ;;  %v931_v58 = vsel %vm885_vm2, %v1818_v54, 0.0 }
 0x10e   : > { %v918_v31 = vadd.f32 %v917_v23, %v916_v6  ;;  %v1115_v32 = vadd.f32 %v1114_v2, %v1113_v19  ;;  %852 = vst.msk [vmem:[%s1688_s8 + $0x7c] sm:$0xf] %vm820_vm1, %v787_v14  ;;  %v925_v19 = vsel %vm885_vm2, %v1747_v18, 0.0  ;;  %v801_v6 = vpack.c.bf16 %v2112_v56, %v2112_v56 }
 0x10f   : > { %877 = vst.msk [vmem:[%s1688_s8 + $0xe0] sm:$0xf] %vm820_vm1, %v812_v12  ;;  %v813_v2 = vpack.c.bf16 %v2115_v53, %v2115_v53  ;;  %v927_v18 = vsel %vm885_vm2, %v1776_v35, 0.0  ;;  %v1047_v12 = vmul.f32 %v1898_v37, %v1898_v37 }
 0x110   : > { %v920_v46 = vadd.f32 %v919_v40, %v918_v31  ;;  %v1117_v33 = vadd.f32 %v1116_v38, %v1115_v32  ;;  %v1124_v31 = vsel %vm885_vm2, %v1041_v63, 0.0  ;;  %v1043_v32 = vmul.f32 %v1795_v45, %v1795_v45  ;;  %866 = vst.msk [vmem:[%s1688_s8 + $0xb4] sm:$0xf] %vm820_vm1, %v801_v6 }
 0x111   : > { %878 = vst.msk [vmem:[%s1688_s8 + $0xe4] sm:$0xf] %vm820_vm1, %v813_v2 }
 0x112   : > { %v922_v0 = vadd.f32 %v921_v34, %v920_v46  ;;  %v1119_v1 = vadd.f32 %v1118_v59, %v1117_v33  ;;  %v1126_v59 = vsel %vm885_vm2, %v1042_v4, 0.0  ;;  %v929_v34 = vsel %vm885_vm2, %v1795_v45, 0.0  ;;  %v711_v33 = vpop.f32.mrf.mxu2 }
 0x113   : > { %v1044_v46 = vmul.f32 %v1818_v54, %v1818_v54  ;;  %v1128_v43 = vsel %vm885_vm2, %v1043_v32, 0.0  ;;  %v937_v4 = vsel %vm885_vm2, %v1898_v37, 0.0  ;;  %v2174_v2 = vadd.f32 %v1677_v30, %v711_v33 }
 0x114   : > { %v924_v29 = vadd.f32 %v923_v5, %v922_v0  ;;  %v1121_v14 = vadd.f32 %v1120_v16, %v1119_v1  ;;  %v741_v16 = vpop.f32.mrf.mxu3  ;;  %v1045_v0 = vmul.f32 %v1842_v3, %v1842_v3  ;;  %v1046_v1 = vmul.f32 %v1874_v17, %v1874_v17 }
 0x115   : > { %v1130_v63 = vsel %vm885_vm2, %v1044_v46, 0.0  ;;  %v1048_v3 = vmul.f32 %v1930_v57, %v1930_v57  ;;  %v802_v46 = vpack.c.bf16 %v2174_v2, %v2174_v2 }
 0x116   : > { %v926_v23 = vadd.f32 %v925_v19, %v924_v29  ;;  %v1123_v28 = vadd.f32 %v1122_v15, %v1121_v14  ;;  %v1132_v54 = vsel %vm885_vm2, %v1045_v0, 0.0  ;;  %v935_v15 = vsel %vm885_vm2, %v1874_v17, 0.0 }
 0x117   : > { %v1134_v19 = vsel %vm885_vm2, %v1046_v1, 0.0  ;;  %867 = vst.msk [vmem:[%s1688_s8 + $0xb8] sm:$0xf] %vm820_vm1, %v802_v46 }
 0x118   : > { %v928_v38 = vadd.f32 %v927_v18, %v926_v23  ;;  %v1125_v40 = vadd.f32 %v1124_v31, %v1123_v28  ;;  %v1136_v28 = vsel %vm885_vm2, %v1047_v12, 0.0  ;;  %v2177_v31 = vadd.f32 %v1677_v30, %v741_v16 }
 0x11a   : > { %v1127_v35 = vadd.f32 %v1126_v59, %v1125_v40  ;;  %v930_v48 = vadd.f32 %v929_v34, %v928_v38  ;;  %v713_v17 = vpop.f32.mrf.mxu2  ;;  %v939_v59 = vsel %vm885_vm2, %v1930_v57, 0.0  ;;  %v1049_v34 = vmul.f32 %v1946_v9, %v1946_v9 }
 0x11b   : > { %v2180_v37 = vadd.f32 %v1677_v30, %v713_v17  ;;  %v814_v33 = vpack.c.bf16 %v2177_v31, %v2177_v31  ;;  %v1050_v57 = vmul.f32 %v1998_v26, %v1998_v26  ;;  %v949_v17 = vsel %vm885_vm2, %v1741_v13, 0.0 }
 0x11c   : > { %v932_v5 = vadd.f32 %v931_v58, %v930_v48  ;;  %v1129_v45 = vadd.f32 %v1128_v43, %v1127_v35  ;;  %v743_v18 = vpop.f32.mrf.mxu3  ;;  %v1138_v48 = vsel %vm885_vm2, %v1048_v3, 0.0  ;;  %v941_v43 = vsel %vm885_vm2, %v1946_v9, 0.0 }
 0x11d   : > { %v2183_v40 = vadd.f32 %v1677_v30, %v743_v18  ;;  %v803_v58 = vpack.c.bf16 %v2180_v37, %v2180_v37  ;;  %879 = vst.msk [vmem:[%s1688_s8 + $0xe8] sm:$0xf] %vm820_vm1, %v814_v33  ;;  %v943_v9 = vsel %vm885_vm2, %v1998_v26, 0.0 }
 0x11e   : > { %v934_v29 = vadd.f32 %v933_v55, %v932_v5  ;;  %v1131_v14 = vadd.f32 %v1130_v63, %v1129_v45  ;;  %v1140_v45 = vsel %vm885_vm2, %v1049_v34, 0.0  ;;  %v1051_v63 = vmul.f32 %v2032_v52, %v2032_v52 }
 0x11f   : > { %v815_v5 = vpack.c.bf16 %v2183_v40, %v2183_v40  ;;  %868 = vst.msk [vmem:[%s1688_s8 + $0xbc] sm:$0xf] %vm820_vm1, %v803_v58  ;;  %v951_v34 = vsel %vm885_vm2, %v1752_v20, 0.0 }
 0x120   : > { %v936_v6 = vadd.f32 %v935_v15, %v934_v29  ;;  %v1133_v23 = vadd.f32 %v1132_v54, %v1131_v14  ;;  %v1142_v29 = vsel %vm885_vm2, %v1050_v57, 0.0  ;;  %v945_v14 = vsel %vm885_vm2, %v2032_v52, 0.0 }
 0x121   : > { %880 = vst.msk [vmem:[%s1688_s8 + $0xec] sm:$0xf] %vm820_vm1, %v815_v5  ;;  %v1052_v54 = vmul.f32 %v2074_v51, %v2074_v51  ;;  %v1054_v52 = vmul.f32 %v1752_v20, %v1752_v20 }
 0x122   : > { %v938_v32 = vadd.f32 %v937_v4, %v936_v6  ;;  %v1135_v38 = vadd.f32 %v1134_v19, %v1133_v23  ;;  %v1053_v4 = vmul.f32 %v1741_v13, %v1741_v13  ;;  %v1144_v6 = vsel %vm885_vm2, %v1051_v63, 0.0 }
 0x123   : > { %v947_v23 = vsel %vm885_vm2, %v2074_v51, 0.0  ;;  %v1146_v18 = vsel %vm885_vm2, %v1052_v54, 0.0  ;;  %v1055_v51 = vmul.f32 %v1787_v39, %v1787_v39  ;;  %v953_v13 = vsel %vm885_vm2, %v1787_v39, 0.0 }
 0x124   : > { %v940_v16 = vadd.f32 %v939_v59, %v938_v32  ;;  %v1137_v35 = vadd.f32 %v1136_v28, %v1135_v38  ;;  %v746_v15 = vpop.f32.mrf.mxu3  ;;  %v1148_v59 = vsel %vm885_vm2, %v1053_v4, 0.0  ;;  %v1057_v39 = vmul.f32 %v1829_v60, %v1829_v60 }
 0x126   : > { %v942_v0 = vadd.f32 %v941_v43, %v940_v16  ;;  %v1139_v1 = vadd.f32 %v1138_v48, %v1137_v35  ;;  %v1150_v16 = vsel %vm885_vm2, %v1054_v52, 0.0  ;;  %v1056_v35 = vmul.f32 %v1800_v47, %v1800_v47 }
 0x127   : > { %v2241_v48 = vadd.f32 %v1677_v30, %v746_v15  ;;  %v1156_v54 = vsel %vm885_vm2, %v1057_v39, 0.0  ;;  %v959_v15 = vsel %vm885_vm2, %v1847_v7, 0.0 }
 0x128   : > { %v1141_v55 = vadd.f32 %v1140_v45, %v1139_v1  ;;  %v944_v12 = vadd.f32 %v943_v9, %v942_v0  ;;  %v1152_v0 = vsel %vm885_vm2, %v1055_v51, 0.0  ;;  %v955_v1 = vsel %vm885_vm2, %v1800_v47, 0.0 }
 0x129   : > { %v816_v5 = vpack.c.bf16 %v2241_v48, %v2241_v48 }
 0x12a   : > { %v1143_v19 = vadd.f32 %v1142_v29, %v1141_v55  ;;  %v946_v26 = vadd.f32 %v945_v14, %v944_v12  ;;  %v1154_v55 = vsel %vm885_vm2, %v1056_v35, 0.0  ;;  %v957_v12 = vsel %vm885_vm2, %v1829_v60, 0.0 }
 0x12b   : > { %v1058_v29 = vmul.f32 %v1847_v7, %v1847_v7  ;;  %881 = vst.msk [vmem:[%s1688_s8 + $0xf0] sm:$0xf] %vm820_vm1, %v816_v5  ;;  %v963_v7 = vsel %vm885_vm2, %v1903_v41, 0.0 }
 0x12c   : > { %v1145_v28 = vadd.f32 %v1144_v6, %v1143_v19  ;;  %v948_v3 = vadd.f32 %v947_v23, %v946_v26  ;;  %v748_v43 = vpop.f32.mrf.mxu3  ;;  %v1059_v19 = vmul.f32 %v1885_v24, %v1885_v24  ;;  %v961_v6 = vsel %vm885_vm2, %v1885_v24, 0.0 }
 0x12d   : > { %v2244_v58 = vadd.f32 %v1677_v30, %v748_v43  ;;  %v1158_v60 = vsel %vm885_vm2, %v1058_v29, 0.0  ;;  %v1060_v23 = vmul.f32 %v1903_v41, %v1903_v41  ;;  %v965_v24 = vsel %vm885_vm2, %v1949_v10, 0.0 }
 0x12e   : > { %v950_v32 = vadd.f32 %v949_v17, %v948_v3  ;;  %v1147_v38 = vadd.f32 %v1146_v18, %v1145_v28  ;;  %v1160_v52 = vsel %vm885_vm2, %v1059_v19, 0.0  ;;  %v1061_v18 = vmul.f32 %v1949_v10, %v1949_v10 }
 0x12f   : > { %v817_v63 = vpack.c.bf16 %v2244_v58, %v2244_v58  ;;  %v967_v41 = vsel %vm885_vm2, %v1961_v22, 0.0  ;;  %v969_v10 = vsel %vm885_vm2, %v2035_v44, 0.0  ;;  %v1067_v19 = vmul.f32 %v2174_v2, %v2174_v2 }
 0x130   : > { %v952_v46 = vadd.f32 %v951_v34, %v950_v32  ;;  %v1149_v33 = vadd.f32 %v1148_v59, %v1147_v38  ;;  %v1162_v59 = vsel %vm885_vm2, %v1060_v23, 0.0  ;;  %v1062_v34 = vmul.f32 %v1961_v22, %v1961_v22 }
 0x131   : > { %882 = vst.msk [vmem:[%s1688_s8 + $0xf4] sm:$0xf] %vm820_vm1, %v817_v63 }
 0x132   : > { %v954_v57 = vadd.f32 %v953_v13, %v952_v46  ;;  %v1151_v20 = vadd.f32 %v1150_v16, %v1149_v33  ;;  %v1164_v33 = vsel %vm885_vm2, %v1061_v18, 0.0  ;;  %v1063_v16 = vmul.f32 %v2035_v44, %v2035_v44 }
 0x133   : > { %v1166_v43 = vsel %vm885_vm2, %v1062_v34, 0.0  ;;  %v1065_v44 = vmul.f32 %v2106_v49, %v2106_v49  ;;  %v981_v18 = vsel %vm885_vm2, %v1832_v61, 0.0  ;;  %v983_v34 = vsel %vm885_vm2, %v1850_v8, 0.0 }
 0x134   : > { %v956_v45 = vadd.f32 %v955_v1, %v954_v57  ;;  %v1153_v9 = vadd.f32 %v1152_v0, %v1151_v20  ;;  %v751_v28 = vpop.f32.mrf.mxu3  ;;  %v1064_v57 = vmul.f32 %v2046_v62, %v2046_v62  ;;  %v1168_v5 = vsel %vm885_vm2, %v1063_v16, 0.0 }
 0x135   : > { %v2295_v20 = vadd.f32 %v1677_v30, %v751_v28 }
 0x136   : > { %v958_v47 = vadd.f32 %v957_v12, %v956_v45  ;;  %v1155_v14 = vadd.f32 %v1154_v55, %v1153_v9  ;;  %v971_v45 = vsel %vm885_vm2, %v2046_v62, 0.0  ;;  %v1170_v29 = vsel %vm885_vm2, %v1064_v57, 0.0 }
 0x137   : > { %v818_v9 = vpack.c.bf16 %v2295_v20, %v2295_v20 }
 0x138   : > { %v1157_v26 = vadd.f32 %v1156_v54, %v1155_v14  ;;  %v960_v4 = vadd.f32 %v959_v15, %v958_v47  ;;  %v1066_v47 = vmul.f32 %v2112_v56, %v2112_v56  ;;  %v1172_v54 = vsel %vm885_vm2, %v1065_v44, 0.0 }
 0x139   : > { %883 = vst.msk [vmem:[%s1688_s8 + $0xf8] sm:$0xf] %vm820_vm1, %v818_v9  ;;  %v975_v15 = vsel %vm885_vm2, %v2112_v56, 0.0  ;;  %v1176_v56 = vsel %vm885_vm2, %v1067_v19, 0.0  ;;  %v1075_v44 = vmul.f32 %v2038_v36, %v2038_v36  ;;  %v1078_v19 = vmul.f32 %v2115_v53, %v2115_v53 }
 0x13a   : > { %v962_v3 = vadd.f32 %v961_v6, %v960_v4  ;;  %v1159_v17 = vadd.f32 %v1158_v60, %v1157_v26  ;;  %v977_v60 = vsel %vm885_vm2, %v2174_v2, 0.0  ;;  %v1068_v6 = vmul.f32 %v2180_v37, %v2180_v37 }
 0x13b   : > { %v1070_v2 = vmul.f32 %v1850_v8, %v1850_v8  ;;  %v987_v8 = vsel %vm885_vm2, %v1906_v42, 0.0 }
 0x13c   : > { %v964_v32 = vadd.f32 %v963_v7, %v962_v3  ;;  %v1161_v38 = vadd.f32 %v1160_v52, %v1159_v17  ;;  %v753_v0 = vpop.f32.mrf.mxu3  ;;  %v1069_v3 = vmul.f32 %v1832_v61, %v1832_v61  ;;  %v979_v17 = vsel %vm885_vm2, %v2180_v37, 0.0 }
 0x13d   : > { %v2298_v39 = vadd.f32 %v1677_v30, %v753_v0  ;;  %v973_v30 = vsel %vm885_vm2, %v2106_v49, 0.0  ;;  %v1174_v49 = vsel %vm885_vm2, %v1066_v47, 0.0  ;;  %v1071_v37 = vmul.f32 %v1888_v25, %v1888_v25 }
 0x13e   : > { %v966_v51 = vadd.f32 %v965_v24, %v964_v32  ;;  %v1163_v46 = vadd.f32 %v1162_v59, %v1161_v38  ;;  %v1178_v32 = vsel %vm885_vm2, %v1068_v6, 0.0  ;;  %v1180_v24 = vsel %vm885_vm2, %v1069_v3, 0.0 }
 0x13f   : > { %v819_v12 = vpack.c.bf16 %v2298_v39, %v2298_v39  ;;  %v985_v61 = vsel %vm885_vm2, %v1888_v25, 0.0  ;;  %v989_v25 = vsel %vm885_vm2, %v1952_v11, 0.0  ;;  %v1192_v47 = vsel %vm885_vm2, %v1075_v44, 0.0 }
 0x140   : > { %v968_v13 = vadd.f32 %v967_v41, %v966_v51  ;;  %v1165_v35 = vadd.f32 %v1164_v33, %v1163_v46  ;;  %v1182_v33 = vsel %vm885_vm2, %v1070_v2, 0.0  ;;  %v1072_v41 = vmul.f32 %v1906_v42, %v1906_v42 }
 0x141   : > { %884 = vst.msk [vmem:[%s1688_s8 + $0xfc] sm:$0xf] %vm820_vm1, %v819_v12  ;;  %v991_v42 = vsel %vm885_vm2, %v1966_v27, 0.0  ;;  %v1076_v12 = vmul.f32 %v2051_v21, %v2051_v21  ;;  %v1080_v3 = vmul.f32 %v2183_v40, %v2183_v40 }
 0x142   : > { %v970_v1 = vadd.f32 %v969_v10, %v968_v13  ;;  %v1167_v22 = vadd.f32 %v1166_v43, %v1165_v35  ;;  %v1184_v35 = vsel %vm885_vm2, %v1071_v37, 0.0  ;;  %v1073_v43 = vmul.f32 %v1952_v11, %v1952_v11 }
 0x143   : > { %v1186_v0 = vsel %vm885_vm2, %v1072_v41, 0.0  ;;  %v993_v11 = vsel %vm885_vm2, %v2038_v36, 0.0  ;;  %v997_v36 = vsel %vm885_vm2, %v2109_v50, 0.0  ;;  %v1083_v37 = vmul.f32 %v2295_v20, %v2295_v20 }
 0x144   : > { %v972_v63 = vadd.f32 %v971_v45, %v970_v1  ;;  %v1169_v55 = vadd.f32 %v1168_v5, %v1167_v22  ;;  %v1074_v1 = vmul.f32 %v1966_v27, %v1966_v27  ;;  %v1188_v45 = vsel %vm885_vm2, %v1073_v43, 0.0 }
 0x145   : > { %v995_v27 = vsel %vm885_vm2, %v2051_v21, 0.0  ;;  %v999_v21 = vsel %vm885_vm2, %v2115_v53, 0.0  ;;  %v1003_v53 = vsel %vm885_vm2, %v2183_v40, 0.0  ;;  %v1007_v40 = vsel %vm885_vm2, %v2244_v58, 0.0 }
 0x146   : > { %v1171_v62 = vadd.f32 %v1170_v29, %v1169_v55  ;;  %v974_v14 = vadd.f32 %v973_v30, %v972_v63  ;;  %v1190_v55 = vsel %vm885_vm2, %v1074_v1, 0.0 }
 0x148   : > { %v1173_v26 = vadd.f32 %v1172_v54, %v1171_v62  ;;  %v976_v4 = vadd.f32 %v975_v15, %v974_v14  ;;  %v1077_v62 = vmul.f32 %v2109_v50, %v2109_v50  ;;  %v1194_v15 = vsel %vm885_vm2, %v1076_v12, 0.0 }
 0x149   : > { %v1001_v50 = vsel %vm885_vm2, %v2177_v31, 0.0 }
 0x14a   : > { %v1175_v23 = vadd.f32 %v1174_v49, %v1173_v26  ;;  %v978_v28 = vadd.f32 %v977_v60, %v976_v4  ;;  %v1196_v49 = vsel %vm885_vm2, %v1077_v62, 0.0  ;;  %v1079_v60 = vmul.f32 %v2177_v31, %v2177_v31 }
 0x14b   : > { %v1005_v31 = vsel %vm885_vm2, %v2241_v48, 0.0 }
 0x14c   : > { %v1177_v52 = vadd.f32 %v1176_v56, %v1175_v23  ;;  %v980_v7 = vadd.f32 %v979_v17, %v978_v28  ;;  %v1198_v28 = vsel %vm885_vm2, %v1078_v19, 0.0 }
 0x14e   : > { %v982_v38 = vadd.f32 %v981_v18, %v980_v7  ;;  %v1179_v59 = vadd.f32 %v1178_v32, %v1177_v52  ;;  %v1200_v52 = vsel %vm885_vm2, %v1079_v60, 0.0  ;;  %v1081_v7 = vmul.f32 %v2241_v48, %v2241_v48 }
 0x14f   : > { %v1202_v32 = vsel %vm885_vm2, %v1080_v3, 0.0  ;;  %v1009_v48 = vsel %vm885_vm2, %v2295_v20, 0.0 }
 0x150   : > { %v984_v51 = vadd.f32 %v983_v34, %v982_v38  ;;  %v1181_v46 = vadd.f32 %v1180_v24, %v1179_v59  ;;  %v1082_v38 = vmul.f32 %v2244_v58, %v2244_v58  ;;  %v1204_v34 = vsel %vm885_vm2, %v1081_v7, 0.0 }
 0x151   : > { %v1011_v58 = vsel %vm885_vm2, %v2298_v39, 0.0 }
 0x152   : > { %v986_v16 = vadd.f32 %v985_v61, %v984_v51  ;;  %v1183_v13 = vadd.f32 %v1182_v33, %v1181_v46  ;;  %v1206_v33 = vsel %vm885_vm2, %v1082_v38, 0.0  ;;  %v1084_v61 = vmul.f32 %v2298_v39, %v2298_v39 }
 0x154   : > { %v988_v10 = vadd.f32 %v987_v8, %v986_v16  ;;  %v1185_v57 = vadd.f32 %v1184_v35, %v1183_v13  ;;  %v1208_v13 = vsel %vm885_vm2, %v1083_v37, 0.0  ;;  %v1210_v43 = vsel %vm885_vm2, %v1084_v61, 0.0 }
 0x156   : > { %v990_v22 = vadd.f32 %v989_v25, %v988_v10  ;;  %v1187_v5 = vadd.f32 %v1186_v0, %v1185_v57 }
 0x158   : > { %v1189_v9 = vadd.f32 %v1188_v45, %v1187_v5  ;;  %v992_v63 = vadd.f32 %v991_v42, %v990_v22 }
 0x15a   : > { %v994_v29 = vadd.f32 %v993_v11, %v992_v63  ;;  %v1191_v30 = vadd.f32 %v1190_v55, %v1189_v9 }
 0x15c   : > { %v996_v14 = vadd.f32 %v995_v27, %v994_v29  ;;  %v1193_v54 = vadd.f32 %v1192_v47, %v1191_v30 }
 0x15e   : > { %v998_v26 = vadd.f32 %v997_v36, %v996_v14  ;;  %v1195_v4 = vadd.f32 %v1194_v15, %v1193_v54 }
 0x160   : > { %v1000_v6 = vadd.f32 %v999_v21, %v998_v26  ;;  %v1197_v23 = vadd.f32 %v1196_v49, %v1195_v4 }
 0x162   : > { %v1002_v56 = vadd.f32 %v1001_v50, %v1000_v6  ;;  %v1199_v17 = vadd.f32 %v1198_v28, %v1197_v23 }
 0x164   : > { %v1004_v18 = vadd.f32 %v1003_v53, %v1002_v56  ;;  %v1201_v2 = vadd.f32 %v1200_v52, %v1199_v17 }
 0x166   : > { %v1203_v59 = vadd.f32 %v1202_v32, %v1201_v2  ;;  %v1006_v24 = vadd.f32 %v1005_v31, %v1004_v18 }
 0x168   : > { %v1205_v51 = vadd.f32 %v1204_v34, %v1203_v59  ;;  %v1008_v46 = vadd.f32 %v1007_v40, %v1006_v24 }
 0x16a   : > { %v1207_v41 = vadd.f32 %v1206_v33, %v1205_v51  ;;  %v1010_v16 = vadd.f32 %v1009_v48, %v1008_v46 }
 0x16c   : > { %v1209_v35 = vadd.f32 %v1208_v13, %v1207_v41  ;;  %v1012_v8 = vadd.f32 %v1011_v58, %v1010_v16 }
 0x16e   : > { %v1013_v10 = vrot.slane %v1012_v8, 4  ;;  %v1211_v57 = vadd.f32 %v1210_v43, %v1209_v35 }
 0x170   : > { %v1014_v0 = vadd.f32 %v1013_v10, %v1012_v8  ;;  %v1212_v20 = vrot.slane %v1211_v57, 4 }
 0x172   : > { %v1015_v25 = vrot.slane %v1014_v0, 2  ;;  %v1213_v1 = vadd.f32 %v1212_v20, %v1211_v57 }
 0x174   : > { %v1016_v22 = vadd.f32 %v1015_v25, %v1014_v0  ;;  %v1214_v5 = vrot.slane %v1213_v1, 2 }
 0x176   : > { %v1017_v45 = vrot.slane %v1016_v22, 1  ;;  %v1215_v42 = vadd.f32 %v1214_v5, %v1213_v1 }
 0x178   : > { %v1018_v39 = vadd.f32 %v1017_v45, %v1016_v22  ;;  %v1216_v44 = vrot.slane %v1215_v42, 1 }
 0x17a   : > { %1020 = vst.msk [vmem:[%s241_s11] sm:$0x1] %vm1019_vm3, %v1018_v39  ;;  %v1217_v9 = vadd.f32 %v1216_v44, %v1215_v42 }
 0x17c   : > { %1218 = vst.msk [vmem:[%s244_s14] sm:$0x1] %vm1019_vm3, %v1217_v9 }
 0x17d PF: > { %s16_s18 = sadd.s32 1, %s1559_s18  }
 0x17e   : > { %p13_p5 = scmp.ge.s32.totalorder %s16_s18, 4  }
 0x180   :  { %15 = sbr.rel (!%p13_p5) target bundleno = 1 (0x1), region = 86 }

// kernel: down_transition_forward.7
= control target key start
LH: loop header
LB: loop body
LE: loop exit
PB: predicated region body
PF: predicated region fallthrough
CT: control target
= control target key end

     0   :  { %s240_s0 = inlined_call_operand.vmem [shape: bf16[64,128], index: 0, kind: input, shape index: {}]   ;;  %s241_s1 = inlined_call_operand.vmem [shape: f32[1,128], index: 1, kind: input, shape index: {}]   ;;  %s242_s2 = inlined_call_operand.vmem [shape: f32[1,128], index: 2, kind: input, shape index: {}]   ;;  %s243_s3 = inlined_call_operand.vmem [shape: bf16[64,128], index: 3, kind: output, shape index: {}]  }
   0x1   :  { %v131_v0 = vld [vmem:[%s240_s0] sm:$0xff]   ;;  %v166_v5 = vld [vmem:[%s240_s0 + $0x8] sm:$0xff]   ;;  %v167_v8 = vld [vmem:[%s240_s0 + $0x10] sm:$0xff]  }
   0x2   :  { %v172_v1 = vld [vmem:[%s241_s1] ss:$0 sm:$0xff]  ;;  %v132_v2 = vunpack.c.l.bf16 %v131_v0  ;;  %v133_v3 = vunpack.c.h.bf16 %v131_v0  ;;  %v136_v6 = vunpack.c.l.bf16 %v166_v5  ;;  %v137_v7 = vunpack.c.h.bf16 %v166_v5  ;;  %v168_v9 = vld [vmem:[%s240_s0 + $0x18] sm:$0xff]  }
   0x3   :  { %v173_v4 = vld [vmem:[%s242_s2] ss:$0 sm:$0xff]  ;;  %v140_v12 = vunpack.c.l.bf16 %v167_v8  ;;  %v141_v13 = vunpack.c.h.bf16 %v167_v8  ;;  %v144_v16 = vunpack.c.l.bf16 %v168_v9  ;;  %v145_v17 = vunpack.c.h.bf16 %v168_v9 }
   0x4   :  { %v34_v10 = vmul.f32 %v172_v1, %v132_v2  ;;  %v35_v11 = vmul.f32 %v172_v1, %v133_v3  ;;  %v36_v14 = vmul.f32 %v172_v1, %v136_v6  ;;  %v37_v15 = vmul.f32 %v172_v1, %v137_v7 }
   0x5   :  { %v38_v20 = vmul.f32 %v172_v1, %v140_v12  ;;  %v39_v21 = vmul.f32 %v172_v1, %v141_v13  ;;  %v40_v24 = vmul.f32 %v172_v1, %v144_v16  ;;  %v41_v25 = vmul.f32 %v172_v1, %v145_v17 }
   0x6   :  { %v46_v18 = vadd.f32 %v173_v4, %v34_v10  ;;  %v47_v19 = vadd.f32 %v173_v4, %v35_v11  ;;  %v48_v22 = vadd.f32 %v173_v4, %v36_v14  ;;  %v49_v23 = vadd.f32 %v173_v4, %v37_v15 }
   0x7   :  { %v50_v32 = vadd.f32 %v173_v4, %v38_v20  ;;  %v51_v33 = vadd.f32 %v173_v4, %v39_v21  ;;  %v52_v36 = vadd.f32 %v173_v4, %v40_v24  ;;  %v53_v37 = vadd.f32 %v173_v4, %v41_v25 }
   0x8   :  { %v62_v26 = vmin.f32 %v46_v18, 0.0  ;;  %v63_v27 = vmin.f32 %v47_v19, 0.0  ;;  %v64_v28 = vmin.f32 %v48_v22, 0.0  ;;  %v65_v29 = vmin.f32 %v49_v23, 0.0 }
   0x9   :  { %v66_v38 = vmin.f32 %v50_v32, 0.0  ;;  %v67_v39 = vmin.f32 %v51_v33, 0.0  ;;  %v68_v41 = vmin.f32 %v52_v36, 0.0  ;;  %v69_v42 = vmin.f32 %v53_v37, 0.0 }
   0xa   :  { %v70_v30 = vmul.f32 1.442695, %v62_v26  ;;  %v72_v31 = vmul.f32 1.442695, %v63_v27  ;;  %v74_v34 = vmul.f32 1.442695, %v64_v28 }
   0xb   :  { %v76_v35 = vmul.f32 1.442695, %v65_v29  ;;  %v78_v40 = vmul.f32 1.442695, %v66_v38  ;;  %v80_v43 = vmul.f32 1.442695, %v67_v39 }
   0xc   :  { %174 = vpow2.f32 %v70_v30  ;;  %v82_v44 = vmul.f32 1.442695, %v68_v41  ;;  %v84_v45 = vmul.f32 1.442695, %v69_v42  ;;  %vm54_vm0 = vcmp.gt.f32.partialorder %v46_v18, 0.0 }
   0xd   :  { %176 = vpow2.f32 %v72_v31  ;;  %vm55_vm1 = vcmp.gt.f32.partialorder %v47_v19, 0.0  ;;  %vm56_vm2 = vcmp.gt.f32.partialorder %v48_v22, 0.0  ;;  %vm57_vm3 = vcmp.gt.f32.partialorder %v49_v23, 0.0 }
   0xe   :  { %178 = vpow2.f32 %v74_v34  ;;  %vm58_vm4 = vcmp.gt.f32.partialorder %v50_v32, 0.0  ;;  %vm59_vm5 = vcmp.gt.f32.partialorder %v51_v33, 0.0  ;;  %vm60_vm6 = vcmp.gt.f32.partialorder %v52_v36, 0.0 }
   0xf   :  { %180 = vpow2.f32 %v76_v35  ;;  %vm61_vm7 = vcmp.gt.f32.partialorder %v53_v37, 0.0 }
  0x10   :  { %182 = vpow2.f32 %v78_v40 }
  0x11   :  { %184 = vpow2.f32 %v80_v43 }
  0x12   :  { %v175_v46 = vpop.eup %174  ;;  %186 = vpow2.f32 %v82_v44 }
  0x13   :  { %v177_v47 = vpop.eup %176  ;;  %v122_v48 = vadd.f32 -1.0, %v175_v46  ;;  %188 = vpow2.f32 %v84_v45 }
  0x14   :  { %v179_v49 = vpop.eup %178  ;;  %v123_v50 = vadd.f32 -1.0, %v177_v47 }
  0x15   :  { %v181_v51 = vpop.eup %180  ;;  %v94_v52 = vsel %vm54_vm0, %v46_v18, %v122_v48  ;;  %v124_v53 = vadd.f32 -1.0, %v179_v49 }
  0x16   :  { %v183_v54 = vpop.eup %182  ;;  %v95_v55 = vsel %vm55_vm1, %v47_v19, %v123_v50  ;;  %v125_v56 = vadd.f32 -1.0, %v181_v51 }
  0x17   :  { %v185_v57 = vpop.eup %184  ;;  %v149_v58 = vpack.c.bf16 %v95_v55, %v94_v52  ;;  %v96_v59 = vsel %vm56_vm2, %v48_v22, %v124_v53  ;;  %v126_v60 = vadd.f32 -1.0, %v183_v54 }
  0x18   :  { %v187_v61 = vpop.eup %186  ;;  %v97_v62 = vsel %vm57_vm3, %v49_v23, %v125_v56  ;;  %v127_v63 = vadd.f32 -1.0, %v185_v57 }
  0x19   :  { %v189_v0 = vpop.eup %188  ;;  %150 = vst [vmem:[%s243_s3] sm:$0xff] %v149_v58   ;;  %v154_v1 = vpack.c.bf16 %v97_v62, %v96_v59  ;;  %v98_v2 = vsel %vm58_vm4, %v50_v32, %v126_v60  ;;  %v128_v3 = vadd.f32 -1.0, %v187_v61 }
  0x1a   :  { %v99_v4 = vsel %vm59_vm5, %v51_v33, %v127_v63  ;;  %v129_v5 = vadd.f32 -1.0, %v189_v0 }
  0x1b   :  { %169 = vst [vmem:[%s243_s3 + $0x8] sm:$0xff] %v154_v1   ;;  %v159_v6 = vpack.c.bf16 %v99_v4, %v98_v2  ;;  %v100_v7 = vsel %vm60_vm6, %v52_v36, %v128_v3 }
  0x1c   :  { %v101_v8 = vsel %vm61_vm7, %v53_v37, %v129_v5 }
  0x1d   :  { %170 = vst [vmem:[%s243_s3 + $0x10] sm:$0xff] %v159_v6   ;;  %v164_v9 = vpack.c.bf16 %v101_v8, %v100_v7 }
  0x1f   :  { %171 = vst [vmem:[%s243_s3 + $0x18] sm:$0xff] %v164_v9  }

// kernel: down_transition_forward.9
= control target key start
LH: loop header
LB: loop body
LE: loop exit
PB: predicated region body
PF: predicated region fallthrough
CT: control target
= control target key end

     0   :  { %s410_s0 = inlined_call_operand.vmem [shape: bf16[96,128], index: 0, kind: input, shape index: {}]   ;;  %s411_s1 = inlined_call_operand.vmem [shape: f32[1,128], index: 1, kind: input, shape index: {}]   ;;  %s412_s2 = inlined_call_operand.vmem [shape: f32[1,128], index: 2, kind: input, shape index: {}]   ;;  %s413_s3 = inlined_call_operand.vmem [shape: bf16[96,128], index: 3, kind: output, shape index: {}]  }
   0x1   :  { %v183_v0 = vld [vmem:[%s410_s0] sm:$0xff]   ;;  %v236_v5 = vld [vmem:[%s410_s0 + $0x8] sm:$0xff]   ;;  %v237_v8 = vld [vmem:[%s410_s0 + $0x10] sm:$0xff]  }
   0x2   :  { %v298_v1 = vld [vmem:[%s411_s1] ss:$0 sm:$0xff]  ;;  %v184_v2 = vunpack.c.l.bf16 %v183_v0  ;;  %v185_v3 = vunpack.c.h.bf16 %v183_v0  ;;  %v188_v6 = vunpack.c.l.bf16 %v236_v5  ;;  %v189_v7 = vunpack.c.h.bf16 %v236_v5  ;;  %v238_v9 = vld [vmem:[%s410_s0 + $0x18] sm:$0xff]   ;;  %v240_v41 = vld [vmem:[%s410_s0 + $0x28] sm:$0xff]  }
   0x3   :  { %v303_v4 = vld [vmem:[%s412_s2] ss:$0 sm:$0xff]  ;;  %v192_v12 = vunpack.c.l.bf16 %v237_v8  ;;  %v193_v13 = vunpack.c.h.bf16 %v237_v8  ;;  %v196_v16 = vunpack.c.l.bf16 %v238_v9  ;;  %v197_v17 = vunpack.c.h.bf16 %v238_v9 }
   0x4   :  { %v42_v10 = vmul.f32 %v298_v1, %v184_v2  ;;  %v43_v11 = vmul.f32 %v298_v1, %v185_v3  ;;  %v44_v14 = vmul.f32 %v298_v1, %v188_v6  ;;  %v45_v15 = vmul.f32 %v298_v1, %v189_v7  ;;  %v239_v39 = vld [vmem:[%s410_s0 + $0x20] sm:$0xff]  }
   0x5   :  { %v46_v20 = vmul.f32 %v298_v1, %v192_v12  ;;  %v47_v21 = vmul.f32 %v298_v1, %v193_v13  ;;  %v48_v24 = vmul.f32 %v298_v1, %v196_v16  ;;  %v49_v25 = vmul.f32 %v298_v1, %v197_v17 }
   0x6   :  { %v58_v18 = vadd.f32 %v303_v4, %v42_v10  ;;  %v320_v19 = vadd.f32 %v303_v4, %v43_v11  ;;  %v325_v22 = vadd.f32 %v303_v4, %v44_v14  ;;  %v328_v23 = vadd.f32 %v303_v4, %v45_v15 }
   0x7   :  { %v336_v32 = vadd.f32 %v303_v4, %v46_v20  ;;  %v339_v33 = vadd.f32 %v303_v4, %v47_v21  ;;  %v342_v36 = vadd.f32 %v303_v4, %v48_v24  ;;  %v345_v37 = vadd.f32 %v303_v4, %v49_v25 }
   0x8   :  { %v82_v26 = vmin.f32 %v58_v18, 0.0  ;;  %v83_v27 = vmin.f32 %v320_v19, 0.0  ;;  %v84_v28 = vmin.f32 %v325_v22, 0.0  ;;  %v85_v29 = vmin.f32 %v328_v23, 0.0 }
   0x9   :  { %v86_v38 = vmin.f32 %v336_v32, 0.0  ;;  %vm70_vm0 = vcmp.gt.f32.partialorder %v58_v18, 0.0  ;;  %vm71_vm1 = vcmp.gt.f32.partialorder %v320_v19, 0.0  ;;  %v87_v40 = vmin.f32 %v339_v33, 0.0 }
   0xa   :  { %v94_v30 = vmul.f32 1.442695, %v82_v26  ;;  %v96_v31 = vmul.f32 1.442695, %v83_v27  ;;  %v98_v34 = vmul.f32 1.442695, %v84_v28  ;;  %v200_v46 = vunpack.c.l.bf16 %v239_v39 }
   0xb   :  { %v100_v35 = vmul.f32 1.442695, %v85_v29  ;;  %v102_v42 = vmul.f32 1.442695, %v86_v38  ;;  %v88_v43 = vmin.f32 %v342_v36, 0.0  ;;  %v89_v44 = vmin.f32 %v345_v37, 0.0 }
   0xc   :  { %248 = vpow2.f32 %v94_v30  ;;  %v104_v45 = vmul.f32 1.442695, %v87_v40  ;;  %v201_v47 = vunpack.c.h.bf16 %v239_v39  ;;  %v204_v50 = vunpack.c.l.bf16 %v240_v41 }
   0xd   :  { %250 = vpow2.f32 %v96_v31  ;;  %v106_v48 = vmul.f32 1.442695, %v88_v43  ;;  %v108_v49 = vmul.f32 1.442695, %v89_v44  ;;  %v50_v51 = vmul.f32 %v298_v1, %v200_v46 }
   0xe   :  { %252 = vpow2.f32 %v98_v34  ;;  %v51_v52 = vmul.f32 %v298_v1, %v201_v47  ;;  %v205_v53 = vunpack.c.h.bf16 %v240_v41  ;;  %vm72_vm2 = vcmp.gt.f32.partialorder %v325_v22, 0.0 }
   0xf   :  { %254 = vpow2.f32 %v100_v35  ;;  %vm73_vm3 = vcmp.gt.f32.partialorder %v328_v23, 0.0  ;;  %v52_v55 = vmul.f32 %v298_v1, %v204_v50  ;;  %v66_v58 = vadd.f32 %v303_v4, %v50_v51 }
  0x10   :  { %256 = vpow2.f32 %v102_v42  ;;  %v67_v59 = vadd.f32 %v303_v4, %v51_v52  ;;  %vm74_vm4 = vcmp.gt.f32.partialorder %v336_v32, 0.0  ;;  %vm75_vm5 = vcmp.gt.f32.partialorder %v339_v33, 0.0 }
  0x11   :  { %258 = vpow2.f32 %v104_v45  ;;  %v53_v62 = vmul.f32 %v298_v1, %v205_v53  ;;  %vm76_vm6 = vcmp.gt.f32.partialorder %v342_v36, 0.0  ;;  %v68_v3 = vadd.f32 %v303_v4, %v52_v55 }
  0x12   :  { %v249_v54 = vpop.eup %248  ;;  %260 = vpow2.f32 %v106_v48  ;;  %v90_v8 = vmin.f32 %v66_v58, 0.0  ;;  %v91_v9 = vmin.f32 %v67_v59, 0.0  ;;  %vm77_vm7 = vcmp.gt.f32.partialorder %v345_v37, 0.0 }
  0x13   :  { %v251_v56 = vpop.eup %250  ;;  %v170_v57 = vadd.f32 -1.0, %v249_v54  ;;  %262 = vpow2.f32 %v108_v49  ;;  %v69_v13 = vadd.f32 %v303_v4, %v53_v62  ;;  %v92_v26 = vmin.f32 %v68_v3, 0.0 }
  0x14   :  { %v253_v60 = vpop.eup %252  ;;  %v171_v61 = vadd.f32 -1.0, %v251_v56  ;;  %v110_v17 = vmul.f32 1.442695, %v90_v8  ;;  %vm78_vm8 = vcmp.gt.f32.partialorder %v66_v58, 0.0  ;;  %vm79_vm9 = vcmp.gt.f32.partialorder %v67_v59, 0.0 }
  0x15   :  { %v255_v63 = vpop.eup %254  ;;  %v130_v0 = vsel %vm70_vm0, %v58_v18, %v170_v57  ;;  %v172_v2 = vadd.f32 -1.0, %v253_v60  ;;  %v112_v18 = vmul.f32 1.442695, %v91_v9  ;;  %v93_v28 = vmin.f32 %v69_v13, 0.0 }
  0x16   :  { %v257_v5 = vpop.eup %256  ;;  %v131_v6 = vsel %vm71_vm1, %v320_v19, %v171_v61  ;;  %v173_v7 = vadd.f32 -1.0, %v255_v63  ;;  %264 = vpow2.f32 %v110_v17  ;;  %v114_v30 = vmul.f32 1.442695, %v92_v26 }
  0x17   :  { %v259_v10 = vpop.eup %258  ;;  %v209_v11 = vpack.c.bf16 %v131_v6, %v130_v0  ;;  %v132_v1 = vsel %vm72_vm2, %v325_v22, %v172_v2  ;;  %v174_v12 = vadd.f32 -1.0, %v257_v5  ;;  %266 = vpow2.f32 %v112_v18 }
  0x18   :  { %v261_v14 = vpop.eup %260  ;;  %v133_v15 = vsel %vm73_vm3, %v328_v23, %v173_v7  ;;  %v175_v16 = vadd.f32 -1.0, %v259_v10  ;;  %v116_v31 = vmul.f32 1.442695, %v93_v28  ;;  %268 = vpow2.f32 %v114_v30 }
  0x19   :  { %v263_v19 = vpop.eup %262  ;;  %210 = vst [vmem:[%s413_s3] sm:$0xff] %v209_v11   ;;  %v214_v20 = vpack.c.bf16 %v133_v15, %v132_v1  ;;  %v134_v21 = vsel %vm74_vm4, %v336_v32, %v174_v12  ;;  %v176_v4 = vadd.f32 -1.0, %v261_v14  ;;  %vm80_vm10 = vcmp.gt.f32.partialorder %v68_v3, 0.0 }
  0x1a   :  { %v135_v22 = vsel %vm75_vm5, %v339_v33, %v175_v16  ;;  %v177_v23 = vadd.f32 -1.0, %v263_v19  ;;  %270 = vpow2.f32 %v116_v31  ;;  %vm81_vm11 = vcmp.gt.f32.partialorder %v69_v13, 0.0 }
  0x1b   :  { %241 = vst [vmem:[%s413_s3 + $0x8] sm:$0xff] %v214_v20   ;;  %v219_v24 = vpack.c.bf16 %v135_v22, %v134_v21  ;;  %v136_v25 = vsel %vm76_vm6, %v342_v36, %v176_v4 }
  0x1c   :  { %v137_v27 = vsel %vm77_vm7, %v345_v37, %v177_v23  ;;  %v265_v32 = vpop.eup %264 }
  0x1d   :  { %242 = vst [vmem:[%s413_s3 + $0x10] sm:$0xff] %v219_v24   ;;  %v224_v29 = vpack.c.bf16 %v137_v27, %v136_v25  ;;  %v267_v33 = vpop.eup %266  ;;  %v178_v34 = vadd.f32 -1.0, %v265_v32 }
  0x1e   :  { %v179_v35 = vadd.f32 -1.0, %v267_v33  ;;  %v269_v38 = vpop.eup %268 }
  0x1f   :  { %243 = vst [vmem:[%s413_s3 + $0x18] sm:$0xff] %v224_v29   ;;  %v138_v36 = vsel %vm78_vm8, %v66_v58, %v178_v34  ;;  %v180_v41 = vadd.f32 -1.0, %v269_v38 }
  0x20   :  { %v139_v37 = vsel %vm79_vm9, %v67_v59, %v179_v35  ;;  %v271_v40 = vpop.eup %270 }
  0x21   :  { %v229_v39 = vpack.c.bf16 %v139_v37, %v138_v36  ;;  %v181_v42 = vadd.f32 -1.0, %v271_v40  ;;  %v140_v43 = vsel %vm80_vm10, %v68_v3, %v180_v41 }
  0x23   :  { %244 = vst [vmem:[%s413_s3 + $0x20] sm:$0xff] %v229_v39   ;;  %v141_v44 = vsel %vm81_vm11, %v69_v13, %v181_v42 }
  0x24   :  { %v234_v45 = vpack.c.bf16 %v141_v44, %v140_v43 }
  0x26   :  { %245 = vst [vmem:[%s413_s3 + $0x28] sm:$0xff] %v234_v45  }

// kernel: down_transition_forward.8
= control target key start
LH: loop header
LB: loop body
LE: loop exit
PB: predicated region body
PF: predicated region fallthrough
CT: control target
= control target key end

     0   :  { %s4587_s13 = smov 0   ;;  %s4589_s14 = smov 0   ;;  %s5867_s0 = inlined_call_operand.vmem [shape: bf16[2,12,156,8], index: 0, kind: input, shape index: {}, may-alias: {0,1,2,3,4}]   ;;  %s5868_s1 = inlined_call_operand.vmem [shape: bf16[2,12,156,8], index: 1, kind: input, shape index: {}, may-alias: {0,1,2,3,4}]   ;;  %s5869_s2 = inlined_call_operand.vmem [shape: bf16[2,12,156,8], index: 2, kind: input, shape index: {}, may-alias: {0,1,2,3,4}]   ;;  %s5870_s3 = inlined_call_operand.vmem [shape: bf16[2,12,156,8], index: 3, kind: input, shape index: {}, may-alias: {0,1,2,3,4}]   ;;  %s5871_s4 = inlined_call_operand.vmem [shape: bf16[2,12,156,8], index: 4, kind: input, shape index: {}, may-alias: {0,1,2,3,4}]   ;;  %s5872_s5 = inlined_call_operand.vmem [shape: bf16[200,40], index: 5, kind: input, shape index: {}]   ;;  %s5873_s6 = inlined_call_operand.vmem [shape: f32[96,1], index: 6, kind: input, shape index: {}]   ;;  %s5874_s7 = inlined_call_operand.vmem [shape: f32[1,8], index: 7, kind: input, shape index: {}]   ;;  %s5875_s8 = inlined_call_operand.vmem [shape: bf16[2,8,96,8], index: 8, kind: output, shape index: {0}]   ;;  %s5876_s9 = inlined_call_operand.vmem [shape: f32[2,8,1,8], index: 9, kind: output, shape index: {1}]   ;;  %s5877_s10 = inlined_call_operand.vmem [shape: f32[2,8,1,8], index: 10, kind: output, shape index: {2}]  }
   0x1   :  { %s4591_s15 = smov 0   ;;  %s4593_s16 = smov 0  }
   0x2   :  { %s4595_s17 = smov 0  }
   0x3 LB: > { %s30_s18 = sadd.s32 1, %s4517_s15  ;;  %s33_s19 = sadd.s32 1, %s4521_s16  ;;  %s4525_s17 = sphi %s4595_s17, %s21_s17   ;;  %s4521_s16 = sphi %s4593_s16, %s5881_s16   ;;  %s4517_s15 = sphi %s4591_s15, %s5880_s15   ;;  %s4513_s14 = sphi %s4589_s14, %s5879_s14   ;;  %s4509_s13 = sphi %s4587_s13, %s5878_s13  }
   0x4   : > { %p31_p0 = scmp.ge.s32.totalorder %s30_s18, 8  ;;  %p3846_p1 = scmp.ge.s32.totalorder %s4525_s17, 1 }
   0x5   : > { %p421_p2 = scmp.lt.s32.totalorder %s4525_s17, 17 }
   0x6   : > { %s5883_s18 = smov (%p31_p0, %s30_s18), 0  ;;  %s5885_s19 = smov (!%p31_p0, %s33_s19), %s4521_s16 }
   0x7   : > { %p422_p3 = pnand %p3846_p1, %p421_p2  ;;  %p35_p4 = scmp.ge.s32.totalorder %s5885_s19, 2 }
   0x8   : > { %p521_p5 = scmp.lt.s32.totalorder (!%p422_p3), %s4513_s14, 1  ;;  %p523_p6 = scmp.lt.s32.totalorder (!%p422_p3), %s4509_s13, 11 }
   0x9   : > { %s5887_s19 = smov (%p35_p4, %s5885_s19), 0  ;;  %425 = sbr.rel (%p422_p3) target bundleno = 1047 (0x417), region = 52 }
   0xa   : > { %s552_s29 = sadd.s32 (!%p422_p3), 3, %s4509_s13  ;;  %p576_p11 = scmp.lt.s32.totalorder (!%p422_p3), %s4509_s13, 7 }
   0xb   : > { %p555_p9 = scmp.lt.s32.totalorder (!%p422_p3), %s552_s29, 11 }
   0xe   : > { %v618_v0 = vld [vmem:[%s5872_s5 + $0x4] sm:$0xf]  ;;  %vm688_vm0 = vcmask 1043456   ;;  %v898_v2 = vld [vmem:[%s5872_s5 + $0xc] sm:$0xf]  ;;  %s5889_s14 = smov (!%p521_p5, %s4513_s14), 1 }
   0xf   : > { %v690_v1 = vsel %vm688_vm0, %v618_v0, 0  ;;  %v617_v3 = vld [vmem:[%s5872_s5] sm:$0xf]  ;;  %v939_v4 = vsel %vm688_vm0, %v898_v2, 0  ;;  %v997_v6 = vld [vmem:[%s5872_s5 + $0x10] sm:$0xf] }
  0x10   : > { %4417 = vmatpush.bf16.msra.mxu1 %v690_v1  ;;  %699 = vmatpush.bf16.msra.mxu0 %v690_v1  ;;  %v766_v5 = vsel %vm688_vm0, %v617_v3, 0  ;;  %s524_s28 = scalar_select %p523_p6, %s4509_s13, 11  ;;  %v1017_v7 = vsel %vm688_vm0, %v997_v6, 0  ;;  %v811_v8 = vld [vmem:[%s5872_s5 + $0x8] sm:$0xf]  ;;  %vm652_vm1 = vcmask 1045504  }
  0x11   : > { %4419 = vmatpush.bf16.msra.mxu3 %v690_v1  ;;  %s4643_s11 = smul.u32 240, %s5889_s14  ;;  %4418 = vmatpush.bf16.msra.mxu2 %v690_v1  ;;  %v840_v9 = vsel %vm688_vm0, %v811_v8, 0  ;;  %vm666_vm2 = vcmask 64512   ;;  %v1208_v29 = vld [vmem:[%s5872_s5 + $0x18] sm:$0xf]  ;;  %s5895_s29 = smov (!%p555_p9, %s552_s29), 11 }
  0x12   : > { %s4430_s12 = smul.u32 20, %s524_s28  ;;  %v1253_v32 = vsel %vm688_vm0, %v1208_v29, 0  ;;  %v1311_v35 = vld [vmem:[%s5872_s5 + $0x1c] sm:$0xf]  ;;  %v1094_v36 = vld [vmem:[%s5872_s5 + $0x14] sm:$0xf] }
  0x13   : > { %v1398_v37 = vld [vmem:[%s5872_s5 + $0x20] sm:$0xf]  ;;  %v1340_v38 = vsel %vm688_vm0, %v1311_v35, 0  ;;  %v1150_v39 = vsel %vm688_vm0, %v1094_v36, 0  ;;  %v1594_v3 = vld [vmem:[%s5872_s5 + $0x28] sm:$0xf] }
  0x14   : > { %775 = vmatpush.bf16.msrb.mxu1 %v766_v5  ;;  %1026 = vmatpush.bf16.msrb.mxu0 %v1017_v7  ;;  %s527_s20 = sadd.s32 %s4643_s11, %s4430_s12  ;;  %v1439_v40 = vsel %vm688_vm0, %v1398_v37, 0  ;;  %v1650_v5 = vsel %vm688_vm0, %v1594_v3, 0  ;;  %v1708_v7 = vld [vmem:[%s5872_s5 + $0x2c] sm:$0xf]  ;;  %v1497_v8 = vld [vmem:[%s5872_s5 + $0x24] sm:$0xf] }
  0x15   : > { %948 = vmatpush.bf16.msrb.mxu3 %v939_v4  ;;  %849 = vmatpush.bf16.msrb.mxu2 %v840_v9  ;;  %s3847_s21 = sshll.u32 %s527_s20, 2  ;;  %vm3088_vm3 = vcmask 1046528   ;;  %vm3236_vm4 = vcmask 1044480   ;;  %vm3411_vm5 = vcmask 60416   ;;  %vm3537_vm6 = vcmask 57344  }
  0x16   : > { %s4650_s24 = scalar_lea.vmem %s5867_s0, %s3847_s21  ;;  %s530_s21 = sadd.s32 1, %s4509_s13 }
  0x17   : > { %v4426_v10 = vld [vmem:[%s4650_s24 + $0x14] sm:$0xff]   ;;  %v4654_v11 = vld [vmem:[%s4650_s24 + $0x1c] sm:$0xff]   ;;  %v4422_v12 = vld [vmem:[%s4650_s24 + $0x4] sm:$0xff]   ;;  %p533_p7 = scmp.lt.s32.totalorder %s530_s21, 11 }
  0x18   : > { %v4424_v13 = vld [vmem:[%s4650_s24 + $0xc] sm:$0xff]   ;;  %v656_v16 = vrot.slane %v4426_v10, 2  ;;  %v658_v17 = vrot.slane %v4654_v11, 2  ;;  %v653_v18 = vrot.slane %v4422_v12, 2  ;;  %v4429_v20 = vld [vmem:[%s4650_s24 + $0x24] sm:$0xff]   ;;  %v4214_v44 = vld [vmem:[%s4650_s24 + $0x18] sm:$0xff]  }
  0x19   : > { %v4659_v14 = vld [vmem:[%s4650_s24 + $0x28] sm:$0xff]   ;;  %v4662_v15 = vld [vmem:[%s4650_s24 + $0x30] sm:$0xff]   ;;  %v654_v21 = vrot.slane %v4424_v13, 2  ;;  %v660_v28 = vrot.slane %v4429_v20, 2  ;;  %v4033_v45 = vld [vmem:[%s4650_s24] sm:$0xff]   ;;  %v905_v47 = vrot.slane %v4214_v44, 2 }
  0x1a   : > { %v4055_v19 = vunpack.c.h.b16 %v4659_v14  ;;  %v4668_v22 = vunpack.c.l.b16 %v4662_v15  ;;  %v4671_v23 = vunpack.c.h.b16 %v4662_v15  ;;  %v659_v24 = vsel %vm652_vm1, %v656_v16, %v658_v17  ;;  %v4213_v43 = vld [vmem:[%s4650_s24 + $0x10] sm:$0xff]   ;;  %v4215_v49 = vld [vmem:[%s4650_s24 + $0x20] sm:$0xff]   ;;  %v4212_v50 = vld [vmem:[%s4650_s24 + $0x8] sm:$0xff]   ;;  %s5891_s21 = smov (!%p533_p7, %s530_s21), 11 }
  0x1b   : > { %3857 = vmatmul.msk.bf16.vlgmr.msra.gmra.mxu1 %vm666_vm2, %v659_v24  ;;  %v655_v25 = vsel %vm652_vm1, %v653_v18, %v654_v21  ;;  %v661_v41 = vsel %vm652_vm1, %v658_v17, %v660_v28  ;;  %v657_v42 = vsel %vm652_vm1, %v654_v21, %v656_v16  ;;  %v904_v46 = vrot.slane %v4213_v43, 2  ;;  %v4218_v57 = vld [vmem:[%s4650_s24 + $0x38] sm:$0xff]   ;;  %v4219_v62 = vld [vmem:[%s4650_s24 + $0x40] sm:$0xff]   ;;  %s4432_s22 = smul.u32 20, %s5891_s21  ;;  %v616_v9 = vld [vmem:[%s4650_s24 + $0x48] sm:$0xf] }
  0x1c   : > { %v650_v26 = vpack.c.b16 %v4668_v22, %v4055_v19  ;;  %v651_v27 = vpack.c.b16 %v4671_v23, %v4671_v23  ;;  %3855 = vmatmul.msk.bf16.vlgmr.msra.gmra.mxu0 %vm666_vm2, %v655_v25  ;;  %1159 = vmatpush.bf16.msra.mxu1 %v1150_v39  ;;  %v907_v51 = vrot.slane %v4215_v49, 2  ;;  %v909_v53 = vrot.slane %v4659_v14, 2  ;;  %v1811_v12 = vld [vmem:[%s5872_s5 + $0x30] sm:$0xf]  ;;  %s541_s24 = sadd.s32 2, %s4509_s13 }
  0x1d   : > { %1448 = vmatpush.bf16.msra.mxu0 %v1439_v40  ;;  %v906_v48 = vsel %vm652_vm1, %v904_v46, %v905_v47  ;;  %v911_v55 = vrot.slane %v4662_v15, 2  ;;  %v4062_v58 = vunpack.c.l.b16 %v4218_v57  ;;  %v913_v59 = vrot.slane %v4218_v57, 2  ;;  %s537_s26 = sadd.s32 %s4432_s22, %s4643_s11  ;;  %p544_p8 = scmp.lt.s32.totalorder %s541_s24, 11 }
  0x1e   : > { %v662_v30 = vrot.slane %v650_v26, 2  ;;  %v664_v31 = vrot.slane %v651_v27, 2  ;;  %v908_v52 = vsel %vm652_vm1, %v905_v47, %v907_v51  ;;  %v910_v54 = vsel %vm652_vm1, %v907_v51, %v909_v53  ;;  %s3848_s27 = sshll.u32 %s537_s26, 2  ;;  %s563_s26 = sadd.s32 4, %s4509_s13 }
  0x1f   : > { %v912_v56 = vsel %vm652_vm1, %v909_v53, %v911_v55  ;;  %v816_v60 = vpack.c.b16 %v4062_v58, %v4671_v23  ;;  %v914_v61 = vsel %vm652_vm1, %v911_v55, %v913_v59  ;;  %v4066_v63 = vunpack.c.l.b16 %v4219_v62  ;;  %s4768_s22 = scalar_lea.vmem %s5868_s1, %s3848_s27  ;;  %s5893_s24 = smov (!%p544_p8, %s541_s24), 11 }
  0x20   : > { %v665_v33 = vsel %vm652_vm1, %v662_v30, %v664_v31  ;;  %v663_v34 = vsel %vm652_vm1, %v660_v28, %v662_v30  ;;  %v4063_v1 = vunpack.c.h.b16 %v4218_v57  ;;  %v4381_v16 = vld [vmem:[%s4768_s22 + $0xc] sm:$0xff]   ;;  %v743_v17 = vpack.c.b16 %v4668_v22, %v4668_v22  ;;  %v4789_v27 = vld [vmem:[%s4768_s22 + $0x18] sm:$0xff]   ;;  %v4386_v3 = vld [vmem:[%s4768_s22 + $0x24] sm:$0xff]   ;;  %s4433_s28 = smul.u32 20, %s5893_s24  ;;  %p566_p10 = scmp.lt.s32.totalorder %s563_s26, 11 }
  0x21   : > { %3860 = vmatmul.msk.bf16.vlgmr.msra.gmra.mxu3 %vm666_vm2, %v665_v33  ;;  %3859 = vmatmul.msk.bf16.vlgmr.msra.gmra.mxu2 %vm666_vm2, %v663_v34  ;;  %v903_v0 = vpack.c.b16 %v4066_v63, %v4066_v63  ;;  %v1219_v23 = vrot.slane %v4381_v16, 2  ;;  %v4069_v34 = vld [vmem:[%s4768_s22] sm:$0xff]   ;;  %s5899_s13 = smov (!%p576_p11, %s4509_s13), 7 }
  0x22   : > { %1262 = vmatpush.bf16.msra.mxu2 %v1253_v32  ;;  %1349 = vmatpush.bf16.msra.mxu3 %v1340_v38  ;;  %v817_v4 = vpack.c.b16 %v4063_v1, %v4063_v1  ;;  %v4383_v32 = vld [vmem:[%s4768_s22 + $0x14] sm:$0xff]   ;;  %v4385_v47 = vld [vmem:[%s4768_s22 + $0x1c] sm:$0xff]   ;;  %s548_s21 = sadd.s32 %s4433_s28, %s4643_s11  ;;  %s5897_s26 = smov (!%p566_p10, %s563_s26), 11 }
  0x23   : > { %v915_v2 = vrot.slane %v903_v0, 2  ;;  %v1221_v37 = vrot.slane %v4383_v32, 2  ;;  %v1223_v53 = vrot.slane %v4385_v47, 2  ;;  %s3849_s24 = sshll.u32 %s548_s21, 2  ;;  %s4435_s30 = smul.u32 20, %s5897_s26 }
  0x24   : > { %s4925_s28 = scalar_lea.vmem %s5869_s2, %s3849_s24 }
  0x25   : > { %v916_v6 = vsel %vm652_vm1, %v913_v59, %v915_v2  ;;  %v1222_v40 = vsel %vm652_vm1, %v1219_v23, %v1221_v37  ;;  %s570_s12 = sadd.s32 %s4435_s30, %s4643_s11  ;;  %s4530_s30 = smov 104  }
  0x2b   : > { %3858 = vmatmul.msk.bf16.gmra.mxu1 %vm666_vm2, %v661_v41 }
  0x2c   : > { %3856 = vmatmul.msk.bf16.gmra.mxu0 %vm666_vm2, %v657_v42 }
  0x31   : > { %3861 = vmatmul.msk.bf16.gmra.mxu3 %vm666_vm2, %v664_v31  ;;  %3869 = vmatmul.msk.bf16.vlgmr.msrb.gmra.mxu2 %vm666_vm2, %v4424_v13  ;;  %v1001_v13 = vunpack.c.l.b16 %v616_v9  ;;  %v1405_v31 = vrot.slane %v4789_v27, 2  ;;  %v1225_v9 = vrot.slane %v4386_v3, 2 }
  0x32   : > { %1659 = vmatpush.bf16.msrb.mxu2 %v1650_v5 }
  0x33   : > { %v1003_v19 = vpack.c.b16 %v1001_v13, %v1001_v13 }
  0x3b   : > { %3862 = vmatmul.msk.bf16.vlgmr.msrb.gmra.mxu1 %vm666_vm2, %v4033_v45 }
  0x3c   : > { %3883 = vmatmul.msk.bf16.vlgmr.msrb.gmra.mxu0 %vm666_vm2, %v4214_v44 }
  0x41   : > { %3876 = vmatmul.msk.bf16.vlgmr.msrb.gmra.mxu3 %vm666_vm2, %v906_v48  ;;  %3870 = vmatmul.msk.bf16.gmra.mxu2 %vm666_vm2, %v4426_v10  ;;  %v1753_v10 = vsel %vm688_vm0, %v1708_v7, 0 }
  0x42   : > { %1762 = vmatpush.bf16.msrb.mxu3 %v1753_v10 }
  0x4b   : > { %3863 = vmatmul.msk.bf16.gmra.mxu1 %vm666_vm2, %v4212_v50 }
  0x4c   : > { %3884 = vmatmul.msk.bf16.gmra.mxu0 %vm666_vm2, %v4215_v49 }
  0x51   : > { %3877 = vmatmul.msk.bf16.gmra.mxu3 %vm666_vm2, %v908_v52  ;;  %3871 = vmatmul.msk.bf16.gmra.mxu2 %vm666_vm2, %v4654_v11  ;;  %v1517_v11 = vsel %vm688_vm0, %v1497_v8, 0 }
  0x52   : > { %1526 = vmatpush.bf16.msrb.mxu1 %v1517_v11 }
  0x5b   : > { %3864 = vmatmul.msk.bf16.gmra.mxu1 %vm666_vm2, %v4213_v43  ;;  %v4813_v43 = vld [vmem:[%s4768_s22 + $0x20] sm:$0xff]  }
  0x5c   : > { %3885 = vmatmul.msk.bf16.gmra.mxu0 %vm666_vm2, %v4659_v14  ;;  %v1407_v46 = vrot.slane %v4813_v43, 2 }
  0x5e   : > { %v1408_v52 = vsel %vm652_vm1, %v1405_v31, %v1407_v46 }
  0x61   : > { %3878 = vmatmul.msk.bf16.gmra.mxu3 %vm666_vm2, %v910_v54  ;;  %3872 = vmatmul.msk.bf16.gmra.mxu2 %vm666_vm2, %v4429_v20 }
  0x6b   : > { %3865 = vmatmul.msk.bf16.gmra.mxu1 %vm666_vm2, %v4214_v44 }
  0x6c   : > { %3886 = vmatmul.msk.bf16.gmra.mxu0 %vm666_vm2, %v4662_v15  ;;  %v4379_v15 = vld [vmem:[%s4768_s22 + $0x4] sm:$0xff]  }
  0x6d   : > { %v1218_v21 = vrot.slane %v4379_v15, 2 }
  0x6f   : > { %v1220_v24 = vsel %vm652_vm1, %v1218_v21, %v1219_v23 }
  0x71   : > { %3879 = vmatmul.msk.bf16.gmra.mxu3 %vm666_vm2, %v912_v56  ;;  %3873 = vmatmul.msk.bf16.gmra.mxu2 %vm666_vm2, %v650_v26  ;;  %v4221_v26 = vld [vmem:[%s4768_s22 + $0x10] sm:$0xff]  }
  0x72   : > { %v1404_v30 = vrot.slane %v4221_v26, 2 }
  0x74   : > { %v1406_v36 = vsel %vm652_vm1, %v1404_v30, %v1405_v31 }
  0x7b   : > { %3866 = vmatmul.msk.bf16.gmra.mxu1 %vm666_vm2, %v4215_v49  ;;  %v4220_v49 = vld [vmem:[%s4768_s22 + $0x8] sm:$0xff]  }
  0x7c   : > { %3887 = vmatmul.msk.bf16.gmra.mxu0 %vm666_vm2, %v4218_v57  ;;  %v1224_v57 = vsel %vm652_vm1, %v1221_v37, %v1223_v53 }
  0x81   : > { %3880 = vmatmul.msk.bf16.gmra.mxu3 %vm666_vm2, %v914_v61  ;;  %3874 = vmatmul.msk.bf16.gmra.mxu2 %vm666_vm2, %v816_v60  ;;  %v4827_v61 = vld [vmem:[%s4768_s22 + $0x28] sm:$0xff]  }
  0x82   : > { %v4091_v21 = vunpack.c.h.b16 %v4827_v61 }
  0x8b   : > { %3867 = vmatmul.msk.bf16.gmra.mxu1 %vm666_vm2, %v4659_v14  ;;  %v1840_v14 = vsel %vm688_vm0, %v1811_v12, 0 }
  0x8c   : > { %3888 = vmatmul.msk.bf16.gmra.mxu0 %vm666_vm2, %v4219_v62 }
  0x8d   : > { %1849 = vmatpush.bf16.msrb.mxu0 %v1840_v14  ;;  %v1226_v14 = vsel %vm652_vm1, %v1223_v53, %v1225_v9 }
  0x91   : > { %3881 = vmatmul.msk.bf16.gmra.mxu3 %vm666_vm2, %v916_v6  ;;  %3875 = vmatmul.msk.bf16.gmra.mxu2 %vm666_vm2, %v817_v4 }
  0x98   : > { %v4778_v18 = vpop.f32.mrf.mxu1 }
  0x99   : > { %v701_v20 = vpop.f32.mrf.mxu0 }
  0x9b   : > { %3868 = vmatmul.msk.bf16.gmra.mxu1 %vm666_vm2, %v743_v17  ;;  %v4842_v17 = vld [vmem:[%s4768_s22 + $0x30] sm:$0xff]  }
  0x9c   : > { %3889 = vmatmul.msk.bf16.gmra.mxu0 %vm666_vm2, %v1003_v19  ;;  %v4846_v23 = vunpack.c.l.b16 %v4842_v17  ;;  %v1411_v31 = vrot.slane %v4842_v17, 2  ;;  %v4095_v53 = vunpack.c.h.b16 %v4842_v17 }
  0xa0   : > { %v4784_v25 = vpop.f32.mrf.mxu1 }
  0xa1   : > { %3882 = vmatmul.msk.bf16.gmra.mxu3 %vm666_vm2, %v915_v2  ;;  %3897 = vmatmul.msk.bf16.vlgmr.msra.gmra.mxu2 %vm666_vm2, %v1220_v24  ;;  %v703_v22 = vpop.f32.mrf.mxu0  ;;  %v1409_v2 = vrot.slane %v4827_v61, 2 }
  0xa3   : > { %v1410_v8 = vsel %vm652_vm1, %v1407_v46, %v1409_v2 }
  0xa4   : > { %v4791_v28 = vpop.f32.mrf.mxu3  ;;  %v4793_v29 = vpop.f32.mrf.mxu2 }
  0xa8   : > { %v4797_v33 = vpop.f32.mrf.mxu1 }
  0xa9   : > { %v706_v35 = vpop.f32.mrf.mxu0 }
  0xab   : > { %3890 = vmatmul.msk.bf16.vlgmr.msra.gmra.mxu1 %vm666_vm2, %v4069_v34 }
  0xac   : > { %v4801_v38 = vpop.f32.mrf.mxu3  ;;  %v4804_v39 = vpop.f32.mrf.mxu2  ;;  %3911 = vmatmul.msk.bf16.vlgmr.msra.gmra.mxu0 %vm666_vm2, %v1406_v36 }
  0xb0   : > { %v4809_v41 = vpop.f32.mrf.mxu1 }
  0xb1   : > { %3904 = vmatmul.msk.bf16.vlgmr.msra.gmra.mxu3 %vm666_vm2, %v4381_v16  ;;  %3898 = vmatmul.msk.bf16.gmra.mxu2 %vm666_vm2, %v1222_v40  ;;  %v708_v42 = vpop.f32.mrf.mxu0  ;;  %v1412_v40 = vsel %vm652_vm1, %v1409_v2, %v1411_v31 }
  0xb4   : > { %v4815_v44 = vpop.f32.mrf.mxu3  ;;  %v851_v45 = vpop.f32.mrf.mxu2 }
  0xb8   : > { %v777_v48 = vpop.f32.mrf.mxu1 }
  0xb9   : > { %v778_v50 = vadd.f32 %v777_v48, %v701_v20  ;;  %v1028_v51 = vpop.f32.mrf.mxu0 }
  0xbb   : > { %3891 = vmatmul.msk.bf16.gmra.mxu1 %vm666_vm2, %v4220_v49  ;;  %v885_v56 = vadd.f32 %v851_v45, %v778_v50 }
  0xbc   : > { %v733_v54 = vpop.f32.mrf.mxu3  ;;  %v853_v55 = vpop.f32.mrf.mxu2  ;;  %3912 = vmatmul.msk.bf16.gmra.mxu0 %vm666_vm2, %v1408_v52 }
  0xbd   : > { %v4865_v54 = vld [vmem:[%s4768_s22 + $0x38] sm:$0xff]  }
  0xc0   : > { %v779_v58 = vpop.f32.mrf.mxu1 }
  0xc1   : > { %3905 = vmatmul.msk.bf16.gmra.mxu3 %vm666_vm2, %v4383_v32  ;;  %3899 = vmatmul.msk.bf16.gmra.mxu2 %vm666_vm2, %v1224_v57  ;;  %v780_v59 = vadd.f32 %v779_v58, %v703_v22  ;;  %v1030_v60 = vpop.f32.mrf.mxu0  ;;  %v1216_v32 = vpack.c.b16 %v4846_v23, %v4091_v21 }
  0xc3   : > { %v886_v0 = vadd.f32 %v853_v55, %v780_v59  ;;  %v1413_v59 = vrot.slane %v4865_v54, 2 }
  0xc4   : > { %v950_v62 = vpop.f32.mrf.mxu3  ;;  %v856_v63 = vpop.f32.mrf.mxu2 }
  0xc5   : > { %v984_v1 = vadd.f32 %v950_v62, %v885_v56 }
  0xc7   : > { %v4831_v4 = vadd.f32 %v1028_v51, %v984_v1 }
  0xc8   : > { %v782_v5 = vpop.f32.mrf.mxu1 }
  0xc9   : > { %v783_v6 = vadd.f32 %v782_v5, %v706_v35  ;;  %v1033_v7 = vpop.f32.mrf.mxu0 }
  0xcb   : > { %3892 = vmatmul.msk.bf16.gmra.mxu1 %vm666_vm2, %v4221_v26  ;;  %v887_v12 = vadd.f32 %v856_v63, %v783_v6 }
  0xcc   : > { %v952_v10 = vpop.f32.mrf.mxu3  ;;  %v858_v11 = vpop.f32.mrf.mxu2  ;;  %3913 = vmatmul.msk.bf16.gmra.mxu0 %vm666_vm2, %v1410_v8 }
  0xcd   : > { %v985_v13 = vadd.f32 %v952_v10, %v886_v0 }
  0xcf   : > { %v4837_v15 = vadd.f32 %v1030_v60, %v985_v13  ;;  %v1217_v60 = vpack.c.b16 %v4095_v53, %v4095_v53 }
  0xd0   : > { %v784_v16 = vpop.f32.mrf.mxu1 }
  0xd1   : > { %3906 = vmatmul.msk.bf16.gmra.mxu3 %vm666_vm2, %v4385_v47  ;;  %3900 = vmatmul.msk.bf16.gmra.mxu2 %vm666_vm2, %v1226_v14  ;;  %v785_v19 = vadd.f32 %v784_v16, %v708_v42  ;;  %v1035_v20 = vpop.f32.mrf.mxu0  ;;  %v1227_v42 = vrot.slane %v1216_v32, 2  ;;  %v1229_v2 = vrot.slane %v1217_v60, 2 }
  0xd3   : > { %v888_v26 = vadd.f32 %v858_v11, %v785_v19  ;;  %v1228_v49 = vsel %vm652_vm1, %v1225_v9, %v1227_v42  ;;  %v1230_v9 = vsel %vm652_vm1, %v1227_v42, %v1229_v2 }
  0xd4   : > { %v955_v24 = vpop.f32.mrf.mxu3  ;;  %v861_v22 = vpop.f32.mrf.mxu2 }
  0xd5   : > { %v986_v30 = vadd.f32 %v955_v24, %v887_v12 }
  0xd7   : > { %v4850_v34 = vadd.f32 %v1033_v7, %v986_v30  ;;  %v4098_v30 = vunpack.c.l.b16 %v4865_v54 }
  0xd8   : > { %v787_v35 = vpop.f32.mrf.mxu1 }
  0xd9   : > { %v788_v36 = vadd.f32 %v787_v35, %v4778_v18  ;;  %v1038_v37 = vpop.f32.mrf.mxu0  ;;  %v1316_v42 = vpack.c.b16 %v4098_v30, %v4095_v53 }
  0xdb   : > { %3893 = vmatmul.msk.bf16.gmra.mxu1 %vm666_vm2, %v4789_v27  ;;  %v889_v47 = vadd.f32 %v861_v22, %v788_v36 }
  0xdc   : > { %v957_v45 = vpop.f32.mrf.mxu3  ;;  %v863_v46 = vpop.f32.mrf.mxu2  ;;  %3914 = vmatmul.msk.bf16.gmra.mxu0 %vm666_vm2, %v1412_v40 }
  0xdd   : > { %v987_v48 = vadd.f32 %v957_v45, %v888_v26  ;;  %v1997_v45 = vld [vmem:[%s5872_s5 + $0x38] sm:$0xf] }
  0xdf   : > { %v4858_v50 = vadd.f32 %v1035_v20, %v987_v48  ;;  %v2094_v48 = vld [vmem:[%s5872_s5 + $0x3c] sm:$0xf] }
  0xe0   : > { %v789_v18 = vpop.f32.mrf.mxu1 }
  0xe1   : > { %3907 = vmatmul.msk.bf16.gmra.mxu3 %vm666_vm2, %v4386_v3  ;;  %3901 = vmatmul.msk.bf16.gmra.mxu2 %vm666_vm2, %v1228_v49  ;;  %v790_v51 = vadd.f32 %v789_v18, %v4784_v25  ;;  %v1040_v52 = vpop.f32.mrf.mxu0  ;;  %v1414_v25 = vsel %vm652_vm1, %v1411_v31, %v1413_v59  ;;  %v4873_v3 = vld [vmem:[%s4768_s22 + $0x40] sm:$0xff]   ;;  %v1898_v49 = vld [vmem:[%s5872_s5 + $0x34] sm:$0xf] }
  0xe2   : > { %v1939_v53 = vsel %vm688_vm0, %v1898_v49, 0  ;;  %v4393_v49 = vld [vmem:[%s4925_s28 + $0x14] sm:$0xff]  }
  0xe3   : > { %v890_v57 = vadd.f32 %v863_v46, %v790_v51  ;;  %1948 = vmatpush.bf16.msra.mxu1 %v1939_v53 }
  0xe4   : > { %v960_v55 = vpop.f32.mrf.mxu3  ;;  %v866_v56 = vpop.f32.mrf.mxu2 }
  0xe5   : > { %v988_v58 = vadd.f32 %v960_v55, %v889_v47 }
  0xe7   : > { %v4868_v62 = vadd.f32 %v1038_v37, %v988_v58 }
  0xe8   : > { %v792_v63 = vpop.f32.mrf.mxu1 }
  0xe9   : > { %v793_v0 = vadd.f32 %v792_v63, %v4797_v33  ;;  %v1043_v1 = vpop.f32.mrf.mxu0  ;;  %v4102_v33 = vunpack.c.l.b16 %v4873_v3  ;;  %v1127_v63 = vpack.c.b16 %v4846_v23, %v4846_v23 }
  0xeb   : > { %3894 = vmatmul.msk.bf16.gmra.mxu1 %vm666_vm2, %v4813_v43  ;;  %v891_v7 = vadd.f32 %v866_v56, %v793_v0  ;;  %v1403_v14 = vpack.c.b16 %v4102_v33, %v4102_v33 }
  0xec   : > { %v962_v5 = vpop.f32.mrf.mxu3  ;;  %v868_v6 = vpop.f32.mrf.mxu2  ;;  %3915 = vmatmul.msk.bf16.gmra.mxu0 %vm666_vm2, %v1414_v25 }
  0xed   : > { %v989_v8 = vadd.f32 %v962_v5, %v890_v57  ;;  %v1415_v24 = vrot.slane %v1403_v14, 2 }
  0xef   : > { %v4880_v10 = vadd.f32 %v1040_v52, %v989_v8  ;;  %v1416_v35 = vsel %vm652_vm1, %v1413_v59, %v1415_v24  ;;  %v2150_v52 = vsel %vm688_vm0, %v2094_v48, 0  ;;  %v2208_v59 = vld [vmem:[%s5872_s5 + $0x40] sm:$0xf] }
  0xf0   : > { %v794_v11 = vpop.f32.mrf.mxu1  ;;  %2159 = vmatpush.bf16.msra.mxu3 %v2150_v52  ;;  %v2253_v60 = vsel %vm688_vm0, %v2208_v59, 0 }
  0xf1   : > { %3908 = vmatmul.msk.bf16.gmra.mxu3 %vm666_vm2, %v1216_v32  ;;  %3902 = vmatmul.msk.bf16.gmra.mxu2 %vm666_vm2, %v1230_v9  ;;  %v795_v12 = vadd.f32 %v794_v11, %v4809_v41  ;;  %v1045_v13 = vpop.f32.mrf.mxu0  ;;  %v4105_v9 = vld [vmem:[%s4925_s28] sm:$0xff]  }
  0xf2   : > { %2262 = vmatpush.bf16.msra.mxu0 %v2253_v60  ;;  %v4958_v60 = vld [vmem:[%s4925_s28 + $0x10] sm:$0xff]  }
  0xf3   : > { %v892_v20 = vadd.f32 %v868_v6, %v795_v12 }
  0xf4   : > { %v965_v16 = vpop.f32.mrf.mxu3  ;;  %v871_v19 = vpop.f32.mrf.mxu2 }
  0xf5   : > { %v990_v21 = vadd.f32 %v965_v16, %v891_v7 }
  0xf7   : > { %v4886_v22 = vadd.f32 %v1043_v1, %v990_v21  ;;  %v4099_v1 = vunpack.c.h.b16 %v4865_v54  ;;  %v4391_v21 = vld [vmem:[%s4925_s28 + $0xc] sm:$0xff]  }
  0xf8   : > { %v797_v26 = vpop.f32.mrf.mxu1 }
  0xf9   : > { %v798_v31 = vadd.f32 %v797_v26, %v4793_v29  ;;  %v1048_v32 = vpop.f32.mrf.mxu0  ;;  %v2017_v29 = vsel %vm688_vm0, %v1997_v45, 0  ;;  %v1317_v8 = vpack.c.b16 %v4099_v1, %v4099_v1 }
  0xfa   : > { %2026 = vmatpush.bf16.msra.mxu2 %v2017_v29 }
  0xfb   : > { %3895 = vmatmul.msk.bf16.gmra.mxu1 %vm666_vm2, %v4827_v61  ;;  %v893_v37 = vadd.f32 %v871_v19, %v798_v31 }
  0xfc   : > { %v967_v41 = vpop.f32.mrf.mxu3  ;;  %v873_v36 = vpop.f32.mrf.mxu2  ;;  %3916 = vmatmul.msk.bf16.gmra.mxu0 %vm666_vm2, %v1416_v35  ;;  %v1719_v35 = vrot.slane %v4391_v21, 2 }
  0xfd   : > { %v991_v40 = vadd.f32 %v967_v41, %v892_v20  ;;  %v4389_v20 = vld [vmem:[%s4925_s28 + $0x4] sm:$0xff]  }
  0xff   : > { %v4898_v46 = vadd.f32 %v1045_v13, %v991_v40 }
 0x100   : > { %v799_v47 = vpop.f32.mrf.mxu1 }
 0x101   : > { %3909 = vmatmul.msk.bf16.gmra.mxu3 %vm666_vm2, %v1316_v42  ;;  %3903 = vmatmul.msk.bf16.gmra.mxu2 %vm666_vm2, %v1229_v2  ;;  %v800_v18 = vadd.f32 %v799_v47, %v4804_v39  ;;  %v1050_v51 = vpop.f32.mrf.mxu0  ;;  %v4253_v42 = vld [vmem:[%s4925_s28 + $0x8] sm:$0xff]  }
 0x103   : > { %v894_v57 = vadd.f32 %v873_v36, %v800_v18 }
 0x104   : > { %v970_v55 = vpop.f32.mrf.mxu3  ;;  %v876_v56 = vpop.f32.mrf.mxu2 }
 0x105   : > { %v992_v58 = vadd.f32 %v970_v55, %v893_v37  ;;  %v1721_v55 = vrot.slane %v4393_v49, 2 }
 0x107   : > { %v4916_v39 = vadd.f32 %v1048_v32, %v992_v58  ;;  %v1718_v32 = vrot.slane %v4389_v20, 2  ;;  %v1722_v59 = vsel %vm652_vm1, %v1719_v35, %v1721_v55 }
 0x108   : > { %v802_v0 = vpop.f32.mrf.mxu1 }
 0x109   : > { %v803_v25 = vadd.f32 %v802_v0, %v4791_v28  ;;  %v1053_v2 = vpop.f32.mrf.mxu0  ;;  %v1720_v40 = vsel %vm652_vm1, %v1718_v32, %v1719_v35 }
 0x10b   : > { %3896 = vmatmul.msk.bf16.gmra.mxu1 %vm666_vm2, %v1127_v63  ;;  %v895_v7 = vadd.f32 %v876_v56, %v803_v25 }
 0x10c   : > { %v972_v5 = vpop.f32.mrf.mxu3  ;;  %v878_v6 = vpop.f32.mrf.mxu2  ;;  %3917 = vmatmul.msk.bf16.gmra.mxu0 %vm666_vm2, %v1415_v24 }
 0x10d   : > { %v993_v23 = vadd.f32 %v972_v5, %v894_v57  ;;  %v4395_v5 = vld [vmem:[%s4925_s28 + $0x1c] sm:$0xff]  }
 0x10f   : > { %v4930_v28 = vadd.f32 %v1050_v51, %v993_v23 }
 0x110   : > { %v804_v33 = vpop.f32.mrf.mxu1 }
 0x111   : > { %3910 = vmatmul.msk.bf16.gmra.mxu3 %vm666_vm2, %v1317_v8  ;;  %3925 = vmatmul.msk.bf16.vlgmr.msrb.gmra.mxu2 %vm666_vm2, %v4105_v9  ;;  %v805_v11 = vadd.f32 %v804_v33, %v4801_v38  ;;  %v1055_v12 = vpop.f32.mrf.mxu0  ;;  %v1723_v9 = vrot.slane %v4395_v5, 2 }
 0x113   : > { %v896_v16 = vadd.f32 %v878_v6, %v805_v11 }
 0x114   : > { %v975_v13 = vpop.f32.mrf.mxu3  ;;  %v881_v14 = vpop.f32.mrf.mxu2 }
 0x115   : > { %v994_v19 = vadd.f32 %v975_v13, %v895_v7  ;;  %v1724_v13 = vsel %vm652_vm1, %v1721_v55, %v1723_v9 }
 0x117   : > { %v4937_v26 = vadd.f32 %v1053_v2, %v994_v19 }
 0x118   : > { %v807_v24 = vpop.f32.mrf.mxu1 }
 0x119   : > { %v808_v30 = vadd.f32 %v807_v24, %v4815_v44  ;;  %v1058_v31 = vpop.f32.mrf.mxu0 }
 0x11b   : > { %3918 = vmatmul.msk.bf16.vlgmr.msrb.gmra.mxu1 %vm666_vm2, %v4789_v27  ;;  %v897_v36 = vadd.f32 %v881_v14, %v808_v30  ;;  %v4973_v14 = vld [vmem:[%s4925_s28 + $0x18] sm:$0xff]  }
 0x11c   : > { %v977_v41 = vpop.f32.mrf.mxu3  ;;  %v883_v38 = vpop.f32.mrf.mxu2  ;;  %3939 = vmatmul.msk.bf16.vlgmr.msrb.gmra.mxu0 %vm666_vm2, %v4391_v21 }
 0x11d   : > { %v995_v37 = vadd.f32 %v977_v41, %v896_v16 }
 0x11f   : > { %v4945_v45 = vadd.f32 %v1055_v12, %v995_v37 }
 0x120   : > { %v809_v44 = vpop.f32.mrf.mxu1 }
 0x121   : > { %3932 = vmatmul.msk.bf16.vlgmr.msrb.gmra.mxu3 %vm666_vm2, %v1720_v40  ;;  %3926 = vmatmul.msk.bf16.gmra.mxu2 %vm666_vm2, %v4253_v42  ;;  %v1060_v29 = vpop.f32.mrf.mxu0 }
 0x122   : > { %v4990_v29 = vld [vmem:[%s4925_s28 + $0x20] sm:$0xff]  }
 0x124   : > { %v980_v47 = vpop.f32.mrf.mxu3  ;;  %v1264_v48 = vpop.f32.mrf.mxu2 }
 0x125   : > { %v996_v27 = vadd.f32 %v980_v47, %v897_v36  ;;  %v4993_v47 = vld [vmem:[%s4925_s28 + $0x28] sm:$0xff]  }
 0x127   : > { %v4950_v18 = vadd.f32 %v1058_v31, %v996_v27  ;;  %v4396_v31 = vld [vmem:[%s4925_s28 + $0x24] sm:$0xff]  }
 0x128   : > { %v1161_v51 = vpop.f32.mrf.mxu1  ;;  %v1725_v36 = vrot.slane %v4396_v31, 2 }
 0x129   : > { %v1195_v52 = vadd.f32 %v1161_v51, %v4831_v4  ;;  %v1450_v53 = vpop.f32.mrf.mxu0  ;;  %v4127_v51 = vunpack.c.h.b16 %v4993_v47 }
 0x12a   : > { %v1726_v44 = vsel %vm652_vm1, %v1723_v9, %v1725_v36  ;;  %v5021_v9 = vld [vmem:[%s4925_s28 + $0x38] sm:$0xff]  }
 0x12b   : > { %3919 = vmatmul.msk.bf16.gmra.mxu1 %vm666_vm2, %v4813_v43  ;;  %v1298_v58 = vadd.f32 %v1264_v48, %v1195_v52  ;;  %v4996_v48 = vld [vmem:[%s4925_s28 + $0x30] sm:$0xff]  }
 0x12c   : > { %v982_v56 = vpop.f32.mrf.mxu3  ;;  %v1266_v57 = vpop.f32.mrf.mxu2  ;;  %3940 = vmatmul.msk.bf16.gmra.mxu0 %vm666_vm2, %v4393_v49  ;;  %v4130_v52 = vunpack.c.l.b16 %v4996_v48 }
 0x130   : > { %v1163_v63 = vpop.f32.mrf.mxu1 }
 0x131   : > { %3933 = vmatmul.msk.bf16.gmra.mxu3 %vm666_vm2, %v1722_v59  ;;  %3927 = vmatmul.msk.bf16.gmra.mxu2 %vm666_vm2, %v4958_v60  ;;  %v1196_v4 = vadd.f32 %v1163_v63, %v4837_v15  ;;  %v1452_v0 = vpop.f32.mrf.mxu0 }
 0x133   : > { %v1299_v43 = vadd.f32 %v1266_v57, %v1196_v4 }
 0x134   : > { %v1351_v1 = vpop.f32.mrf.mxu3  ;;  %v1269_v25 = vpop.f32.mrf.mxu2 }
 0x135   : > { %v1385_v2 = vadd.f32 %v1351_v1, %v1298_v58  ;;  %v1716_v58 = vpack.c.b16 %v4130_v52, %v4127_v51 }
 0x137   : > { %v4965_v6 = vadd.f32 %v1450_v53, %v1385_v2  ;;  %v1727_v1 = vrot.slane %v1716_v58, 2 }
 0x138   : > { %v1166_v7 = vpop.f32.mrf.mxu1 }
 0x139   : > { %v1197_v23 = vadd.f32 %v1166_v7, %v4850_v34  ;;  %v1455_v8 = vpop.f32.mrf.mxu0 }
 0x13b   : > { %3920 = vmatmul.msk.bf16.gmra.mxu1 %vm666_vm2, %v4827_v61  ;;  %v1300_v15 = vadd.f32 %v1269_v25, %v1197_v23 }
 0x13c   : > { %v1353_v33 = vpop.f32.mrf.mxu3  ;;  %v1271_v11 = vpop.f32.mrf.mxu2  ;;  %3941 = vmatmul.msk.bf16.gmra.mxu0 %vm666_vm2, %v4395_v5  ;;  %v1728_v5 = vsel %vm652_vm1, %v1725_v36, %v1727_v1  ;;  %v2398_v36 = vld [vmem:[%s5872_s5 + $0x48] sm:$0xf] }
 0x13d   : > { %v1386_v12 = vadd.f32 %v1353_v33, %v1299_v43 }
 0x13f   : > { %v4975_v16 = vadd.f32 %v1452_v0, %v1386_v12 }
 0x140   : > { %v1168_v34 = vpop.f32.mrf.mxu1 }
 0x141   : > { %3934 = vmatmul.msk.bf16.gmra.mxu3 %vm666_vm2, %v1724_v13  ;;  %3928 = vmatmul.msk.bf16.gmra.mxu2 %vm666_vm2, %v4973_v14  ;;  %v1198_v61 = vadd.f32 %v1168_v34, %v4858_v50  ;;  %v1457_v19 = vpop.f32.mrf.mxu0  ;;  %v4134_v13 = vunpack.c.l.b16 %v5021_v9 }
 0x143   : > { %v1301_v24 = vadd.f32 %v1271_v11, %v1198_v61 }
 0x144   : > { %v1356_v20 = vpop.f32.mrf.mxu3  ;;  %v1274_v21 = vpop.f32.mrf.mxu2 }
 0x145   : > { %v1387_v30 = vadd.f32 %v1356_v20, %v1300_v15 }
 0x147   : > { %v4982_v32 = vadd.f32 %v1455_v8, %v1387_v30 }
 0x148   : > { %v1171_v35 = vpop.f32.mrf.mxu1 }
 0x149   : > { %v1199_v41 = vadd.f32 %v1171_v35, %v4868_v62  ;;  %v1460_v38 = vpop.f32.mrf.mxu0 }
 0x14b   : > { %3921 = vmatmul.msk.bf16.gmra.mxu1 %vm666_vm2, %v4842_v17  ;;  %v1302_v40 = vadd.f32 %v1274_v21, %v1199_v41 }
 0x14c   : > { %v1358_v37 = vpop.f32.mrf.mxu3  ;;  %v1276_v50 = vpop.f32.mrf.mxu2  ;;  %3942 = vmatmul.msk.bf16.gmra.mxu0 %vm666_vm2, %v4396_v31 }
 0x14d   : > { %v1388_v42 = vadd.f32 %v1358_v37, %v1301_v24  ;;  %v2439_v37 = vsel %vm688_vm0, %v2398_v36, 0 }
 0x14e   : > { %2448 = vmatpush.bf16.msrb.mxu2 %v2439_v37 }
 0x14f   : > { %v4998_v62 = vadd.f32 %v1457_v19, %v1388_v42  ;;  %v2497_v42 = vld [vmem:[%s5872_s5 + $0x4c] sm:$0xf] }
 0x150   : > { %v1173_v27 = vpop.f32.mrf.mxu1 }
 0x151   : > { %3935 = vmatmul.msk.bf16.gmra.mxu3 %vm666_vm2, %v1726_v44  ;;  %3929 = vmatmul.msk.bf16.gmra.mxu2 %vm666_vm2, %v4990_v29  ;;  %v1200_v17 = vadd.f32 %v1173_v27, %v4880_v10  ;;  %v1462_v49 = vpop.f32.mrf.mxu0  ;;  %v2311_v44 = vld [vmem:[%s5872_s5 + $0x44] sm:$0xf] }
 0x152   : > { %v2340_v51 = vsel %vm688_vm0, %v2311_v44, 0 }
 0x153   : > { %v1303_v56 = vadd.f32 %v1276_v50, %v1200_v17  ;;  %2349 = vmatpush.bf16.msrb.mxu1 %v2340_v51 }
 0x154   : > { %v1361_v53 = vpop.f32.mrf.mxu3  ;;  %v1279_v55 = vpop.f32.mrf.mxu2 }
 0x155   : > { %v1389_v57 = vadd.f32 %v1361_v53, %v1302_v40  ;;  %v1093_v40 = vld [vmem:[%s4768_s22 + $0x48] sm:$0xf]  ;;  %s4434_s22 = smul.u32 20, %s5895_s29 }
 0x157   : > { %v5006_v59 = vadd.f32 %v1460_v38, %v1389_v57  ;;  %v1627_v38 = vpack.c.b16 %v4130_v52, %v4130_v52  ;;  %s559_s27 = sadd.s32 %s4434_s22, %s4643_s11 }
 0x158   : > { %v1176_v63 = vpop.f32.mrf.mxu1  ;;  %s3850_s29 = sshll.u32 %s559_s27, 2  ;;  %s4528_s27 = smov 120  }
 0x159   : > { %v1201_v4 = vadd.f32 %v1176_v63, %v4886_v22  ;;  %v1465_v0 = vpop.f32.mrf.mxu0  ;;  %s5064_s20 = scalar_lea.vmem %s5870_s3, %s3850_s29  ;;  %s4529_s29 = smov 112  }
 0x15a   : > { %v4141_v37 = vld [vmem:[%s5064_s20] sm:$0xff]  }
 0x15b   : > { %3922 = vmatmul.msk.bf16.gmra.mxu1 %vm666_vm2, %v4865_v54  ;;  %v1304_v43 = vadd.f32 %v1279_v55, %v1201_v4  ;;  %v4131_v54 = vunpack.c.h.b16 %v4996_v48 }
 0x15c   : > { %v1363_v25 = vpop.f32.mrf.mxu3  ;;  %v1281_v10 = vpop.f32.mrf.mxu2  ;;  %3943 = vmatmul.msk.bf16.gmra.mxu0 %vm666_vm2, %v1716_v58  ;;  %v4135_v58 = vunpack.c.h.b16 %v5021_v9 }
 0x15d   : > { %v1390_v2 = vadd.f32 %v1363_v25, %v1303_v56  ;;  %v1717_v34 = vpack.c.b16 %v4131_v54, %v4131_v54  ;;  %v1816_v20 = vpack.c.b16 %v4134_v13, %v4131_v54  ;;  %v1501_v56 = vunpack.c.l.b16 %v1093_v40 }
 0x15e   : > { %v1817_v25 = vpack.c.b16 %v4135_v58, %v4135_v58 }
 0x15f   : > { %v5013_v7 = vadd.f32 %v1462_v49, %v1390_v2  ;;  %v1729_v24 = vrot.slane %v1717_v34, 2  ;;  %v2517_v49 = vsel %vm688_vm0, %v2497_v42, 0  ;;  %v5093_v42 = vld [vmem:[%s5064_s20 + $0x14] sm:$0xff]  }
 0x160   : > { %v1178_v22 = vpop.f32.mrf.mxu1  ;;  %2526 = vmatpush.bf16.msrb.mxu3 %v2517_v49  ;;  %v2221_v51 = vrot.slane %v5093_v42, 2 }
 0x161   : > { %3936 = vmatmul.msk.bf16.gmra.mxu3 %vm666_vm2, %v1728_v5  ;;  %3930 = vmatmul.msk.bf16.gmra.mxu2 %vm666_vm2, %v4993_v47  ;;  %v1202_v23 = vadd.f32 %v1178_v22, %v4898_v46  ;;  %v1467_v8 = vpop.f32.mrf.mxu0 }
 0x163   : > { %v1305_v15 = vadd.f32 %v1281_v10, %v1202_v23 }
 0x164   : > { %v1366_v33 = vpop.f32.mrf.mxu3  ;;  %v1284_v11 = vpop.f32.mrf.mxu2 }
 0x165   : > { %v1391_v12 = vadd.f32 %v1366_v33, %v1304_v43 }
 0x167   : > { %v5024_v61 = vadd.f32 %v1465_v0, %v1391_v12  ;;  %v1503_v0 = vpack.c.b16 %v1501_v56, %v1501_v56 }
 0x168   : > { %v1181_v19 = vpop.f32.mrf.mxu1 }
 0x169   : > { %v1203_v21 = vadd.f32 %v1181_v19, %v4916_v39  ;;  %v1470_v46 = vpop.f32.mrf.mxu0  ;;  %v1730_v39 = vsel %vm652_vm1, %v1727_v1, %v1729_v24  ;;  %v1904_v19 = vrot.slane %v4958_v60, 2 }
 0x16b   : > { %3923 = vmatmul.msk.bf16.gmra.mxu1 %vm666_vm2, %v4873_v3  ;;  %v1306_v35 = vadd.f32 %v1284_v11, %v1203_v21  ;;  %v4399_v11 = vld [vmem:[%s5064_s20 + $0x4] sm:$0xff]  }
 0x16c   : > { %v1368_v30 = vpop.f32.mrf.mxu3  ;;  %v1286_v31 = vpop.f32.mrf.mxu2  ;;  %3944 = vmatmul.msk.bf16.gmra.mxu0 %vm666_vm2, %v1816_v20  ;;  %v1905_v20 = vrot.slane %v4973_v14, 2 }
 0x16d   : > { %v1392_v41 = vadd.f32 %v1368_v30, %v1305_v15  ;;  %v5074_v15 = vld [vmem:[%s5064_s20 + $0xc] sm:$0xff]  }
 0x16f   : > { %v5036_v50 = vadd.f32 %v1467_v8, %v1392_v41 }
 0x170   : > { %v1183_v3 = vpop.f32.mrf.mxu1 }
 0x171   : > { %3937 = vmatmul.msk.bf16.gmra.mxu3 %vm666_vm2, %v1730_v39  ;;  %3931 = vmatmul.msk.bf16.gmra.mxu2 %vm666_vm2, %v1627_v38  ;;  %v1204_v27 = vadd.f32 %v1183_v3, %v4930_v28  ;;  %v1472_v17 = vpop.f32.mrf.mxu0  ;;  %v2594_v28 = vld [vmem:[%s5872_s5 + $0x50] sm:$0xf] }
 0x172   : > { %v2650_v63 = vsel %vm688_vm0, %v2594_v28, 0 }
 0x173   : > { %v1307_v55 = vadd.f32 %v1286_v31, %v1204_v27  ;;  %2659 = vmatpush.bf16.msrb.mxu0 %v2650_v63 }
 0x174   : > { %v1371_v52 = vpop.f32.mrf.mxu3  ;;  %v1289_v53 = vpop.f32.mrf.mxu2 }
 0x175   : > { %v1393_v57 = vadd.f32 %v1371_v52, %v1306_v35 }
 0x177   : > { %v5055_v4 = vadd.f32 %v1470_v46, %v1393_v57  ;;  %v2218_v46 = vrot.slane %v4399_v11, 2 }
 0x178   : > { %v1186_v1 = vpop.f32.mrf.mxu1 }
 0x179   : > { %v1205_v10 = vadd.f32 %v1186_v1, %v4937_v26  ;;  %v1475_v43 = vpop.f32.mrf.mxu0 }
 0x17b   : > { %3924 = vmatmul.msk.bf16.gmra.mxu1 %vm666_vm2, %v1503_v0  ;;  %v1308_v22 = vadd.f32 %v1289_v53, %v1205_v10  ;;  %v5110_v10 = vld [vmem:[%s5064_s20 + $0x1c] sm:$0xff]  }
 0x17c   : > { %v1373_v2 = vpop.f32.mrf.mxu3  ;;  %v1291_v5 = vpop.f32.mrf.mxu2  ;;  %3945 = vmatmul.msk.bf16.gmra.mxu0 %vm666_vm2, %v1817_v25 }
 0x17d   : > { %v1394_v23 = vadd.f32 %v1373_v2, %v1307_v55 }
 0x17f   : > { %v5066_v8 = vadd.f32 %v1472_v17, %v1394_v23  ;;  %v1907_v17 = vrot.slane %v4990_v29, 2  ;;  %v1909_v23 = vrot.slane %v4993_v47, 2 }
 0x180   : > { %v1188_v26 = vpop.f32.mrf.mxu1 }
 0x181   : > { %3938 = vmatmul.msk.bf16.gmra.mxu3 %vm666_vm2, %v1729_v24  ;;  %3953 = vmatmul.msk.bf16.vlgmr.msra.gmra.mxu2 %vm666_vm2, %v4973_v14  ;;  %v1206_v54 = vadd.f32 %v1188_v26, %v4945_v45  ;;  %v1477_v33 = vpop.f32.mrf.mxu0  ;;  %v2219_v24 = vrot.slane %v5074_v15, 2  ;;  %v1906_v45 = vsel %vm652_vm1, %v1904_v19, %v1905_v20  ;;  %v1908_v55 = vsel %vm652_vm1, %v1905_v20, %v1907_v17 }
 0x182   : > { %v2223_v26 = vrot.slane %v5110_v10, 2  ;;  %v1910_v11 = vsel %vm652_vm1, %v1907_v17, %v1909_v23  ;;  %v5145_v17 = vld [vmem:[%s5064_s20 + $0x30] sm:$0xff]  }
 0x183   : > { %v1309_v34 = vadd.f32 %v1291_v5, %v1206_v54  ;;  %v2220_v38 = vsel %vm652_vm1, %v2218_v46, %v2219_v24  ;;  %v2222_v58 = vsel %vm652_vm1, %v2219_v24, %v2221_v51 }
 0x184   : > { %v1376_v12 = vpop.f32.mrf.mxu3  ;;  %v1294_v13 = vpop.f32.mrf.mxu2 }
 0x185   : > { %v1395_v21 = vadd.f32 %v1376_v12, %v1308_v22 }
 0x187   : > { %v5079_v30 = vadd.f32 %v1475_v43, %v1395_v21 }
 0x188   : > { %v1191_v31 = vpop.f32.mrf.mxu1 }
 0x189   : > { %v1207_v35 = vadd.f32 %v1191_v31, %v4950_v18  ;;  %v1480_v41 = vpop.f32.mrf.mxu0 }
 0x18b   : > { %3946 = vmatmul.msk.bf16.vlgmr.msra.gmra.mxu1 %vm666_vm2, %v1906_v45  ;;  %v1310_v14 = vadd.f32 %v1294_v13, %v1207_v35  ;;  %v2224_v13 = vsel %vm652_vm1, %v2221_v51, %v2223_v26  ;;  %v5132_v45 = vld [vmem:[%s5064_s20 + $0x24] sm:$0xff]  }
 0x18c   : > { %v1378_v36 = vpop.f32.mrf.mxu3  ;;  %v1296_v60 = vpop.f32.mrf.mxu2  ;;  %3967 = vmatmul.msk.bf16.vlgmr.msra.gmra.mxu0 %vm666_vm2, %v2220_v38 }
 0x18d   : > { %v1396_v39 = vadd.f32 %v1378_v36, %v1309_v34  ;;  %v1911_v60 = vrot.slane %v4996_v48, 2 }
 0x18f   : > { %v5087_v3 = vadd.f32 %v1477_v33, %v1396_v39 }
 0x190   : > { %v1193_v40 = vpop.f32.mrf.mxu1 }
 0x191   : > { %3960 = vmatmul.msk.bf16.vlgmr.msra.gmra.mxu3 %vm666_vm2, %v4141_v37  ;;  %3954 = vmatmul.msk.bf16.gmra.mxu2 %vm666_vm2, %v4990_v29  ;;  %v1482_v18 = vpop.f32.mrf.mxu0  ;;  %v4286_v29 = vld [vmem:[%s5064_s20 + $0x8] sm:$0xff]   ;;  %v1912_v40 = vsel %vm652_vm1, %v1909_v23, %v1911_v60 }
 0x194   : > { %v1381_v44 = vpop.f32.mrf.mxu3  ;;  %v1661_v27 = vpop.f32.mrf.mxu2 }
 0x195   : > { %v1397_v49 = vadd.f32 %v1381_v44, %v1310_v14  ;;  %v2225_v14 = vrot.slane %v5132_v45, 2 }
 0x197   : > { %v5097_v52 = vadd.f32 %v1480_v41, %v1397_v49  ;;  %v2226_v44 = vsel %vm652_vm1, %v2223_v26, %v2225_v14 }
 0x198   : > { %v1528_v53 = vpop.f32.mrf.mxu1 }
 0x199   : > { %v1562_v56 = vadd.f32 %v1528_v53, %v4965_v6  ;;  %v1851_v57 = vpop.f32.mrf.mxu0 }
 0x19b   : > { %3947 = vmatmul.msk.bf16.gmra.mxu1 %vm666_vm2, %v1908_v55  ;;  %v1695_v0 = vadd.f32 %v1661_v27, %v1562_v56  ;;  %v5142_v27 = vld [vmem:[%s5064_s20 + $0x28] sm:$0xff]   ;;  %v5150_v55 = vld [vmem:[%s5064_s20 + $0x18] sm:$0xff]  }
 0x19c   : > { %v1383_v28 = vpop.f32.mrf.mxu3  ;;  %v1663_v63 = vpop.f32.mrf.mxu2  ;;  %3968 = vmatmul.msk.bf16.gmra.mxu0 %vm666_vm2, %v2222_v58  ;;  %v4163_v56 = vunpack.c.h.b16 %v5142_v27 }
 0x1a0   : > { %v1530_v1 = vpop.f32.mrf.mxu1 }
 0x1a1   : > { %3961 = vmatmul.msk.bf16.gmra.mxu3 %vm666_vm2, %v4286_v29  ;;  %3955 = vmatmul.msk.bf16.gmra.mxu2 %vm666_vm2, %v4993_v47  ;;  %v1563_v25 = vadd.f32 %v1530_v1, %v4975_v16  ;;  %v1853_v6 = vpop.f32.mrf.mxu0  ;;  %v5122_v47 = vld [vmem:[%s5064_s20 + $0x10] sm:$0xff]  }
 0x1a3   : > { %v1696_v5 = vadd.f32 %v1663_v63, %v1563_v25 }
 0x1a4   : > { %v1764_v43 = vpop.f32.mrf.mxu3  ;;  %v1666_v2 = vpop.f32.mrf.mxu2 }
 0x1a5   : > { %v1798_v22 = vadd.f32 %v1764_v43, %v1695_v0  ;;  %v1913_v43 = vrot.slane %v5021_v9, 2 }
 0x1a7   : > { %v5114_v54 = vadd.f32 %v1851_v57, %v1798_v22  ;;  %v1914_v23 = vsel %vm652_vm1, %v1911_v60, %v1913_v43 }
 0x1a8   : > { %v1533_v33 = vpop.f32.mrf.mxu1 }
 0x1a9   : > { %v1564_v12 = vadd.f32 %v1533_v33, %v4982_v32  ;;  %v1856_v16 = vpop.f32.mrf.mxu0 }
 0x1ab   : > { %3948 = vmatmul.msk.bf16.gmra.mxu1 %vm666_vm2, %v1910_v11  ;;  %v1697_v20 = vadd.f32 %v1666_v2, %v1564_v12  ;;  %v4260_v11 = vld [vmem:[%s4925_s28 + $0x40] sm:$0xff]  }
 0x1ac   : > { %v1766_v34 = vpop.f32.mrf.mxu3  ;;  %v1668_v19 = vpop.f32.mrf.mxu2  ;;  %3969 = vmatmul.msk.bf16.gmra.mxu0 %vm666_vm2, %v2224_v13 }
 0x1ad   : > { %v1799_v21 = vadd.f32 %v1766_v34, %v1696_v5  ;;  %v4138_v34 = vunpack.c.l.b16 %v4260_v11 }
 0x1af   : > { %v5124_v46 = vadd.f32 %v1853_v6, %v1799_v21 }
 0x1b0   : > { %v1535_v32 = vpop.f32.mrf.mxu1 }
 0x1b1   : > { %3962 = vmatmul.msk.bf16.gmra.mxu3 %vm666_vm2, %v5122_v47  ;;  %3956 = vmatmul.msk.bf16.gmra.mxu2 %vm666_vm2, %v4996_v48  ;;  %v1565_v24 = vadd.f32 %v1535_v32, %v4998_v62  ;;  %v1858_v31 = vpop.f32.mrf.mxu0  ;;  %v1903_v32 = vpack.c.b16 %v4138_v34, %v4138_v34  ;;  %v2404_v34 = vrot.slane %v5122_v47, 2 }
 0x1b3   : > { %v1698_v38 = vadd.f32 %v1668_v19, %v1565_v24  ;;  %v5177_v19 = vld [vmem:[%s5064_s20 + $0x20] sm:$0xff]  }
 0x1b4   : > { %v1769_v35 = vpop.f32.mrf.mxu3  ;;  %v1671_v41 = vpop.f32.mrf.mxu2 }
 0x1b5   : > { %v1800_v36 = vadd.f32 %v1769_v35, %v1697_v20  ;;  %v5180_v20 = vunpack.c.h.b16 %v5145_v17 }
 0x1b7   : > { %v5136_v39 = vadd.f32 %v1856_v16, %v1800_v36  ;;  %v2217_v35 = vpack.c.b16 %v5180_v20, %v5180_v20 }
 0x1b8   : > { %v1538_v37 = vpop.f32.mrf.mxu1 }
 0x1b9   : > { %v1566_v62 = vadd.f32 %v1538_v37, %v5006_v59  ;;  %v1861_v18 = vpop.f32.mrf.mxu0  ;;  %v5154_v59 = vunpack.c.l.b16 %v5145_v17  ;;  %v2229_v37 = vrot.slane %v2217_v35, 2 }
 0x1bb   : > { %3949 = vmatmul.msk.bf16.gmra.mxu1 %vm666_vm2, %v1912_v40  ;;  %v1699_v51 = vadd.f32 %v1671_v41, %v1566_v62  ;;  %v5164_v0 = vpack.c.b16 %v5154_v59, %v4163_v56  ;;  %v1593_v40 = vld [vmem:[%s4925_s28 + $0x48] sm:$0xf]  ;;  %s3851_s28 = sshll.u32 %s570_s12, 2  ;;  %s4531_s12 = smov 96  }
 0x1bc   : > { %v1771_v49 = vpop.f32.mrf.mxu3  ;;  %v1673_v48 = vpop.f32.mrf.mxu2  ;;  %3970 = vmatmul.msk.bf16.gmra.mxu0 %vm666_vm2, %v2226_v44  ;;  %s5240_s25 = scalar_lea.vmem %s5871_s4, %s3851_s28  ;;  %s4437_s28 = smul.u32 96, %s5889_s14 }
 0x1bd   : > { %v1801_v53 = vadd.f32 %v1771_v49, %v1698_v38  ;;  %v2227_v2 = vrot.slane %v5164_v0, 2  ;;  %v2001_v49 = vunpack.c.l.b16 %v1593_v40 }
 0x1bf   : > { %v5156_v57 = vadd.f32 %v1858_v31, %v1801_v53  ;;  %v2228_v33 = vsel %vm652_vm1, %v2225_v14, %v2227_v2  ;;  %v1915_v14 = vrot.slane %v1903_v32, 2 }
 0x1c0   : > { %v1540_v58 = vpop.f32.mrf.mxu1 }
 0x1c1   : > { %3963 = vmatmul.msk.bf16.gmra.mxu3 %vm666_vm2, %v5150_v55  ;;  %3957 = vmatmul.msk.bf16.gmra.mxu2 %vm666_vm2, %v5021_v9  ;;  %v1567_v28 = vadd.f32 %v1540_v58, %v5013_v7  ;;  %v1863_v63 = vpop.f32.mrf.mxu0  ;;  %v1916_v44 = vsel %vm652_vm1, %v1913_v43, %v1915_v14  ;;  %v2708_v43 = vld [vmem:[%s5872_s5 + $0x54] sm:$0xf] }
 0x1c3   : > { %v1700_v25 = vadd.f32 %v1673_v48, %v1567_v28 }
 0x1c4   : > { %v1774_v29 = vpop.f32.mrf.mxu3  ;;  %v1676_v1 = vpop.f32.mrf.mxu2 }
 0x1c5   : > { %v1802_v6 = vadd.f32 %v1774_v29, %v1699_v51  ;;  %v2230_v51 = vsel %vm652_vm1, %v2227_v2, %v2229_v37  ;;  %v2811_v29 = vld [vmem:[%s5872_s5 + $0x58] sm:$0xf] }
 0x1c7   : > { %v5168_v5 = vadd.f32 %v1861_v18, %v1802_v6  ;;  %v2898_v6 = vld [vmem:[%s5872_s5 + $0x5c] sm:$0xf] }
 0x1c8   : > { %v1543_v22 = vpop.f32.mrf.mxu1 }
 0x1c9   : > { %v1568_v7 = vadd.f32 %v1543_v22, %v5024_v61  ;;  %v1866_v26 = vpop.f32.mrf.mxu0 }
 0x1cb   : > { %3950 = vmatmul.msk.bf16.gmra.mxu1 %vm666_vm2, %v1914_v23  ;;  %v1701_v13 = vadd.f32 %v1676_v1, %v1568_v7  ;;  %v2840_v1 = vsel %vm688_vm0, %v2811_v29, 0  ;;  %v2939_v23 = vsel %vm688_vm0, %v2898_v6, 0  ;;  %v2753_v7 = vsel %vm688_vm0, %v2708_v43, 0 }
 0x1cc   : > { %v1776_v12 = vpop.f32.mrf.mxu3  ;;  %v1678_v16 = vpop.f32.mrf.mxu2  ;;  %3971 = vmatmul.msk.bf16.gmra.mxu0 %vm666_vm2, %v2228_v33  ;;  %2849 = vmatpush.bf16.msra.mxu2 %v2840_v1 }
 0x1cd   : > { %v1803_v9 = vadd.f32 %v1776_v12, %v1700_v25  ;;  %2948 = vmatpush.bf16.msra.mxu3 %v2939_v23  ;;  %2762 = vmatpush.bf16.msra.mxu1 %v2753_v7 }
 0x1cf   : > { %v5182_v61 = vadd.f32 %v1863_v63, %v1803_v9  ;;  %v2003_v63 = vpack.c.b16 %v2001_v49, %v2001_v49 }
 0x1d0   : > { %v1545_v21 = vpop.f32.mrf.mxu1 }
 0x1d1   : > { %3964 = vmatmul.msk.bf16.gmra.mxu3 %vm666_vm2, %v5177_v19  ;;  %3958 = vmatmul.msk.bf16.gmra.mxu2 %vm666_vm2, %v4260_v11  ;;  %v1569_v24 = vadd.f32 %v1545_v21, %v5036_v50  ;;  %v1868_v31 = vpop.f32.mrf.mxu0  ;;  %v2405_v21 = vrot.slane %v5150_v55, 2 }
 0x1d3   : > { %v1702_v36 = vadd.f32 %v1678_v16, %v1569_v24  ;;  %v2997_v16 = vld [vmem:[%s5872_s5 + $0x60] sm:$0xf]  ;;  %v2406_v47 = vsel %vm652_vm1, %v2404_v34, %v2405_v21 }
 0x1d4   : > { %v1779_v41 = vpop.f32.mrf.mxu3  ;;  %v1681_v38 = vpop.f32.mrf.mxu2 }
 0x1d5   : > { %v1804_v60 = vadd.f32 %v1779_v41, %v1701_v13  ;;  %v3017_v13 = vsel %vm688_vm0, %v2997_v16, 0 }
 0x1d6   : > { %3026 = vmatpush.bf16.msra.mxu0 %v3017_v13 }
 0x1d7   : > { %v5191_v62 = vadd.f32 %v1866_v26, %v1804_v60 }
 0x1d8   : > { %v1548_v18 = vpop.f32.mrf.mxu1 }
 0x1d9   : > { %v1570_v48 = vadd.f32 %v1548_v18, %v5055_v4  ;;  %v1871_v50 = vpop.f32.mrf.mxu0 }
 0x1db   : > { %3951 = vmatmul.msk.bf16.gmra.mxu1 %vm666_vm2, %v1916_v44  ;;  %v1703_v58 = vadd.f32 %v1681_v38, %v1570_v48 }
 0x1dc   : > { %v1781_v53 = vpop.f32.mrf.mxu3  ;;  %v1683_v56 = vpop.f32.mrf.mxu2  ;;  %3972 = vmatmul.msk.bf16.gmra.mxu0 %vm666_vm2, %v2230_v51 }
 0x1dd   : > { %v1805_v28 = vadd.f32 %v1781_v53, %v1702_v36  ;;  %v2127_v36 = vpack.c.b16 %v5154_v59, %v5154_v59  ;;  %v4177_v53 = vld [vmem:[%s5240_s25] sm:$0xff]  }
 0x1df   : > { %v5202_v4 = vadd.f32 %v1868_v31, %v1805_v28 }
 0x1e0   : > { %v1550_v25 = vpop.f32.mrf.mxu1 }
 0x1e1   : > { %3965 = vmatmul.msk.bf16.gmra.mxu3 %vm666_vm2, %v5142_v27  ;;  %3959 = vmatmul.msk.bf16.gmra.mxu2 %vm666_vm2, %v2003_v63  ;;  %v1571_v2 = vadd.f32 %v1550_v25, %v5066_v8  ;;  %v1873_v22 = vpop.f32.mrf.mxu0 }
 0x1e3   : > { %v1704_v11 = vadd.f32 %v1683_v56, %v1571_v2 }
 0x1e4   : > { %v1784_v26 = vpop.f32.mrf.mxu3  ;;  %v1686_v33 = vpop.f32.mrf.mxu2 }
 0x1e5   : > { %v1806_v12 = vadd.f32 %v1784_v26, %v1703_v58  ;;  %v4319_v26 = vld [vmem:[%s5240_s25 + $0x8] sm:$0xff]  }
 0x1e7   : > { %v5221_v8 = vadd.f32 %v1871_v50, %v1806_v12  ;;  %v2407_v50 = vrot.slane %v5177_v19, 2 }
 0x1e8   : > { %v1553_v9 = vpop.f32.mrf.mxu1 }
 0x1e9   : > { %v1572_v32 = vadd.f32 %v1553_v9, %v5079_v30  ;;  %v1876_v24 = vpop.f32.mrf.mxu0  ;;  %v2408_v29 = vsel %vm652_vm1, %v2405_v21, %v2407_v50 }
 0x1eb   : > { %3952 = vmatmul.msk.bf16.gmra.mxu1 %vm666_vm2, %v1915_v14  ;;  %v1705_v41 = vadd.f32 %v1686_v33, %v1572_v32  ;;  %v2409_v33 = vrot.slane %v5142_v27, 2 }
 0x1ec   : > { %v1786_v31 = vpop.f32.mrf.mxu3  ;;  %v1688_v35 = vpop.f32.mrf.mxu2  ;;  %3973 = vmatmul.msk.bf16.gmra.mxu0 %vm666_vm2, %v2229_v37 }
 0x1ed   : > { %v1807_v38 = vadd.f32 %v1786_v31, %v1704_v11  ;;  %v2410_v16 = vsel %vm652_vm1, %v2407_v50, %v2409_v33  ;;  %v5288_v50 = vld [vmem:[%s5064_s20 + $0x38] sm:$0xff]  }
 0x1ef   : > { %v5231_v60 = vadd.f32 %v1873_v22, %v1807_v38  ;;  %v5273_v38 = vld [vmem:[%s5240_s25 + $0x10] sm:$0xff]  }
 0x1f0   : > { %v1555_v30 = vpop.f32.mrf.mxu1 }
 0x1f1   : > { %3966 = vmatmul.msk.bf16.gmra.mxu3 %vm666_vm2, %v2127_v36  ;;  %3981 = vmatmul.msk.bf16.vlgmr.msrb.gmra.mxu2 %vm666_vm2, %v2406_v47  ;;  %v1573_v14 = vadd.f32 %v1555_v30, %v5087_v3  ;;  %v1878_v40 = vpop.f32.mrf.mxu0 }
 0x1f3   : > { %v1706_v49 = vadd.f32 %v1688_v35, %v1573_v14 }
 0x1f4   : > { %v1789_v18 = vpop.f32.mrf.mxu3  ;;  %v1691_v44 = vpop.f32.mrf.mxu2 }
 0x1f5   : > { %v1808_v59 = vadd.f32 %v1789_v18, %v1705_v41 }
 0x1f7   : > { %v5242_v37 = vadd.f32 %v1876_v24, %v1808_v59 }
 0x1f8   : > { %v1558_v48 = vpop.f32.mrf.mxu1 }
 0x1f9   : > { %v1574_v51 = vadd.f32 %v1558_v48, %v5097_v52  ;;  %v1881_v3 = vpop.f32.mrf.mxu0 }
 0x1fb   : > { %3974 = vmatmul.msk.bf16.vlgmr.msrb.gmra.mxu1 %vm666_vm2, %v5074_v15  ;;  %v1707_v28 = vadd.f32 %v1691_v44, %v1574_v51 }
 0x1fc   : > { %v1791_v56 = vpop.f32.mrf.mxu3  ;;  %v1693_v58 = vpop.f32.mrf.mxu2  ;;  %3995 = vmatmul.msk.bf16.vlgmr.msrb.gmra.mxu0 %vm666_vm2, %v4177_v53 }
 0x1fd   : > { %v1809_v63 = vadd.f32 %v1791_v56, %v1706_v49  ;;  %v2413_v58 = vrot.slane %v5288_v50, 2 }
 0x1ff   : > { %v5251_v1 = vadd.f32 %v1878_v40, %v1809_v63 }
 0x200   : > { %v1560_v52 = vpop.f32.mrf.mxu1 }
 0x201   : > { %3988 = vmatmul.msk.bf16.vlgmr.msrb.gmra.mxu3 %vm666_vm2, %v5150_v55  ;;  %3982 = vmatmul.msk.bf16.gmra.mxu2 %vm666_vm2, %v2408_v29  ;;  %v1883_v25 = vpop.f32.mrf.mxu0 }
 0x202   : > { %v4293_v25 = vld [vmem:[%s5064_s20 + $0x40] sm:$0xff]  }
 0x204   : > { %v1794_v6 = vpop.f32.mrf.mxu3  ;;  %v2028_v43 = vpop.f32.mrf.mxu2 }
 0x205   : > { %v1810_v15 = vadd.f32 %v1794_v6, %v1707_v28 }
 0x207   : > { %v5256_v2 = vadd.f32 %v1881_v3, %v1810_v15  ;;  %v4174_v15 = vunpack.c.l.b16 %v4293_v25 }
 0x208   : > { %v1950_v22 = vpop.f32.mrf.mxu1 }
 0x209   : > { %v1984_v23 = vadd.f32 %v1950_v22, %v5114_v54  ;;  %v2264_v7 = vpop.f32.mrf.mxu0 }
 0x20b   : > { %3975 = vmatmul.msk.bf16.gmra.mxu1 %vm666_vm2, %v5093_v42  ;;  %v2062_v12 = vadd.f32 %v2028_v43, %v1984_v23 }
 0x20c   : > { %v1796_v11 = vpop.f32.mrf.mxu3  ;;  %v2030_v55 = vpop.f32.mrf.mxu2  ;;  %3996 = vmatmul.msk.bf16.gmra.mxu0 %vm666_vm2, %v4319_v26 }
 0x210   : > { %v1952_v13 = vpop.f32.mrf.mxu1 }
 0x211   : > { %3989 = vmatmul.msk.bf16.gmra.mxu3 %vm666_vm2, %v5177_v19  ;;  %3983 = vmatmul.msk.bf16.gmra.mxu2 %vm666_vm2, %v2410_v16  ;;  %v1985_v54 = vadd.f32 %v1952_v13, %v5124_v46  ;;  %v2266_v9 = vpop.f32.mrf.mxu0  ;;  %v2411_v19 = vrot.slane %v5145_v17, 2  ;;  %v5313_v13 = vld [vmem:[%s5240_s25 + $0x20] sm:$0xff]  }
 0x213   : > { %v2063_v32 = vadd.f32 %v2030_v55, %v1985_v54  ;;  %v2412_v14 = vsel %vm652_vm1, %v2409_v33, %v2411_v19  ;;  %v2414_v52 = vsel %vm652_vm1, %v2411_v19, %v2413_v58  ;;  %v2403_v33 = vpack.c.b16 %v4174_v15, %v4174_v15 }
 0x214   : > { %v2161_v34 = vpop.f32.mrf.mxu3  ;;  %v2033_v21 = vpop.f32.mrf.mxu2  ;;  %v4170_v19 = vunpack.c.l.b16 %v5288_v50 }
 0x215   : > { %v2195_v42 = vadd.f32 %v2161_v34, %v2062_v12 }
 0x217   : > { %v5269_v24 = vadd.f32 %v2264_v7, %v2195_v42 }
 0x218   : > { %v1955_v31 = vpop.f32.mrf.mxu1 }
 0x219   : > { %v1986_v35 = vadd.f32 %v1955_v31, %v5136_v39  ;;  %v2269_v41 = vpop.f32.mrf.mxu0 }
 0x21b   : > { %3976 = vmatmul.msk.bf16.gmra.mxu1 %vm666_vm2, %v5110_v10  ;;  %v2064_v47 = vadd.f32 %v2033_v21, %v1986_v35 }
 0x21c   : > { %v2163_v36 = vpop.f32.mrf.mxu3  ;;  %v2035_v46 = vpop.f32.mrf.mxu2  ;;  %3997 = vmatmul.msk.bf16.gmra.mxu0 %vm666_vm2, %v5273_v38 }
 0x21d   : > { %v2196_v30 = vadd.f32 %v2163_v36, %v2063_v32 }
 0x21f   : > { %v5281_v39 = vadd.f32 %v2266_v9, %v2196_v30 }
 0x220   : > { %v1957_v40 = vpop.f32.mrf.mxu1 }
 0x221   : > { %3990 = vmatmul.msk.bf16.gmra.mxu3 %vm666_vm2, %v5142_v27  ;;  %3984 = vmatmul.msk.bf16.gmra.mxu2 %vm666_vm2, %v2412_v14  ;;  %v1987_v10 = vadd.f32 %v1957_v40, %v5156_v57  ;;  %v2271_v18 = vpop.f32.mrf.mxu0  ;;  %v5294_v27 = vld [vmem:[%s5240_s25 + $0x18] sm:$0xff]  }
 0x223   : > { %v2065_v59 = vadd.f32 %v2035_v46, %v1987_v10  ;;  %v5332_v10 = vld [vmem:[%s5240_s25 + $0x28] sm:$0xff]  }
 0x224   : > { %v2166_v44 = vpop.f32.mrf.mxu3  ;;  %v2038_v49 = vpop.f32.mrf.mxu2 }
 0x225   : > { %v2197_v48 = vadd.f32 %v2166_v44, %v2064_v47  ;;  %v2316_v47 = vpack.c.b16 %v4170_v19, %v5180_v20 }
 0x227   : > { %v5290_v51 = vadd.f32 %v2269_v41, %v2197_v48 }
 0x228   : > { %v1960_v3 = vpop.f32.mrf.mxu1 }
 0x229   : > { %v1988_v53 = vadd.f32 %v1960_v3, %v5168_v5  ;;  %v2274_v56 = vpop.f32.mrf.mxu0  ;;  %v5343_v3 = vld [vmem:[%s5240_s25 + $0x30] sm:$0xff]  }
 0x22b   : > { %3977 = vmatmul.msk.bf16.gmra.mxu1 %vm666_vm2, %v5132_v45  ;;  %v2066_v63 = vadd.f32 %v2038_v49, %v1988_v53 }
 0x22c   : > { %v2168_v28 = vpop.f32.mrf.mxu3  ;;  %v2040_v57 = vpop.f32.mrf.mxu2  ;;  %3998 = vmatmul.msk.bf16.gmra.mxu0 %vm666_vm2, %v5294_v27 }
 0x22d   : > { %v2198_v29 = vadd.f32 %v2168_v28, %v2065_v59  ;;  %v4171_v28 = vunpack.c.h.b16 %v5288_v50 }
 0x22f   : > { %v5303_v6 = vadd.f32 %v2271_v18, %v2198_v29  ;;  %v2093_v29 = vld [vmem:[%s5064_s20 + $0x48] sm:$0xf]  ;;  %s4436_s20 = smul.u32 12, %s5899_s13 }
 0x230   : > { %v1962_v5 = vpop.f32.mrf.mxu1 }
 0x231   : > { %3991 = vmatmul.msk.bf16.gmra.mxu3 %vm666_vm2, %v5145_v17  ;;  %3985 = vmatmul.msk.bf16.gmra.mxu2 %vm666_vm2, %v2414_v52  ;;  %v1989_v45 = vadd.f32 %v1962_v5, %v5182_v61  ;;  %v2276_v43 = vpop.f32.mrf.mxu0  ;;  %v2415_v17 = vrot.slane %v2403_v33, 2  ;;  %v4411_v33 = vld [vmem:[%s5240_s25 + $0xc] sm:$0xff]   ;;  %s580_s26 = sadd.s32 %s4437_s28, %s4436_s20  ;;  %s3853_s28 = sshll.u32 %s5889_s14, 3 }
 0x233   : > { %v2067_v7 = vadd.f32 %v2040_v57, %v1989_v45  ;;  %v2416_v21 = vsel %vm652_vm1, %v2413_v58, %v2415_v17  ;;  %v2501_v45 = vunpack.c.l.b16 %v2093_v29 }
 0x234   : > { %v2171_v22 = vpop.f32.mrf.mxu3  ;;  %v2043_v23 = vpop.f32.mrf.mxu2 }
 0x235   : > { %v2199_v26 = vadd.f32 %v2171_v22, %v2066_v63  ;;  %v5347_v63 = vunpack.c.l.b16 %v5343_v3 }
 0x237   : > { %v5309_v11 = vadd.f32 %v2274_v56, %v2199_v26  ;;  %v2503_v26 = vpack.c.b16 %v2501_v45, %v2501_v45 }
 0x238   : > { %v1965_v55 = vpop.f32.mrf.mxu1 }
 0x239   : > { %v1990_v12 = vadd.f32 %v1965_v55, %v5191_v62  ;;  %v2279_v16 = vpop.f32.mrf.mxu0 }
 0x23b   : > { %3978 = vmatmul.msk.bf16.gmra.mxu1 %vm666_vm2, %v5164_v0  ;;  %v2068_v9 = vadd.f32 %v2043_v23, %v1990_v12 }
 0x23c   : > { %v2173_v54 = vpop.f32.mrf.mxu3  ;;  %v2045_v61 = vpop.f32.mrf.mxu2  ;;  %3999 = vmatmul.msk.bf16.gmra.mxu0 %vm666_vm2, %v5313_v13 }
 0x23d   : > { %v2200_v34 = vadd.f32 %v2173_v54, %v2067_v7 }
 0x23f   : > { %v5320_v32 = vadd.f32 %v2276_v43, %v2200_v34 }
 0x240   : > { %v1967_v62 = vpop.f32.mrf.mxu1 }
 0x241   : > { %3992 = vmatmul.msk.bf16.gmra.mxu3 %vm666_vm2, %v5288_v50  ;;  %3986 = vmatmul.msk.bf16.gmra.mxu2 %vm666_vm2, %v2416_v21  ;;  %v1991_v42 = vadd.f32 %v1967_v62, %v5202_v4  ;;  %v2281_v0 = vpop.f32.mrf.mxu0  ;;  %v2719_v62 = vrot.slane %v4411_v33, 2 }
 0x243   : > { %v2069_v41 = vadd.f32 %v2045_v61, %v1991_v42 }
 0x244   : > { %v2176_v31 = vpop.f32.mrf.mxu3  ;;  %v2048_v35 = vpop.f32.mrf.mxu2 }
 0x245   : > { %v2201_v36 = vadd.f32 %v2176_v31, %v2068_v9 }
 0x247   : > { %v5327_v46 = vadd.f32 %v2279_v16, %v2201_v36  ;;  %v4409_v16 = vld [vmem:[%s5240_s25 + $0x4] sm:$0xff]  }
 0x248   : > { %v1970_v30 = vpop.f32.mrf.mxu1  ;;  %v2718_v21 = vrot.slane %v4409_v16, 2 }
 0x249   : > { %v1992_v14 = vadd.f32 %v1970_v30, %v5221_v8  ;;  %v2284_v40 = vpop.f32.mrf.mxu0 }
 0x24a   : > { %v2720_v31 = vsel %vm652_vm1, %v2718_v21, %v2719_v62 }
 0x24b   : > { %3979 = vmatmul.msk.bf16.gmra.mxu1 %vm666_vm2, %v2316_v47  ;;  %v2070_v44 = vadd.f32 %v2048_v35, %v1992_v14  ;;  %v2904_v35 = vrot.slane %v5273_v38, 2 }
 0x24c   : > { %v2178_v18 = vpop.f32.mrf.mxu3  ;;  %v2050_v4 = vpop.f32.mrf.mxu2  ;;  %4000 = vmatmul.msk.bf16.gmra.mxu0 %vm666_vm2, %v5332_v10 }
 0x24d   : > { %v2202_v49 = vadd.f32 %v2178_v18, %v2069_v41  ;;  %v2905_v41 = vrot.slane %v5294_v27, 2 }
 0x24f   : > { %v5337_v59 = vadd.f32 %v2281_v0, %v2202_v49  ;;  %v2906_v18 = vsel %vm652_vm1, %v2904_v35, %v2905_v41 }
 0x250   : > { %v1972_v20 = vpop.f32.mrf.mxu1 }
 0x251   : > { %3993 = vmatmul.msk.bf16.gmra.mxu3 %vm666_vm2, %v4293_v25  ;;  %3987 = vmatmul.msk.bf16.gmra.mxu2 %vm666_vm2, %v2415_v17  ;;  %v1993_v8 = vadd.f32 %v1972_v20, %v5231_v60  ;;  %v2286_v48 = vpop.f32.mrf.mxu0  ;;  %v2317_v25 = vpack.c.b16 %v4171_v28, %v4171_v28  ;;  %v2627_v60 = vpack.c.b16 %v5347_v63, %v5347_v63 }
 0x253   : > { %v2071_v58 = vadd.f32 %v2050_v4, %v1993_v8 }
 0x254   : > { %v2181_v53 = vpop.f32.mrf.mxu3  ;;  %v2053_v56 = vpop.f32.mrf.mxu2 }
 0x255   : > { %v2203_v57 = vadd.f32 %v2181_v53, %v2070_v44 }
 0x257   : > { %v5350_v52 = vadd.f32 %v2284_v40, %v2203_v57  ;;  %v4413_v40 = vld [vmem:[%s5240_s25 + $0x14] sm:$0xff]  }
 0x258   : > { %v1975_v5 = vpop.f32.mrf.mxu1  ;;  %v2721_v8 = vrot.slane %v4413_v40, 2 }
 0x259   : > { %v1994_v43 = vadd.f32 %v1975_v5, %v5242_v37  ;;  %v2289_v15 = vpop.f32.mrf.mxu0  ;;  %v4415_v5 = vld [vmem:[%s5240_s25 + $0x1c] sm:$0xff]  }
 0x25b   : > { %3980 = vmatmul.msk.bf16.gmra.mxu1 %vm666_vm2, %v2317_v25  ;;  %v2072_v23 = vadd.f32 %v2053_v56, %v1994_v43  ;;  %v2907_v56 = vrot.slane %v5313_v13, 2 }
 0x25c   : > { %v2183_v22 = vpop.f32.mrf.mxu3  ;;  %v2055_v50 = vpop.f32.mrf.mxu2  ;;  %4001 = vmatmul.msk.bf16.gmra.mxu0 %vm666_vm2, %v2627_v60 }
 0x25d   : > { %v2204_v7 = vadd.f32 %v2183_v22, %v2071_v58  ;;  %v2908_v45 = vsel %vm652_vm1, %v2905_v41, %v2907_v56 }
 0x25f   : > { %v5358_v55 = vadd.f32 %v2286_v48, %v2204_v7  ;;  %v2723_v7 = vrot.slane %v4415_v5, 2 }
 0x260   : > { %v1977_v12 = vpop.f32.mrf.mxu1 }
 0x261   : > { %3994 = vmatmul.msk.bf16.gmra.mxu3 %vm666_vm2, %v2503_v26  ;;  %4009 = vmatmul.msk.bf16.vlgmr.msra.gmra.mxu2 %vm666_vm2, %v4411_v33  ;;  %v1995_v37 = vadd.f32 %v1977_v12, %v5251_v1  ;;  %v2291_v17 = vpop.f32.mrf.mxu0  ;;  %v2724_v33 = vsel %vm652_vm1, %v2721_v8, %v2723_v7  ;;  %v2909_v12 = vrot.slane %v5332_v10, 2 }
 0x263   : > { %v2073_v9 = vadd.f32 %v2055_v50, %v1995_v37 }
 0x264   : > { %v2186_v54 = vpop.f32.mrf.mxu3  ;;  %v2058_v61 = vpop.f32.mrf.mxu2 }
 0x265   : > { %v2205_v34 = vadd.f32 %v2186_v54, %v2072_v23 }
 0x267   : > { %v5364_v42 = vadd.f32 %v2289_v15, %v2205_v34  ;;  %v2910_v34 = vsel %vm652_vm1, %v2907_v56, %v2909_v12 }
 0x268   : > { %v1980_v0 = vpop.f32.mrf.mxu1 }
 0x269   : > { %v1996_v19 = vadd.f32 %v1980_v0, %v5256_v2  ;;  %v2294_v1 = vpop.f32.mrf.mxu0 }
 0x26b   : > { %4002 = vmatmul.msk.bf16.vlgmr.msra.gmra.mxu1 %vm666_vm2, %v2720_v31  ;;  %v2074_v30 = vadd.f32 %v2058_v61, %v1996_v19 }
 0x26c   : > { %v2188_v36 = vpop.f32.mrf.mxu3  ;;  %v2060_v47 = vpop.f32.mrf.mxu2  ;;  %4023 = vmatmul.msk.bf16.vlgmr.msra.gmra.mxu0 %vm666_vm2, %v5294_v27  ;;  %v2722_v27 = vsel %vm652_vm1, %v2719_v62, %v2721_v8 }
 0x26d   : > { %v2206_v14 = vadd.f32 %v2188_v36, %v2073_v9  ;;  %v4416_v9 = vld [vmem:[%s5240_s25 + $0x24] sm:$0xff]   ;;  %v4199_v47 = vunpack.c.h.b16 %v5332_v10 }
 0x26f   : > { %v5375_v4 = vadd.f32 %v2291_v17, %v2206_v14 }
 0x270   : > { %v1982_v38 = vpop.f32.mrf.mxu1 }
 0x271   : > { %4016 = vmatmul.msk.bf16.vlgmr.msra.gmra.mxu3 %vm666_vm2, %v2906_v18  ;;  %4010 = vmatmul.msk.bf16.gmra.mxu2 %vm666_vm2, %v4413_v40  ;;  %v2296_v2 = vpop.f32.mrf.mxu0  ;;  %v2911_v38 = vrot.slane %v5343_v3, 2 }
 0x274   : > { %v2191_v44 = vpop.f32.mrf.mxu3  ;;  %v2450_v49 = vpop.f32.mrf.mxu2 }
 0x275   : > { %v2207_v20 = vadd.f32 %v2191_v44, %v2074_v30 }
 0x277   : > { %v5379_v48 = vadd.f32 %v2294_v1, %v2207_v20  ;;  %v2725_v1 = vrot.slane %v4416_v9, 2  ;;  %v2912_v20 = vsel %vm652_vm1, %v2909_v12, %v2911_v38  ;;  %v4326_v12 = vld [vmem:[%s5240_s25 + $0x40] sm:$0xff]  }
 0x278   : > { %v2351_v53 = vpop.f32.mrf.mxu1 }
 0x279   : > { %v2385_v58 = vadd.f32 %v2351_v53, %v5269_v24  ;;  %v2661_v28 = vpop.f32.mrf.mxu0  ;;  %v2726_v14 = vsel %vm652_vm1, %v2723_v7, %v2725_v1 }
 0x27b   : > { %4003 = vmatmul.msk.bf16.gmra.mxu1 %vm666_vm2, %v2722_v27  ;;  %v2484_v25 = vadd.f32 %v2450_v49, %v2385_v58 }
 0x27c   : > { %v2193_v57 = vpop.f32.mrf.mxu3  ;;  %v2452_v29 = vpop.f32.mrf.mxu2  ;;  %4024 = vmatmul.msk.bf16.gmra.mxu0 %vm666_vm2, %v5313_v13 }
 0x280   : > { %v2353_v60 = vpop.f32.mrf.mxu1 }
 0x281   : > { %4017 = vmatmul.msk.bf16.gmra.mxu3 %vm666_vm2, %v2908_v45  ;;  %4011 = vmatmul.msk.bf16.gmra.mxu2 %vm666_vm2, %v4415_v5  ;;  %v2386_v43 = vadd.f32 %v2353_v60, %v5281_v39  ;;  %v2663_v24 = vpop.f32.mrf.mxu0  ;;  %v4203_v60 = vunpack.c.h.b16 %v5343_v3 }
 0x283   : > { %v2485_v50 = vadd.f32 %v2452_v29, %v2386_v43 }
 0x284   : > { %v2528_v15 = vpop.f32.mrf.mxu3  ;;  %v2455_v22 = vpop.f32.mrf.mxu2 }
 0x285   : > { %v2562_v23 = vadd.f32 %v2528_v15, %v2484_v25  ;;  %v4325_v25 = vld [vmem:[%s5240_s25 + $0x38] sm:$0xff]  }
 0x286   : > { %v4206_v43 = vunpack.c.l.b16 %v4325_v25 }
 0x287   : > { %v5392_v26 = vadd.f32 %v2661_v28, %v2562_v23 }
 0x288   : > { %v2356_v13 = vpop.f32.mrf.mxu1 }
 0x289   : > { %v2387_v16 = vadd.f32 %v2356_v13, %v5290_v51  ;;  %v2666_v37 = vpop.f32.mrf.mxu0  ;;  %v2816_v13 = vpack.c.b16 %v4206_v43, %v4203_v60 }
 0x28b   : > { %4004 = vmatmul.msk.bf16.gmra.mxu1 %vm666_vm2, %v2724_v33  ;;  %v2486_v54 = vadd.f32 %v2455_v22, %v2387_v16 }
 0x28c   : > { %v2530_v17 = vpop.f32.mrf.mxu3  ;;  %v2457_v39 = vpop.f32.mrf.mxu2  ;;  %4025 = vmatmul.msk.bf16.gmra.mxu0 %vm666_vm2, %v5332_v10  ;;  %v2716_v10 = vpack.c.b16 %v5347_v63, %v4199_v47 }
 0x28d   : > { %v2563_v61 = vadd.f32 %v2530_v17, %v2485_v50 }
 0x28e   : > { %v2727_v29 = vrot.slane %v2716_v10, 2 }
 0x28f   : > { %v5402_v21 = vadd.f32 %v2663_v24, %v2563_v61 }
 0x290   : > { %v2358_v62 = vpop.f32.mrf.mxu1  ;;  %v2728_v45 = vsel %vm652_vm1, %v2725_v1, %v2727_v29 }
 0x291   : > { %4018 = vmatmul.msk.bf16.gmra.mxu3 %vm666_vm2, %v2910_v34  ;;  %4012 = vmatmul.msk.bf16.gmra.mxu2 %vm666_vm2, %v4416_v9  ;;  %v2388_v51 = vadd.f32 %v2358_v62, %v5303_v6  ;;  %v2668_v0 = vpop.f32.mrf.mxu0 }
 0x293   : > { %v2487_v41 = vadd.f32 %v2457_v39, %v2388_v51  ;;  %v4210_v39 = vunpack.c.l.b16 %v4326_v12 }
 0x294   : > { %v2533_v31 = vpop.f32.mrf.mxu3  ;;  %v2460_v35 = vpop.f32.mrf.mxu2 }
 0x295   : > { %v2564_v19 = vadd.f32 %v2533_v31, %v2486_v54  ;;  %v2903_v51 = vpack.c.b16 %v4210_v39, %v4210_v39 }
 0x297   : > { %v5407_v36 = vadd.f32 %v2666_v37, %v2564_v19  ;;  %v2915_v47 = vrot.slane %v2903_v51, 2  ;;  %v3430_v51 = vld [vmem:[%s5873_s6 + $0x30] sm:$0xff] }
 0x298   : > { %v2361_v30 = vpop.f32.mrf.mxu1 }
 0x299   : > { %v2389_v40 = vadd.f32 %v2361_v30, %v5309_v11  ;;  %v2671_v18 = vpop.f32.mrf.mxu0 }
 0x29b   : > { %4005 = vmatmul.msk.bf16.gmra.mxu1 %vm666_vm2, %v2726_v14  ;;  %v2488_v44 = vadd.f32 %v2460_v35, %v2389_v40 }
 0x29c   : > { %v2535_v2 = vpop.f32.mrf.mxu3  ;;  %v2462_v6 = vpop.f32.mrf.mxu2  ;;  %4026 = vmatmul.msk.bf16.gmra.mxu0 %vm666_vm2, %v5343_v3 }
 0x29d   : > { %v2565_v49 = vadd.f32 %v2535_v2, %v2487_v41  ;;  %v4207_v41 = vunpack.c.h.b16 %v4325_v25 }
 0x29f   : > { %v5418_v8 = vadd.f32 %v2668_v0, %v2565_v49 }
 0x2a0   : > { %v2363_v11 = vpop.f32.mrf.mxu1 }
 0x2a1   : > { %4019 = vmatmul.msk.bf16.gmra.mxu3 %vm666_vm2, %v2912_v20  ;;  %4013 = vmatmul.msk.bf16.gmra.mxu2 %vm666_vm2, %v2716_v10  ;;  %v2390_v53 = vadd.f32 %v2363_v11, %v5320_v32  ;;  %v2673_v27 = vpop.f32.mrf.mxu0  ;;  %v2913_v32 = vrot.slane %v4325_v25, 2  ;;  %v2593_v20 = vld [vmem:[%s5240_s25 + $0x48] sm:$0xf]  ;;  %s588_s25 = sadd.s32 %s3853_s28, %s5899_s13 }
 0x2a2   : > { %s589_s22 = scalar_lea.vmem %s5876_s9, %s588_s25 }
 0x2a3   : > { %v2489_v28 = vadd.f32 %v2462_v6, %v2390_v53  ;;  %v2914_v33 = vsel %vm652_vm1, %v2911_v38, %v2913_v32  ;;  %v3424_v38 = vld [vmem:[%s5873_s6] sm:$0xff]  ;;  %v2916_v2 = vsel %vm652_vm1, %v2913_v32, %v2915_v47  ;;  %v4527_v6 = vmov 0   ;;  %v3429_v32 = vld [vmem:[%s5873_s6 + $0x28] sm:$0xff] }
 0x2a4   : > { %v2538_v56 = vpop.f32.mrf.mxu3  ;;  %v2465_v58 = vpop.f32.mrf.mxu2  ;;  %4483 = vset.pattern.permute.xlu1 %v4527_v6  ;;  %4485 = vset.pattern.permute.xlu0 %v4527_v6 }
 0x2a5   : > { %v2566_v57 = vadd.f32 %v2538_v56, %v2488_v44  ;;  %3438 = vperm.xlu1 %4483, %v3424_v38   ;;  %4484 = vset.pattern.permute.xlu2 %v4527_v6 }
 0x2a7   : > { %v5424_v5 = vadd.f32 %v2671_v18, %v2566_v57  ;;  %v2817_v18 = vpack.c.b16 %v4207_v41, %v4207_v41 }
 0x2a8   : > { %v2366_v63 = vpop.f32.mrf.mxu1 }
 0x2a9   : > { %v2391_v24 = vadd.f32 %v2366_v63, %v5327_v46  ;;  %v2676_v15 = vpop.f32.mrf.mxu0  ;;  %v2717_v46 = vpack.c.b16 %v4203_v60, %v4203_v60 }
 0x2ab   : > { %4006 = vmatmul.msk.bf16.gmra.mxu1 %vm666_vm2, %v2728_v45  ;;  %v2490_v23 = vadd.f32 %v2465_v58, %v2391_v24  ;;  %v2729_v62 = vrot.slane %v2717_v46, 2  ;;  %v3001_v58 = vunpack.c.l.b16 %v2593_v20  ;;  %v3426_v24 = vld [vmem:[%s5873_s6 + $0x10] sm:$0xff]  ;;  %v3431_v46 = vld [vmem:[%s5873_s6 + $0x38] sm:$0xff] }
 0x2ac   : > { %v2540_v22 = vpop.f32.mrf.mxu3  ;;  %v2467_v50 = vpop.f32.mrf.mxu2  ;;  %4027 = vmatmul.msk.bf16.gmra.mxu0 %vm666_vm2, %v4325_v25  ;;  %3448 = vperm.xlu0 %4485, %v3426_v24  }
 0x2ad   : > { %v2567_v7 = vadd.f32 %v2540_v22, %v2489_v28  ;;  %v2730_v35 = vsel %vm652_vm1, %v2727_v29, %v2729_v62  ;;  %v3427_v28 = vld [vmem:[%s5873_s6 + $0x18] sm:$0xff]  ;;  %v3003_v25 = vpack.c.b16 %v3001_v58, %v3001_v58 }
 0x2ae   : > { %3453 = vperm.xlu1 %4483, %v3427_v28  }
 0x2af   : > { %v5433_v16 = vadd.f32 %v2673_v27, %v2567_v7 }
 0x2b0   : > { %v2368_v3 = vpop.f32.mrf.mxu1 }
 0x2b1   : > { %4020 = vmatmul.msk.bf16.gmra.mxu3 %vm666_vm2, %v2914_v33  ;;  %4014 = vmatmul.msk.bf16.gmra.mxu2 %vm666_vm2, %v2816_v13  ;;  %v2392_v37 = vadd.f32 %v2368_v3, %v5337_v59  ;;  %v2678_v17 = vpop.f32.mrf.mxu0 }
 0x2b3   : > { %v2491_v9 = vadd.f32 %v2467_v50, %v2392_v37  ;;  %v3428_v37 = vld [vmem:[%s5873_s6 + $0x20] sm:$0xff] }
 0x2b4   : > { %v2543_v54 = vpop.f32.mrf.mxu3  ;;  %v2470_v61 = vpop.f32.mrf.mxu2  ;;  %3473 = vperm.xlu0 %4485, %v3431_v46  }
 0x2b5   : > { %v2568_v34 = vadd.f32 %v2543_v54, %v2490_v23 }
 0x2b6   : > { %3463 = vperm.xlu1 %4483, %v3429_v32  }
 0x2b7   : > { %v5438_v0 = vadd.f32 %v2676_v15, %v2568_v34  ;;  %v3425_v15 = vld [vmem:[%s5873_s6 + $0x8] sm:$0xff] }
 0x2b8   : > { %v2371_v31 = vpop.f32.mrf.mxu1  ;;  %3443 = vperm.xlu2 %4484, %v3425_v15  }
 0x2b9   : > { %v2393_v19 = vadd.f32 %v2371_v31, %v5350_v52  ;;  %v2681_v1 = vpop.f32.mrf.mxu0 }
 0x2bb   : > { %4007 = vmatmul.msk.bf16.gmra.mxu1 %vm666_vm2, %v2730_v35  ;;  %v2492_v14 = vadd.f32 %v2470_v61, %v2393_v19 }
 0x2bc   : > { %v2545_v30 = vpop.f32.mrf.mxu3  ;;  %v2472_v59 = vpop.f32.mrf.mxu2  ;;  %4028 = vmatmul.msk.bf16.gmra.mxu0 %vm666_vm2, %v4326_v12 }
 0x2bd   : > { %v2569_v40 = vadd.f32 %v2545_v30, %v2491_v9 }
 0x2bf   : > { %v5448_v52 = vadd.f32 %v2678_v17, %v2569_v40 }
 0x2c0   : > { %v2373_v44 = vpop.f32.mrf.mxu1  ;;  %3458 = vperm.xlu2 %4484, %v3428_v37  }
 0x2c1   : > { %4021 = vmatmul.msk.bf16.gmra.mxu3 %vm666_vm2, %v2916_v2  ;;  %4015 = vmatmul.msk.bf16.gmra.mxu2 %vm666_vm2, %v2817_v18  ;;  %v2394_v49 = vadd.f32 %v2373_v44, %v5358_v55  ;;  %v2683_v10 = vpop.f32.mrf.mxu0 }
 0x2c3   : > { %v2493_v27 = vadd.f32 %v2472_v59, %v2394_v49 }
 0x2c4   : > { %v2548_v11 = vpop.f32.mrf.mxu3  ;;  %v2475_v53 = vpop.f32.mrf.mxu2 }
 0x2c5   : > { %v2570_v56 = vadd.f32 %v2548_v11, %v2492_v14 }
 0x2c7   : > { %v5457_v57 = vadd.f32 %v2681_v1, %v2570_v56 }
 0x2c8   : > { %v2376_v29 = vpop.f32.mrf.mxu1  ;;  %3468 = vperm.xlu2 %4484, %v3430_v51  }
 0x2c9   : > { %v2395_v63 = vadd.f32 %v2376_v29, %v5364_v42  ;;  %v2686_v45 = vpop.f32.mrf.mxu0 }
 0x2cb   : > { %4008 = vmatmul.msk.bf16.gmra.mxu1 %vm666_vm2, %v2729_v62  ;;  %v2494_v43 = vadd.f32 %v2475_v53, %v2395_v63 }
 0x2cc   : > { %v2550_v55 = vpop.f32.mrf.mxu3  ;;  %v2477_v60 = vpop.f32.mrf.mxu2  ;;  %4029 = vmatmul.msk.bf16.gmra.mxu0 %vm666_vm2, %v3003_v25 }
 0x2cd   : > { %v2571_v22 = vadd.f32 %v2550_v55, %v2493_v27 }
 0x2cf   : > { %v5471_v42 = vadd.f32 %v2683_v10, %v2571_v22 }
 0x2d0   : > { %v2378_v50 = vpop.f32.mrf.mxu1 }
 0x2d1   : > { %4022 = vmatmul.msk.bf16.gmra.mxu3 %vm666_vm2, %v2915_v47  ;;  %v2396_v23 = vadd.f32 %v2378_v50, %v5375_v4  ;;  %v2688_v7 = vpop.f32.mrf.mxu0 }
 0x2d3   : > { %v2495_v12 = vadd.f32 %v2477_v60, %v2396_v23 }
 0x2d4   : > { %v2553_v13 = vpop.f32.mrf.mxu3  ;;  %v2480_v33 = vpop.f32.mrf.mxu2 }
 0x2d5   : > { %v2572_v3 = vadd.f32 %v2553_v13, %v2494_v43 }
 0x2d7   : > { %v5481_v17 = vadd.f32 %v2686_v45, %v2572_v3 }
 0x2d8   : > { %v2381_v39 = vpop.f32.mrf.mxu1 }
 0x2d9   : > { %v2397_v4 = vadd.f32 %v2381_v39, %v5379_v48  ;;  %v2691_v54 = vpop.f32.mrf.mxu0  ;;  %v3432_v48 = vld [vmem:[%s5873_s6 + $0x40] sm:$0xff] }
 0x2da   : > { %3478 = vperm.xlu2 %4484, %v3432_v48  }
 0x2db   : > { %v2496_v34 = vadd.f32 %v2480_v33, %v2397_v4 }
 0x2dc   : > { %v2555_v61 = vpop.f32.mrf.mxu3  ;;  %v2482_v9 = vpop.f32.mrf.mxu2 }
 0x2dd   : > { %v2573_v62 = vadd.f32 %v2555_v61, %v2495_v12 }
 0x2df   : > { %v5487_v31 = vadd.f32 %v2688_v7, %v2573_v62 }
 0x2e0   : > { %v2383_v35 = vpop.f32.mrf.mxu1 }
 0x2e1   : > { %v2693_v41 = vpop.f32.mrf.mxu0 }
 0x2e4   : > { %v2558_v19 = vpop.f32.mrf.mxu3  ;;  %v2851_v1 = vpop.f32.mrf.mxu2 }
 0x2e5   : > { %v2574_v47 = vadd.f32 %v2558_v19, %v2496_v34 }
 0x2e7   : > { %v5492_v30 = vadd.f32 %v2691_v54, %v2574_v47 }
 0x2e8   : > { %v2764_v59 = vpop.f32.mrf.mxu1 }
 0x2e9   : > { %v3028_v14 = vpop.f32.mrf.mxu0  ;;  %v2798_v6 = vadd.f32 %v2764_v59, %v5392_v26 }
 0x2eb   : > { %v2885_v20 = vadd.f32 %v2851_v1, %v2798_v6 }
 0x2ec   : > { %v2560_v40 = vpop.f32.mrf.mxu3  ;;  %v2853_v18 = vpop.f32.mrf.mxu2 }
 0x2f0   : > { %v2766_v38 = vpop.f32.mrf.mxu1 }
 0x2f1   : > { %v3030_v2 = vpop.f32.mrf.mxu0  ;;  %v2799_v10 = vadd.f32 %v2766_v38, %v5402_v21 }
 0x2f3   : > { %v2886_v56 = vadd.f32 %v2853_v18, %v2799_v10 }
 0x2f4   : > { %v2950_v44 = vpop.f32.mrf.mxu3  ;;  %v2856_v49 = vpop.f32.mrf.mxu2 }
 0x2f5   : > { %v2984_v11 = vadd.f32 %v2950_v44, %v2885_v20 }
 0x2f7   : > { %v5496_v29 = vadd.f32 %v3028_v14, %v2984_v11 }
 0x2f8   : > { %v2769_v53 = vpop.f32.mrf.mxu1 }
 0x2f9   : > { %v3033_v27 = vpop.f32.mrf.mxu0  ;;  %v2800_v63 = vadd.f32 %v2769_v53, %v5407_v36  ;;  %v3089_v55 = vrot.slane %v5496_v29, 1  ;;  %v3163_v33 = vrot.slane %v5496_v29, 2  ;;  %v3237_v51 = vrot.slane %v5496_v29, 3 }
 0x2fa   : > { %v3310_v6 = vrot.slane %v5496_v29, 4 }
 0x2fb   : > { %v2887_v43 = vadd.f32 %v2856_v49, %v2800_v63 }
 0x2fc   : > { %v2952_v58 = vpop.f32.mrf.mxu3  ;;  %v2858_v28 = vpop.f32.mrf.mxu2 }
 0x2fd   : > { %v2985_v25 = vadd.f32 %v2952_v58, %v2886_v56 }
 0x2ff   : > { %v5499_v45 = vadd.f32 %v3030_v2, %v2985_v25 }
 0x300   : > { %v2771_v26 = vpop.f32.mrf.mxu1 }
 0x301   : > { %v3090_v21 = vrot.slane %v5499_v45, 1  ;;  %v3035_v60 = vpop.f32.mrf.mxu0  ;;  %v2801_v22 = vadd.f32 %v2771_v26, %v5418_v8  ;;  %v3164_v23 = vrot.slane %v5499_v45, 2  ;;  %v3238_v9 = vrot.slane %v5499_v45, 3 }
 0x302   : > { %v3311_v40 = vrot.slane %v5499_v45, 4 }
 0x303   : > { %v3091_v24 = vsel %vm3088_vm3, %v3089_v55, %v3090_v21  ;;  %v2888_v3 = vadd.f32 %v2858_v28, %v2801_v22  ;;  %v3165_v37 = vsel %vm652_vm1, %v3163_v33, %v3164_v23  ;;  %v3239_v47 = vsel %vm3236_vm4, %v3237_v51, %v3238_v9 }
 0x304   : > { %v2955_v15 = vpop.f32.mrf.mxu3  ;;  %3114 = vrot.lane.b32.xlu0 %v3091_v24, %s4528_s27  ;;  %v2861_v32 = vpop.f32.mrf.mxu2 }
 0x305   : > { %v2986_v36 = vadd.f32 %v2955_v15, %v2887_v43 }
 0x307   : > { %v5508_v50 = vadd.f32 %v3033_v27, %v2986_v36 }
 0x308   : > { %v2774_v7 = vpop.f32.mrf.mxu1 }
 0x309   : > { %v3166_v13 = vrot.slane %v5508_v50, 2  ;;  %v3038_v12 = vpop.f32.mrf.mxu0  ;;  %v3240_v61 = vrot.slane %v5508_v50, 3  ;;  %v3313_v14 = vrot.slane %v5508_v50, 4  ;;  %v2802_v18 = vadd.f32 %v2774_v7, %v5424_v5 }
 0x30a   : > { %v3312_v5 = vsel %vm688_vm0, %v3310_v6, %v3311_v40  ;;  %v3092_v25 = vrot.slane %v5508_v50, 1 }
 0x30b   : > { %v3167_v46 = vsel %vm652_vm1, %v3164_v23, %v3166_v13  ;;  %v3241_v19 = vsel %vm3236_vm4, %v3238_v9, %v3240_v61  ;;  %v3314_v10 = vsel %vm688_vm0, %v3311_v40, %v3313_v14 }
 0x30c   : > { %v2957_v39 = vpop.f32.mrf.mxu3  ;;  %3190 = vrot.lane.b32.xlu1 %v3167_v46, %s4529_s29  ;;  %3188 = vrot.lane.b32.xlu0 %v3165_v37, %s4529_s29  ;;  %v2863_v8 = vpop.f32.mrf.mxu2  ;;  %v3093_v36 = vsel %vm3088_vm3, %v3090_v21, %v3092_v25 }
 0x30d   : > { %v2987_v4 = vadd.f32 %v2957_v39, %v2888_v3 }
 0x30f   : > { %v5517_v54 = vadd.f32 %v3035_v60, %v2987_v4 }
 0x310   : > { %v2776_v34 = vpop.f32.mrf.mxu1 }
 0x311   : > { %v3168_v62 = vrot.slane %v5517_v54, 2  ;;  %v3040_v35 = vpop.f32.mrf.mxu0  ;;  %v3242_v59 = vrot.slane %v5517_v54, 3  ;;  %v2803_v38 = vadd.f32 %v2776_v34, %v5433_v16  ;;  %v2889_v16 = vadd.f32 %v2861_v32, %v2802_v18 }
 0x312   : > { %v3315_v58 = vrot.slane %v5517_v54, 4  ;;  %v3094_v28 = vrot.slane %v5517_v54, 1 }
 0x313   : > { %v3169_v41 = vsel %vm652_vm1, %v3166_v13, %v3168_v62  ;;  %v3243_v49 = vsel %vm3236_vm4, %v3240_v61, %v3242_v59  ;;  %v2890_v53 = vadd.f32 %v2863_v8, %v2803_v38 }
 0x314   : > { %v2960_v1 = vpop.f32.mrf.mxu3  ;;  %3192 = vrot.lane.b32.xlu2 %v3169_v41, %s4529_s29  ;;  %3264 = vrot.lane.b32.xlu1 %v3241_v19, %s4530_s30  ;;  %v2866_v48 = vpop.f32.mrf.mxu2  ;;  %v3316_v24 = vsel %vm688_vm0, %v3313_v14, %v3315_v58  ;;  %v3095_v15 = vsel %vm3088_vm3, %v3092_v25, %v3094_v28 }
 0x315   : > { %3262 = vrot.lane.b32.xlu0 %v3239_v47, %s4530_s30  ;;  %v2988_v27 = vadd.f32 %v2960_v1, %v2889_v16 }
 0x317   : > { %v5549_v60 = vadd.f32 %v3038_v12, %v2988_v27 }
 0x318   : > { %v2779_v2 = vpop.f32.mrf.mxu1 }
 0x319   : > { %v3043_v44 = vpop.f32.mrf.mxu0  ;;  %v2804_v63 = vadd.f32 %v2779_v2, %v5438_v0  ;;  %v3096_v7 = vrot.slane %v5549_v60, 1  ;;  %v3170_v33 = vrot.slane %v5549_v60, 2  ;;  %v3244_v34 = vrot.slane %v5549_v60, 3 }
 0x31a   : > { %v3317_v38 = vrot.slane %v5549_v60, 4 }
 0x31b   : > { %v2891_v22 = vadd.f32 %v2866_v48, %v2804_v63  ;;  %v3097_v39 = vsel %vm3088_vm3, %v3094_v28, %v3096_v7  ;;  %v3171_v8 = vsel %vm652_vm1, %v3168_v62, %v3170_v33  ;;  %v3245_v62 = vsel %vm3236_vm4, %v3242_v59, %v3244_v34 }
 0x31c   : > { %v2962_v20 = vpop.f32.mrf.mxu3  ;;  %3266 = vrot.lane.b32.xlu2 %v3243_v49, %s4530_s30  ;;  %3337 = vrot.lane.b32.xlu1 %v3314_v10, %s4531_s12  ;;  %v2868_v11 = vpop.f32.mrf.mxu2 }
 0x31d   : > { %3335 = vrot.lane.b32.xlu0 %v3312_v5, %s4531_s12  ;;  %v2989_v56 = vadd.f32 %v2962_v20, %v2890_v53  ;;  %v3318_v5 = vsel %vm688_vm0, %v3315_v58, %v3317_v38 }
 0x31f   : > { %v5551_v43 = vadd.f32 %v3040_v35, %v2989_v56 }
 0x320   : > { %v2781_v26 = vpop.f32.mrf.mxu1 }
 0x321   : > { %v3045_v55 = vpop.f32.mrf.mxu0  ;;  %v3098_v13 = vrot.slane %v5551_v43, 1  ;;  %v3172_v9 = vrot.slane %v5551_v43, 2  ;;  %v2805_v35 = vadd.f32 %v2781_v26, %v5448_v52  ;;  %v3246_v40 = vrot.slane %v5551_v43, 3 }
 0x322   : > { %v3319_v27 = vrot.slane %v5551_v43, 4 }
 0x323   : > { %v3099_v37 = vsel %vm3088_vm3, %v3096_v7, %v3098_v13  ;;  %v3173_v1 = vsel %vm652_vm1, %v3170_v33, %v3172_v9  ;;  %v2892_v14 = vadd.f32 %v2868_v11, %v2805_v35  ;;  %v3247_v59 = vsel %vm3236_vm4, %v3244_v34, %v3246_v40 }
 0x324   : > { %v2965_v32 = vpop.f32.mrf.mxu3  ;;  %3339 = vrot.lane.b32.xlu2 %v3316_v24, %s4531_s12  ;;  %3118 = vrot.lane.b32.xlu1 %v3095_v15, %s4528_s27  ;;  %v2871_v0 = vpop.f32.mrf.mxu2 }
 0x325   : > { %3116 = vrot.lane.b32.xlu0 %v3093_v36, %s4528_s27  ;;  %v2990_v23 = vadd.f32 %v2965_v32, %v2891_v22 }
 0x327   : > { %v5564_v46 = vadd.f32 %v3043_v44, %v2990_v23 }
 0x328   : > { %v2784_v12 = vpop.f32.mrf.mxu1 }
 0x329   : > { %v3048_v3 = vpop.f32.mrf.mxu0  ;;  %v3100_v61 = vrot.slane %v5564_v46, 1  ;;  %v3174_v52 = vrot.slane %v5564_v46, 2  ;;  %v2806_v2 = vadd.f32 %v2784_v12, %v5457_v57  ;;  %v3248_v53 = vrot.slane %v5564_v46, 3 }
 0x32a   : > { %v3321_v22 = vrot.slane %v5564_v46, 4 }
 0x32b   : > { %v3101_v19 = vsel %vm3088_vm3, %v3098_v13, %v3100_v61  ;;  %v3175_v49 = vsel %vm652_vm1, %v3172_v9, %v3174_v52  ;;  %v2893_v16 = vadd.f32 %v2871_v0, %v2806_v2  ;;  %v3249_v58 = vsel %vm3236_vm4, %v3246_v40, %v3248_v53 }
 0x32c   : > { %v2967_v21 = vpop.f32.mrf.mxu3  ;;  %3122 = vrot.lane.b32.xlu2 %v3099_v37, %s4528_s27  ;;  %3120 = vrot.lane.b32.xlu1 %v3097_v39, %s4528_s27  ;;  %v2873_v4 = vpop.f32.mrf.mxu2 }
 0x32d   : > { %3194 = vrot.lane.b32.xlu0 %v3171_v8, %s4529_s29  ;;  %v2991_v18 = vadd.f32 %v2967_v21, %v2892_v14 }
 0x32f   : > { %v5596_v10 = vadd.f32 %v3045_v55, %v2991_v18  ;;  %v3320_v55 = vsel %vm688_vm0, %v3317_v38, %v3319_v27 }
 0x330   : > { %v2786_v51 = vpop.f32.mrf.mxu1 }
 0x331   : > { %v3050_v41 = vpop.f32.mrf.mxu0  ;;  %v3102_v56 = vrot.slane %v5596_v10, 1  ;;  %v2807_v28 = vadd.f32 %v2786_v51, %v5471_v42  ;;  %v5620_v42 = vpop.permute.xlu2 %3443  ;;  %v3176_v7 = vrot.slane %v5596_v10, 2  ;;  %v3250_v9 = vrot.slane %v5596_v10, 3 }
 0x332   : > { %v3323_v18 = vrot.slane %v5596_v10, 4 }
 0x333   : > { %v3103_v15 = vsel %vm3088_vm3, %v3100_v61, %v3102_v56  ;;  %v2894_v36 = vadd.f32 %v2873_v4, %v2807_v28  ;;  %v3177_v21 = vsel %vm652_vm1, %v3174_v52, %v3176_v7 }
 0x334   : > { %v2970_v47 = vpop.f32.mrf.mxu3  ;;  %3124 = vrot.lane.b32.xlu2 %v3101_v19, %s4528_s27  ;;  %3196 = vrot.lane.b32.xlu1 %v3173_v1, %s4529_s29  ;;  %v5585_v48 = vpop.f32.mrf.mxu2 }
 0x335   : > { %3268 = vrot.lane.b32.xlu0 %v3245_v62, %s4530_s30  ;;  %v2992_v57 = vadd.f32 %v2970_v47, %v2893_v16  ;;  %v3251_v62 = vsel %vm3236_vm4, %v3248_v53, %v3250_v9 }
 0x337   : > { %v5610_v26 = vadd.f32 %v3048_v3, %v2992_v57  ;;  %v3322_v3 = vsel %vm688_vm0, %v3319_v27, %v3321_v22  ;;  %v5666_v27 = vpop.permute.xlu1 %3438 }
 0x338   : > { %v2789_v6 = vpop.f32.mrf.mxu1 }
 0x339   : > { %v5592_v44 = vpop.f32.mrf.mxu0  ;;  %v3104_v23 = vrot.slane %v5610_v26, 1  ;;  %v3178_v61 = vrot.slane %v5610_v26, 2  ;;  %v5636_v34 = vpop.permute.xlu2 %3458  ;;  %v2808_v35 = vadd.f32 %v2789_v6, %v5481_v17  ;;  %v3252_v17 = vrot.slane %v5610_v26, 3 }
 0x33a   : > { %v3325_v57 = vrot.slane %v5610_v26, 4 }
 0x33b   : > { %v3105_v37 = vsel %vm3088_vm3, %v3102_v56, %v3104_v23  ;;  %v3179_v1 = vsel %vm652_vm1, %v3176_v7, %v3178_v61  ;;  %v2895_v14 = vadd.f32 %v5585_v48, %v2808_v35  ;;  %v3324_v48 = vsel %vm688_vm0, %v3321_v22, %v3323_v18 }
 0x33c   : > { %v2972_v20 = vpop.f32.mrf.mxu3  ;;  %3198 = vrot.lane.b32.xlu2 %v3175_v49, %s4529_s29  ;;  %3270 = vrot.lane.b32.xlu1 %v3247_v59, %s4530_s30  ;;  %v5601_v11 = vpop.f32.mrf.mxu2  ;;  %v3253_v49 = vsel %vm3236_vm4, %v3250_v9, %v3252_v17 }
 0x33d   : > { %3341 = vrot.lane.b32.xlu0 %v3318_v5, %s4531_s12  ;;  %v2993_v0 = vadd.f32 %v2972_v20, %v2894_v36 }
 0x33f   : > { %v5625_v12 = vadd.f32 %v3050_v41, %v2993_v0  ;;  %v5685_v22 = vpop.permute.xlu1 %3453 }
 0x340   : > { %v2791_v25 = vpop.f32.mrf.mxu1 }
 0x341   : > { %v5608_v63 = vpop.f32.mrf.mxu0  ;;  %v3106_v4 = vrot.slane %v5625_v12, 1  ;;  %v3180_v52 = vrot.slane %v5625_v12, 2  ;;  %v2809_v38 = vadd.f32 %v2791_v25, %v5487_v31  ;;  %v5650_v2 = vpop.permute.xlu2 %3468  ;;  %v3254_v16 = vrot.slane %v5625_v12, 3 }
 0x342   : > { %v5673_v25 = vpop.permute.xlu0 %3448 }
 0x343   : > { %v3107_v19 = vsel %vm3088_vm3, %v3104_v23, %v3106_v4  ;;  %v3181_v6 = vsel %vm652_vm1, %v3178_v61, %v3180_v52  ;;  %v2896_v5 = vadd.f32 %v5601_v11, %v2809_v38  ;;  %v3255_v28 = vsel %vm3236_vm4, %v3252_v17, %v3254_v16 }
 0x344   : > { %v2975_v24 = vpop.f32.mrf.mxu3  ;;  %3272 = vrot.lane.b32.xlu2 %v3249_v58, %s4530_s30  ;;  %3343 = vrot.lane.b32.xlu1 %v3320_v55, %s4531_s12  ;;  %v5617_v32 = vpop.f32.mrf.mxu2  ;;  %v3326_v11 = vsel %vm688_vm0, %v3323_v18, %v3325_v57 }
 0x345   : > { %3126 = vrot.lane.b32.xlu0 %v3103_v15, %s4528_s27  ;;  %v2994_v40 = vadd.f32 %v2975_v24, %v2895_v14  ;;  %v3327_v24 = vrot.slane %v5625_v12, 4 }
 0x347   : > { %v5655_v59 = vadd.f32 %v5592_v44, %v2994_v40  ;;  %v3328_v23 = vsel %vm688_vm0, %v3325_v57, %v3327_v24  ;;  %v5704_v61 = vpop.permute.xlu1 %3463  ;;  %v3433_v57 = vld [vmem:[%s5873_s6 + $0x48] sm:$0xff] }
 0x348   : > { %v2794_v13 = vpop.f32.mrf.mxu1 }
 0x349   : > { %v3058_v33 = vpop.f32.mrf.mxu0  ;;  %v3108_v53 = vrot.slane %v5655_v59, 1  ;;  %v2810_v44 = vadd.f32 %v2794_v13, %v5492_v30  ;;  %v5678_v55 = vpop.permute.xlu2 %3478  ;;  %v3182_v36 = vrot.slane %v5655_v59, 2 }
 0x34a   : > { %v5693_v13 = vpop.permute.xlu0 %3473 }
 0x34b   : > { %v3109_v58 = vsel %vm3088_vm3, %v3106_v4, %v3108_v53  ;;  %v2897_v30 = vadd.f32 %v5617_v32, %v2810_v44  ;;  %v3183_v32 = vsel %vm652_vm1, %v3180_v52, %v3182_v36  ;;  %v3435_v44 = vld [vmem:[%s5873_s6 + $0x58] sm:$0xff] }
 0x34c   : > { %v2977_v39 = vpop.f32.mrf.mxu3  ;;  %3345 = vrot.lane.b32.xlu2 %v3322_v3, %s4531_s12  ;;  %3128 = vrot.lane.b32.xlu1 %v3105_v37, %s4528_s27  ;;  %v2883_v8 = vpop.f32.mrf.mxu2 }
 0x34d   : > { %3200 = vrot.lane.b32.xlu0 %v3177_v21, %s4529_s29  ;;  %v2995_v31 = vadd.f32 %v2977_v39, %v2896_v5  ;;  %v3256_v39 = vrot.slane %v5655_v59, 3 }
 0x34f   : > { %v5669_v56 = vadd.f32 %v5608_v63, %v2995_v31  ;;  %v3257_v4 = vsel %vm3236_vm4, %v3254_v16, %v3256_v39  ;;  %v3434_v16 = vld [vmem:[%s5873_s6 + $0x50] sm:$0xff] }
 0x350   : > { %v2796_v51 = vpop.f32.mrf.mxu1 }
 0x351   : > { %v3060_v41 = vpop.f32.mrf.mxu0  ;;  %v3110_v15 = vrot.slane %v5669_v56, 1  ;;  %v3331_v18 = vrot.slane %v5669_v56, 4 }
 0x352   : > { %v3258_v41 = vrot.slane %v5669_v56, 3 }
 0x353   : > { %v3111_v7 = vsel %vm3088_vm3, %v3108_v53, %v3110_v15 }
 0x354   : > { %v2980_v47 = vpop.f32.mrf.mxu3  ;;  %3130 = vrot.lane.b32.xlu2 %v3107_v19, %s4528_s27  ;;  %3202 = vrot.lane.b32.xlu1 %v3179_v1, %s4529_s29  ;;  %v3329_v19 = vrot.slane %v5655_v59, 4 }
 0x355   : > { %3274 = vrot.lane.b32.xlu0 %v3251_v62, %s4530_s30  ;;  %v2996_v63 = vadd.f32 %v2980_v47, %v2897_v30  ;;  %v3259_v47 = vsel %vm3236_vm4, %v3256_v39, %v3258_v41 }
 0x356   : > { %v3330_v62 = vsel %vm688_vm0, %v3327_v24, %v3329_v19 }
 0x357   : > { %v3074_v0 = vadd.f32 %v3058_v33, %v2996_v63  ;;  %v3184_v33 = vrot.slane %v5669_v56, 2  ;;  %v5743_v63 = vld [vmem:[%s5874_s7] ss:$0 sm:$0xff] }
 0x359   : > { %v3112_v37 = vrot.slane %v3074_v0, 1  ;;  %v3185_v8 = vsel %vm652_vm1, %v3182_v36, %v3184_v33  ;;  %v3186_v35 = vrot.slane %v3074_v0, 2  ;;  %v3260_v40 = vrot.slane %v3074_v0, 3 }
 0x35a   : > { %v3333_v38 = vrot.slane %v3074_v0, 4 }
 0x35b   : > { %v3113_v21 = vsel %vm3088_vm3, %v3110_v15, %v3112_v37  ;;  %v3187_v1 = vsel %vm652_vm1, %v3184_v33, %v3186_v35 }
 0x35c   : > { %3204 = vrot.lane.b32.xlu2 %v3181_v6, %s4529_s29  ;;  %3276 = vrot.lane.b32.xlu1 %v3253_v49, %s4530_s30  ;;  %v2982_v20 = vpop.f32.mrf.mxu3  ;;  %v3261_v6 = vsel %vm3236_vm4, %v3258_v41, %v3260_v40  ;;  %v3332_v49 = vsel %vm688_vm0, %v3329_v19, %v3331_v18 }
 0x35d   : > { %3347 = vrot.lane.b32.xlu0 %v3324_v48, %s4531_s12  ;;  %v3334_v48 = vsel %vm688_vm0, %v3331_v18, %v3333_v38 }
 0x364   : > { %3278 = vrot.lane.b32.xlu2 %v3255_v28, %s4530_s30  ;;  %3349 = vrot.lane.b32.xlu1 %v3326_v11, %s4531_s12 }
 0x365   : > { %3132 = vrot.lane.b32.xlu0 %v3109_v58, %s4528_s27 }
 0x36c   : > { %3351 = vrot.lane.b32.xlu2 %v3328_v23, %s4531_s12  ;;  %3134 = vrot.lane.b32.xlu1 %v3111_v7, %s4528_s27 }
 0x36d   : > { %3206 = vrot.lane.b32.xlu0 %v3183_v32, %s4529_s29 }
 0x36e   : > { %v5695_v3 = vpop.permute.xlu2 %3192 }
 0x374   : > { %3136 = vrot.lane.b32.xlu2 %v3113_v21, %s4528_s27  ;;  %3208 = vrot.lane.b32.xlu1 %v3185_v8, %s4529_s29  ;;  %s596_s27 = scalar_lea.vmem %s5877_s10, %s588_s25 }
 0x375   : > { %3280 = vrot.lane.b32.xlu0 %v3257_v4, %s4530_s30 }
 0x376   : > { %v3267_v9 = vpop.permute.xlu2 %3266  ;;  %v3115_v51 = vpop.permute.xlu0 %3114 }
 0x377   : > { %v3150_v53 = vadd.f32 %v3115_v51, %v5496_v29 }
 0x37c   : > { %3210 = vrot.lane.b32.xlu2 %v3187_v1, %s4529_s29  ;;  %3282 = vrot.lane.b32.xlu1 %v3259_v47, %s4530_s30 }
 0x37d   : > { %3353 = vrot.lane.b32.xlu0 %v3330_v62, %s4531_s12 }
 0x37e   : > { %v3340_v14 = vpop.permute.xlu2 %3339  ;;  %v3191_v52 = vpop.permute.xlu1 %3190 }
 0x37f   : > { %v3189_v17 = vpop.permute.xlu0 %3188 }
 0x380   : > { %v3224_v28 = vadd.f32 %v3189_v17, %v3150_v53 }
 0x384   : > { %3284 = vrot.lane.b32.xlu2 %v3261_v6, %s4530_s30  ;;  %3355 = vrot.lane.b32.xlu1 %v3332_v49, %s4531_s12  ;;  %s3852_s30 = sshll.u32 %s580_s26, 2 }
 0x385   : > { %3357 = vrot.lane.b32.xlu0 %v3334_v48, %s4531_s12  ;;  %s5749_s23 = scalar_lea.vmem %s5875_s8, %s3852_s30 }
 0x386   : > { %v5726_v20 = vpop.permute.xlu2 %3122  ;;  %v3265_v5 = vpop.permute.xlu1 %3264 }
 0x387   : > { %v3263_v31 = vpop.permute.xlu0 %3262 }
 0x388   : > { %v3298_v11 = vadd.f32 %v3263_v31, %v3224_v28 }
 0x38c   : > { %3488 = vperm.xlu2 %4484, %v3434_v16   ;;  %3483 = vperm.xlu1 %4483, %v3433_v57  }
 0x38d   : > { %3493 = vperm.xlu0 %4485, %v3435_v44  }
 0x38e   : > { %v3125_v58 = vpop.permute.xlu2 %3124  ;;  %v3338_v30 = vpop.permute.xlu1 %3337 }
 0x38f   : > { %v3336_v24 = vpop.permute.xlu0 %3335 }
 0x390   : > { %v3371_v29 = vadd.f32 %v3336_v24, %v3298_v11 }
 0x392   : > { %v3387_v15 = vadd.f32 %v5743_v63, %v3371_v29 }
 0x394   : > { %v3399_v36 = vpack.c.bf16 %v3387_v15, %v3387_v15  ;;  %v3496_v51 = vmul.f32 %v5666_v27, %v3387_v15 }
 0x396   : > { %3412 = vst.msk [vmem:[%s5749_s23] sm:$0xf] %vm3411_vm5, %v3399_v36  ;;  %v3199_v0 = vpop.permute.xlu2 %3198  ;;  %v3119_v23 = vpop.permute.xlu1 %3118  ;;  %v3508_v27 = vsel %vm666_vm2, %v3496_v51, 0.0 }
 0x397   : > { %v3152_v7 = vadd.f32 %v3119_v23, %v5508_v50  ;;  %v3117_v32 = vpop.permute.xlu0 %3116 }
 0x398   : > { %v3151_v37 = vadd.f32 %v3117_v32, %v5499_v45  ;;  %v3155_v45 = vadd.f32 %v3125_v58, %v5551_v43 }
 0x399   : > { %v3226_v33 = vadd.f32 %v5695_v3, %v3152_v7 }
 0x39a   : > { %v3225_v39 = vadd.f32 %v3191_v52, %v3151_v37  ;;  %v3229_v17 = vadd.f32 %v3199_v0, %v3155_v45 }
 0x39b   : > { %v3300_v21 = vadd.f32 %v3267_v9, %v3226_v33  ;;  %v3539_v9 = vmul.f32 %v3496_v51, %v3387_v15 }
 0x39c   : > { %v3299_v8 = vadd.f32 %v3265_v5, %v3225_v39 }
 0x39d   : > { %v3373_v4 = vadd.f32 %v3340_v14, %v3300_v21  ;;  %v3551_v49 = vsel %vm666_vm2, %v3539_v9, 0.0 }
 0x39e   : > { %v3372_v35 = vadd.f32 %v3338_v30, %v3299_v8  ;;  %v3273_v41 = vpop.permute.xlu2 %3272  ;;  %v3121_v19 = vpop.permute.xlu1 %3120 }
 0x39f   : > { %v3389_v1 = vadd.f32 %v5743_v63, %v3373_v4  ;;  %v3195_v47 = vpop.permute.xlu0 %3194  ;;  %v3303_v6 = vadd.f32 %v3273_v41, %v3229_v17  ;;  %v3153_v44 = vadd.f32 %v3121_v19, %v5517_v54  ;;  %v3154_v54 = vadd.f32 %v5726_v20, %v5549_v60 }
 0x3a0   : > { %v3388_v50 = vadd.f32 %v5743_v63, %v3372_v35 }
 0x3a1   : > { %v3401_v62 = vpack.c.bf16 %v3389_v1, %v3389_v1  ;;  %v3498_v3 = vmul.f32 %v5673_v25, %v3389_v1  ;;  %v3227_v29 = vadd.f32 %v3195_v47, %v3153_v44 }
 0x3a2   : > { %v3400_v52 = vpack.c.bf16 %v3388_v50, %v3388_v50  ;;  %v3497_v14 = vmul.f32 %v5620_v42, %v3388_v50 }
 0x3a3   : > { %3414 = vst.msk [vmem:[%s5749_s23 + $0x8] sm:$0xf] %vm3411_vm5, %v3401_v62  ;;  %v3541_v40 = vmul.f32 %v3498_v3, %v3389_v1  ;;  %v3511_v42 = vsel %vm666_vm2, %v3498_v3, 0.0 }
 0x3a4   : > { %3413 = vst.msk [vmem:[%s5749_s23 + $0x4] sm:$0xf] %vm3411_vm5, %v3400_v52  ;;  %v3540_v18 = vmul.f32 %v3497_v14, %v3388_v50  ;;  %v3509_v38 = vsel %vm666_vm2, %v3497_v14, 0.0 }
 0x3a5   : > { %v3510_v43 = vadd.f32 %v3509_v38, %v3508_v27  ;;  %v3554_v28 = vsel %vm666_vm2, %v3541_v40, 0.0 }
 0x3a6   : > { %v3346_v25 = vpop.permute.xlu2 %3345  ;;  %v3197_v48 = vpop.permute.xlu1 %3196  ;;  %v3552_v5 = vsel %vm666_vm2, %v3540_v18, 0.0 }
 0x3a7   : > { %v3376_v31 = vadd.f32 %v3346_v25, %v3303_v6  ;;  %v3269_v16 = vpop.permute.xlu0 %3268  ;;  %v3512_v57 = vadd.f32 %v3511_v42, %v3510_v43  ;;  %v3553_v53 = vadd.f32 %v3552_v5, %v3551_v49  ;;  %v3228_v33 = vadd.f32 %v3197_v48, %v3154_v54 }
 0x3a8   : > { %v3301_v36 = vadd.f32 %v3269_v16, %v3227_v29 }
 0x3a9   : > { %v3392_v11 = vadd.f32 %v5743_v63, %v3376_v31  ;;  %v3555_v58 = vadd.f32 %v3554_v28, %v3553_v53 }
 0x3ab   : > { %v3404_v30 = vpack.c.bf16 %v3392_v11, %v3392_v11  ;;  %v3501_v24 = vmul.f32 %v5704_v61, %v3392_v11 }
 0x3ad   : > { %3417 = vst.msk [vmem:[%s5749_s23 + $0x14] sm:$0xf] %vm3411_vm5, %v3404_v30  ;;  %v3544_v15 = vmul.f32 %v3501_v24, %v3392_v11  ;;  %v3517_v14 = vsel %vm666_vm2, %v3501_v24, 0.0 }
 0x3ae   : > { %v3131_v0 = vpop.permute.xlu2 %3130  ;;  %v3271_v23 = vpop.permute.xlu1 %3270 }
 0x3af   : > { %v3342_v7 = vpop.permute.xlu0 %3341  ;;  %v3302_v61 = vadd.f32 %v3271_v23, %v3228_v33  ;;  %v3560_v38 = vsel %vm666_vm2, %v3544_v15, 0.0 }
 0x3b0   : > { %v3374_v32 = vadd.f32 %v3342_v7, %v3301_v36 }
 0x3b2   : > { %v3390_v37 = vadd.f32 %v5743_v63, %v3374_v32 }
 0x3b4   : > { %v3402_v39 = vpack.c.bf16 %v3390_v37, %v3390_v37  ;;  %v3499_v21 = vmul.f32 %v5685_v22, %v3390_v37 }
 0x3b6   : > { %3415 = vst.msk [vmem:[%s5749_s23 + $0xc] sm:$0xf] %vm3411_vm5, %v3402_v39  ;;  %v3513_v8 = vsel %vm666_vm2, %v3499_v21, 0.0  ;;  %v3542_v4 = vmul.f32 %v3499_v21, %v3390_v37  ;;  %v3205_v51 = vpop.permute.xlu2 %3204  ;;  %v3344_v35 = vpop.permute.xlu1 %3343 }
 0x3b7   : > { %v3514_v41 = vadd.f32 %v3513_v8, %v3512_v57  ;;  %v3375_v19 = vadd.f32 %v3344_v35, %v3302_v61  ;;  %v3127_v1 = vpop.permute.xlu0 %3126 }
 0x3b8   : > { %v3556_v60 = vsel %vm666_vm2, %v3542_v4, 0.0  ;;  %v3156_v16 = vadd.f32 %v3127_v1, %v5564_v46 }
 0x3b9   : > { %v3557_v20 = vadd.f32 %v3556_v60, %v3555_v58  ;;  %v3391_v47 = vadd.f32 %v5743_v63, %v3375_v19 }
 0x3bb   : > { %v3403_v50 = vpack.c.bf16 %v3391_v47, %v3391_v47  ;;  %v3500_v45 = vmul.f32 %v5636_v34, %v3391_v47  ;;  %v3158_v34 = vadd.f32 %v3131_v0, %v5610_v26 }
 0x3bd   : > { %3416 = vst.msk [vmem:[%s5749_s23 + $0x10] sm:$0xf] %vm3411_vm5, %v3403_v50  ;;  %v3515_v22 = vsel %vm666_vm2, %v3500_v45, 0.0  ;;  %v3543_v62 = vmul.f32 %v3500_v45, %v3391_v47  ;;  %v3232_v43 = vadd.f32 %v3205_v51, %v3158_v34 }
 0x3be   : > { %v3516_v3 = vadd.f32 %v3515_v22, %v3514_v41  ;;  %v3279_v9 = vpop.permute.xlu2 %3278  ;;  %v3129_v52 = vpop.permute.xlu1 %3128 }
 0x3bf   : > { %v3558_v17 = vsel %vm666_vm2, %v3543_v62, 0.0  ;;  %v3201_v27 = vpop.permute.xlu0 %3200  ;;  %v3306_v49 = vadd.f32 %v3279_v9, %v3232_v43  ;;  %v3157_v58 = vadd.f32 %v3129_v52, %v5596_v10 }
 0x3c0   : > { %v3559_v40 = vadd.f32 %v3558_v17, %v3557_v20  ;;  %v5792_v18 = vadd.f32 %v3517_v14, %v3516_v3  ;;  %v3230_v53 = vadd.f32 %v3201_v27, %v3156_v16 }
 0x3c2   : > { %v5796_v6 = vadd.f32 %v3560_v38, %v3559_v40 }
 0x3c6   : > { %v3352_v25 = vpop.permute.xlu2 %3351  ;;  %v3203_v48 = vpop.permute.xlu1 %3202 }
 0x3c7   : > { %v3379_v42 = vadd.f32 %v3352_v25, %v3306_v49  ;;  %v3275_v5 = vpop.permute.xlu0 %3274  ;;  %v3231_v24 = vadd.f32 %v3203_v48, %v3157_v58 }
 0x3c8   : > { %v3304_v26 = vadd.f32 %v3275_v5, %v3230_v53 }
 0x3c9   : > { %v5799_v31 = vadd.f32 %v5743_v63, %v3379_v42 }
 0x3cb   : > { %v3407_v57 = vpack.c.bf16 %v5799_v31, %v5799_v31 }
 0x3cd   : > { %3420 = vst.msk [vmem:[%s5749_s23 + $0x20] sm:$0xf] %vm3411_vm5, %v3407_v57 }
 0x3ce   : > { %v3277_v44 = vpop.permute.xlu1 %3276  ;;  %v3137_v32 = vpop.permute.xlu2 %3136 }
 0x3cf   : > { %v3348_v28 = vpop.permute.xlu0 %3347  ;;  %v3305_v15 = vadd.f32 %v3277_v44, %v3231_v24  ;;  %v3161_v1 = vadd.f32 %v3137_v32, %v5669_v56 }
 0x3d0   : > { %v3377_v11 = vadd.f32 %v3348_v28, %v3304_v26 }
 0x3d2   : > { %v3393_v30 = vadd.f32 %v5743_v63, %v3377_v11 }
 0x3d4   : > { %v3405_v29 = vpack.c.bf16 %v3393_v30, %v3393_v30  ;;  %v3502_v41 = vmul.f32 %v5650_v2, %v3393_v30 }
 0x3d6   : > { %3418 = vst.msk [vmem:[%s5749_s23 + $0x18] sm:$0xf] %vm3411_vm5, %v3405_v29  ;;  %v3350_v46 = vpop.permute.xlu1 %3349  ;;  %v3211_v39 = vpop.permute.xlu2 %3210  ;;  %v3545_v22 = vmul.f32 %v3502_v41, %v3393_v30  ;;  %v3519_v2 = vsel %vm666_vm2, %v3502_v41, 0.0 }
 0x3d7   : > { %v3378_v36 = vadd.f32 %v3350_v46, %v3305_v15  ;;  %v3133_v0 = vpop.permute.xlu0 %3132  ;;  %v3235_v45 = vadd.f32 %v3211_v39, %v3161_v1  ;;  %v3520_v34 = vadd.f32 %v3519_v2, %v5792_v18 }
 0x3d8   : > { %v3159_v21 = vadd.f32 %v3133_v0, %v5625_v12  ;;  %v3562_v17 = vsel %vm666_vm2, %v3545_v22, 0.0 }
 0x3d9   : > { %v3394_v23 = vadd.f32 %v5743_v63, %v3378_v36  ;;  %v3563_v25 = vadd.f32 %v3562_v17, %v5796_v6 }
 0x3db   : > { %v3406_v7 = vpack.c.bf16 %v3394_v23, %v3394_v23  ;;  %v3503_v47 = vmul.f32 %v5693_v13, %v3394_v23  ;;  %v3504_v13 = vmul.f32 %v5678_v55, %v5799_v31 }
 0x3dd   : > { %3419 = vst.msk [vmem:[%s5749_s23 + $0x1c] sm:$0xf] %vm3411_vm5, %v3406_v7  ;;  %v3546_v52 = vmul.f32 %v3503_v47, %v3394_v23  ;;  %v3521_v40 = vsel %vm666_vm2, %v3503_v47, 0.0  ;;  %v3547_v55 = vmul.f32 %v3504_v13, %v5799_v31 }
 0x3de   : > { %v3135_v54 = vpop.permute.xlu1 %3134  ;;  %v3285_v60 = vpop.permute.xlu2 %3284  ;;  %v3522_v5 = vadd.f32 %v3521_v40, %v3520_v34 }
 0x3df   : > { %v3207_v37 = vpop.permute.xlu0 %3206  ;;  %v3160_v19 = vadd.f32 %v3135_v54, %v5655_v59  ;;  %v3309_v3 = vadd.f32 %v3285_v60, %v3235_v45  ;;  %v3564_v43 = vsel %vm666_vm2, %v3546_v52, 0.0  ;;  %v3566_v6 = vsel %vm666_vm2, %v3547_v55, 0.0 }
 0x3e0   : > { %v3233_v61 = vadd.f32 %v3207_v37, %v3159_v21  ;;  %v3565_v53 = vadd.f32 %v3564_v43, %v3563_v25 }
 0x3e2   : > { %v3567_v24 = vadd.f32 %v3566_v6, %v3565_v53 }
 0x3e6   : > { %v3209_v33 = vpop.permute.xlu1 %3208  ;;  %v3489_v48 = vpop.permute.xlu2 %3488 }
 0x3e7   : > { %v3281_v10 = vpop.permute.xlu0 %3280  ;;  %v3234_v50 = vadd.f32 %v3209_v33, %v3160_v19 }
 0x3e8   : > { %v3307_v8 = vadd.f32 %v3281_v10, %v3233_v61 }
 0x3ee   : > { %v3283_v4 = vpop.permute.xlu1 %3282 }
 0x3ef   : > { %v3354_v51 = vpop.permute.xlu0 %3353  ;;  %v3308_v62 = vadd.f32 %v3283_v4, %v3234_v50 }
 0x3f0   : > { %v3380_v35 = vadd.f32 %v3354_v51, %v3307_v8 }
 0x3f2   : > { %v3396_v20 = vadd.f32 %v5743_v63, %v3380_v35 }
 0x3f4   : > { %v3408_v12 = vpack.c.bf16 %v3396_v20, %v3396_v20 }
 0x3f6   : > { %3421 = vst.msk [vmem:[%s5749_s23 + $0x24] sm:$0xf] %vm3411_vm5, %v3408_v12  ;;  %v3356_v9 = vpop.permute.xlu1 %3355 }
 0x3f7   : > { %v3381_v59 = vadd.f32 %v3356_v9, %v3308_v62  ;;  %v3358_v56 = vpop.permute.xlu0 %3357 }
 0x3f8   : > { %v3382_v14 = vadd.f32 %v3358_v56, %v3309_v3 }
 0x3f9   : > { %v3397_v27 = vadd.f32 %v5743_v63, %v3381_v59 }
 0x3fa   : > { %v3398_v38 = vadd.f32 %v5743_v63, %v3382_v14  ;;  %v3523_v63 = vsel %vm666_vm2, %v3504_v13, 0.0 }
 0x3fb   : > { %v3409_v49 = vpack.c.bf16 %v3397_v27, %v3397_v27  ;;  %v3506_v16 = vmul.f32 %v3489_v48, %v3397_v27  ;;  %v3524_v44 = vadd.f32 %v3523_v63, %v3522_v5 }
 0x3fc   : > { %v3410_v42 = vpack.c.bf16 %v3398_v38, %v3398_v38 }
 0x3fd   : > { %3422 = vst.msk [vmem:[%s5749_s23 + $0x28] sm:$0xf] %vm3411_vm5, %v3409_v49  ;;  %v3549_v11 = vmul.f32 %v3506_v16, %v3397_v27  ;;  %v3527_v15 = vsel %vm666_vm2, %v3506_v16, 0.0 }
 0x3fe   : > { %3423 = vst.msk [vmem:[%s5749_s23 + $0x2c] sm:$0xf] %vm3411_vm5, %v3410_v42  ;;  %v3484_v57 = vpop.permute.xlu1 %3483 }
 0x3ff   : > { %v3505_v18 = vmul.f32 %v3484_v57, %v3396_v20  ;;  %v3494_v26 = vpop.permute.xlu0 %3493  ;;  %v3570_v23 = vsel %vm666_vm2, %v3549_v11, 0.0 }
 0x400   : > { %v3507_v28 = vmul.f32 %v3494_v26, %v3398_v38 }
 0x401   : > { %v3525_v58 = vsel %vm666_vm2, %v3505_v18, 0.0  ;;  %v3548_v30 = vmul.f32 %v3505_v18, %v3396_v20 }
 0x402   : > { %v3526_v31 = vadd.f32 %v3525_v58, %v3524_v44  ;;  %v3550_v46 = vmul.f32 %v3507_v28, %v3398_v38  ;;  %v3529_v7 = vsel %vm666_vm2, %v3507_v28, 0.0 }
 0x403   : > { %v3568_v29 = vsel %vm666_vm2, %v3548_v30, 0.0 }
 0x404   : > { %v3569_v36 = vadd.f32 %v3568_v29, %v3567_v24  ;;  %v3528_v0 = vadd.f32 %v3527_v15, %v3526_v31  ;;  %v3572_v37 = vsel %vm666_vm2, %v3550_v46, 0.0 }
 0x406   : > { %v3571_v32 = vadd.f32 %v3570_v23, %v3569_v36  ;;  %v3530_v54 = vadd.f32 %v3529_v7, %v3528_v0 }
 0x408   : > { %v3531_v33 = vrot.slane %v3530_v54, 4  ;;  %v3573_v10 = vadd.f32 %v3572_v37, %v3571_v32 }
 0x40a   : > { %v3532_v39 = vadd.f32 %v3531_v33, %v3530_v54  ;;  %v3574_v21 = vrot.slane %v3573_v10, 4 }
 0x40c   : > { %v3533_v61 = vrot.slane %v3532_v39, 2  ;;  %v3575_v8 = vadd.f32 %v3574_v21, %v3573_v10 }
 0x40e   : > { %v3534_v4 = vadd.f32 %v3533_v61, %v3532_v39  ;;  %v3576_v51 = vrot.slane %v3575_v8, 2 }
 0x410   : > { %v3535_v35 = vrot.slane %v3534_v4, 1  ;;  %v3577_v41 = vadd.f32 %v3576_v51, %v3575_v8 }
 0x412   : > { %v3536_v19 = vadd.f32 %v3535_v35, %v3534_v4  ;;  %v3578_v1 = vrot.slane %v3577_v41, 1 }
 0x414   : > { %3538 = vst.msk [vmem:[%s589_s22] sm:$0x1] %vm3537_vm6, %v3536_v19  ;;  %v3579_v60 = vadd.f32 %v3578_v1, %v3577_v41 }
 0x416   : > { %3580 = vst.msk [vmem:[%s596_s27] sm:$0x1] %vm3537_vm6, %v3579_v60 }
 0x417 PF: > { %s21_s17 = sadd.s32 1, %s4525_s17   ;;  %s5878_s13 = smov %s4517_s15 }
 0x418   : > { %p18_p12 = scmp.ge.s32.totalorder %s21_s17, 18   ;;  %s5879_s14 = smov %s4521_s16 }
 0x419   : > { %s5880_s15 = smov %s5883_s18  ;;  %s5881_s16 = smov %s5887_s19 }
 0x41a   :  { %20 = sbr.rel (!%p18_p12) target bundleno = 3 (0x3), region = 118 }

// kernel: down_transition_forward.11
= control target key start
LH: loop header
LB: loop body
LE: loop exit
PB: predicated region body
PF: predicated region fallthrough
CT: control target
= control target key end

     0   :  { %s678_s0 = inlined_call_operand.vmem [shape: bf16[96,128], index: 0, kind: input, shape index: {}]   ;;  %s679_s2 = inlined_call_operand.vmem [shape: f32[1,128], index: 2, kind: input, shape index: {}]   ;;  %s680_s3 = inlined_call_operand.vmem [shape: f32[1,128], index: 3, kind: input, shape index: {}]   ;;  %s681_s1 = inlined_call_operand.vmem [shape: bf16[96,128], index: 1, kind: input, shape index: {}]   ;;  %s682_s4 = inlined_call_operand.vmem [shape: f32[96,128], index: 4, kind: output, shape index: {}]  }
   0x1   :  { %v294_v0 = vld [vmem:[%s678_s0] sm:$0xff]   ;;  %v341_v5 = vld [vmem:[%s678_s0 + $0x8] sm:$0xff]   ;;  %v342_v6 = vld [vmem:[%s678_s0 + $0x10] sm:$0xff]  }
   0x2   :  { %v295_v1 = vunpack.c.l.bf16 %v294_v0  ;;  %v432_v2 = vld [vmem:[%s679_s2] ss:$0 sm:$0xff]  ;;  %v296_v4 = vunpack.c.h.bf16 %v294_v0  ;;  %v299_v9 = vunpack.c.l.bf16 %v341_v5  ;;  %v343_v10 = vld [vmem:[%s678_s0 + $0x18] sm:$0xff]   ;;  %v300_v11 = vunpack.c.h.bf16 %v341_v5  ;;  %v481_v31 = vld [vmem:[%s681_s1 + $0x8] sm:$0xff]  }
   0x3   :  { %v437_v3 = vld [vmem:[%s680_s3] ss:$0 sm:$0xff]  ;;  %v303_v12 = vunpack.c.l.bf16 %v342_v6  ;;  %v304_v16 = vunpack.c.h.bf16 %v342_v6  ;;  %v307_v19 = vunpack.c.l.bf16 %v343_v10  ;;  %v489_v35 = vld [vmem:[%s681_s1 + $0x10] sm:$0xff]   ;;  %v323_v42 = vunpack.c.l.bf16 %v481_v31  ;;  %v508_v48 = vld [vmem:[%s681_s1 + $0x18] sm:$0xff]  }
   0x4   :  { %v69_v7 = vmul.f32 %v432_v2, %v295_v1  ;;  %v70_v8 = vmul.f32 %v432_v2, %v296_v4  ;;  %v71_v15 = vmul.f32 %v432_v2, %v299_v9  ;;  %v72_v17 = vmul.f32 %v432_v2, %v300_v11  ;;  %v462_v20 = vld [vmem:[%s681_s1] sm:$0xff]   ;;  %v538_v6 = vld [vmem:[%s678_s0 + $0x28] sm:$0xff]  }
   0x5   :  { %v73_v18 = vmul.f32 %v432_v2, %v303_v12  ;;  %v74_v26 = vmul.f32 %v432_v2, %v304_v16  ;;  %v75_v29 = vmul.f32 %v432_v2, %v307_v19  ;;  %v319_v30 = vunpack.c.l.bf16 %v462_v20  ;;  %v344_v41 = vld [vmem:[%s678_s0 + $0x20] sm:$0xff]  }
   0x6   :  { %v451_v13 = vadd.f32 %v437_v3, %v69_v7  ;;  %v454_v14 = vadd.f32 %v437_v3, %v70_v8  ;;  %v467_v23 = vadd.f32 %v437_v3, %v71_v15  ;;  %v470_v24 = vadd.f32 %v437_v3, %v72_v17  ;;  %v523_v60 = vld [vmem:[%s681_s1 + $0x20] sm:$0xff]  }
   0x7   :  { %v473_v25 = vadd.f32 %v437_v3, %v73_v18  ;;  %v320_v34 = vunpack.c.h.bf16 %v462_v20  ;;  %v493_v37 = vadd.f32 %v437_v3, %v74_v26  ;;  %v496_v40 = vadd.f32 %v437_v3, %v75_v29 }
   0x8   :  { %v109_v21 = vmin.f32 %v451_v13, 0.0  ;;  %v110_v22 = vmin.f32 %v454_v14, 0.0  ;;  %v111_v32 = vmin.f32 %v467_v23, 0.0  ;;  %v112_v33 = vmin.f32 %v470_v24, 0.0 }
   0x9   :  { %v113_v36 = vmin.f32 %v473_v25, 0.0  ;;  %v114_v44 = vmin.f32 %v493_v37, 0.0  ;;  %v308_v45 = vunpack.c.h.bf16 %v343_v10  ;;  %v324_v46 = vunpack.c.h.bf16 %v481_v31 }
   0xa   :  { %v121_v27 = vmul.f32 1.442695, %v109_v21  ;;  %v123_v28 = vmul.f32 1.442695, %v110_v22  ;;  %v125_v38 = vmul.f32 1.442695, %v111_v32  ;;  %v327_v47 = vunpack.c.l.bf16 %v489_v35 }
   0xb   :  { %v127_v39 = vmul.f32 1.442695, %v112_v33  ;;  %v129_v43 = vmul.f32 1.442695, %v113_v36  ;;  %v115_v49 = vmin.f32 %v496_v40, 0.0  ;;  %v76_v51 = vmul.f32 %v432_v2, %v308_v45 }
   0xc   :  { %353 = vpow2.f32 %v121_v27  ;;  %v131_v50 = vmul.f32 1.442695, %v114_v44  ;;  %v311_v52 = vunpack.c.l.bf16 %v344_v41  ;;  %vm97_vm0 = vcmp.gt.f32.partialorder %v451_v13, 0.0 }
   0xd   :  { %355 = vpow2.f32 %v123_v28  ;;  %v328_v53 = vunpack.c.h.bf16 %v489_v35  ;;  %v133_v54 = vmul.f32 1.442695, %v115_v49  ;;  %vm98_vm1 = vcmp.gt.f32.partialorder %v454_v14, 0.0 }
   0xe   :  { %357 = vpow2.f32 %v125_v38  ;;  %v331_v56 = vunpack.c.l.bf16 %v508_v48  ;;  %v517_v57 = vadd.f32 %v437_v3, %v76_v51  ;;  %vm99_vm2 = vcmp.gt.f32.partialorder %v467_v23, 0.0 }
   0xf   :  { %359 = vpow2.f32 %v127_v39  ;;  %v77_v61 = vmul.f32 %v432_v2, %v311_v52  ;;  %v312_v62 = vunpack.c.h.bf16 %v344_v41  ;;  %vm100_vm3 = vcmp.gt.f32.partialorder %v470_v24, 0.0 }
  0x10   :  { %361 = vpow2.f32 %v129_v43  ;;  %vm101_vm4 = vcmp.gt.f32.partialorder %v473_v25, 0.0  ;;  %vm102_vm5 = vcmp.gt.f32.partialorder %v493_v37, 0.0  ;;  %vm103_vm6 = vcmp.gt.f32.partialorder %v496_v40, 0.0 }
  0x11   :  { %363 = vpow2.f32 %v131_v50  ;;  %v332_v4 = vunpack.c.h.bf16 %v508_v48  ;;  %v116_v5 = vmin.f32 %v517_v57, 0.0  ;;  %v335_v11 = vunpack.c.l.bf16 %v523_v60 }
  0x12   :  { %v354_v55 = vpop.eup %353  ;;  %365 = vpow2.f32 %v133_v54  ;;  %v549_v16 = vadd.f32 %v437_v3, %v77_v61  ;;  %v78_v17 = vmul.f32 %v432_v2, %v312_v62  ;;  %v315_v21 = vunpack.c.l.bf16 %v538_v6 }
  0x13   :  { %v356_v58 = vpop.eup %355  ;;  %v269_v59 = vadd.f32 -1.0, %v354_v55  ;;  %v135_v28 = vmul.f32 1.442695, %v116_v5  ;;  %vm104_vm7 = vcmp.gt.f32.partialorder %v517_v57, 0.0  ;;  %v316_v55 = vunpack.c.h.bf16 %v538_v6 }
  0x14   :  { %v270_v63 = vadd.f32 -1.0, %v356_v58  ;;  %v358_v0 = vpop.eup %357  ;;  %v117_v36 = vmin.f32 %v549_v16, 0.0  ;;  %v577_v39 = vadd.f32 %v437_v3, %v78_v17  ;;  %vm105_vm9 = vcmp.gt.f32.partialorder %v549_v16, 0.0 }
  0x15   :  { %v157_v1 = vsel %vm97_vm0, %v451_v13, %v269_v59  ;;  %v360_v7 = vpop.eup %359  ;;  %v271_v10 = vadd.f32 -1.0, %v358_v0 }
  0x16   :  { %v540_v8 = vadd.f32 %v319_v30, %v157_v1  ;;  %v158_v9 = vsel %vm98_vm1, %v454_v14, %v270_v63  ;;  %v362_v12 = vpop.eup %361  ;;  %v272_v15 = vadd.f32 -1.0, %v360_v7  ;;  %v118_v51 = vmin.f32 %v577_v39, 0.0 }
  0x17   :  { %v546_v13 = vadd.f32 %v320_v34, %v158_v9  ;;  %v364_v18 = vpop.eup %363  ;;  %v159_v20 = vsel %vm99_vm2, %v467_v23, %v271_v10  ;;  %v273_v14 = vadd.f32 -1.0, %v362_v12  ;;  %vm106_vm15 = vcmp.gt.f32.partialorder %v577_v39, 0.0 }
  0x18   :  { %v193_v19 = vmin.f32 %v540_v8, 0.0  ;;  %v558_v26 = vadd.f32 %v323_v42, %v159_v20  ;;  %v160_v27 = vsel %vm100_vm3, %v470_v24, %v272_v15  ;;  %v274_v23 = vadd.f32 -1.0, %v364_v18  ;;  %v366_v32 = vpop.eup %365 }
  0x19   :  { %v194_v22 = vmin.f32 %v546_v13, 0.0  ;;  %v563_v30 = vadd.f32 %v324_v46, %v160_v27  ;;  %v161_v31 = vsel %vm101_vm4, %v473_v25, %v273_v14  ;;  %v79_v42 = vmul.f32 %v432_v2, %v315_v21 }
  0x1a   :  { %v205_v29 = vmul.f32 1.442695, %v193_v19  ;;  %v195_v34 = vmin.f32 %v558_v26, 0.0  ;;  %v569_v35 = vadd.f32 %v327_v47, %v161_v31  ;;  %v162_v38 = vsel %vm102_vm5, %v493_v37, %v274_v23 }
  0x1b   :  { %v207_v33 = vmul.f32 1.442695, %v194_v22  ;;  %v196_v24 = vmin.f32 %v563_v30, 0.0  ;;  %v581_v44 = vadd.f32 %v328_v53, %v162_v38  ;;  %v275_v45 = vadd.f32 -1.0, %v366_v32 }
  0x1c   :  { %367 = vpow2.f32 %v205_v29  ;;  %v209_v25 = vmul.f32 1.442695, %v195_v34  ;;  %v197_v41 = vmin.f32 %v569_v35, 0.0  ;;  %v137_v47 = vmul.f32 1.442695, %v117_v36 }
  0x1d   :  { %369 = vpow2.f32 %v207_v33  ;;  %v211_v43 = vmul.f32 1.442695, %v196_v24  ;;  %vm181_vm8 = vcmp.gt.f32.partialorder %v540_v8, 0.0  ;;  %v198_v37 = vmin.f32 %v581_v44, 0.0 }
  0x1e   :  { %371 = vpow2.f32 %v135_v28  ;;  %v213_v46 = vmul.f32 1.442695, %v197_v41  ;;  %v163_v49 = vsel %vm103_vm6, %v496_v40, %v275_v45  ;;  %v596_v52 = vadd.f32 %v437_v3, %v79_v42 }
  0x1f   :  { %373 = vpow2.f32 %v209_v25  ;;  %v592_v50 = vadd.f32 %v331_v56, %v163_v49  ;;  %vm182_vm10 = vcmp.gt.f32.partialorder %v546_v13, 0.0  ;;  %v215_v54 = vmul.f32 1.442695, %v198_v37 }
  0x20   :  { %375 = vpow2.f32 %v211_v43  ;;  %vm183_vm11 = vcmp.gt.f32.partialorder %v558_v26, 0.0  ;;  %v139_v56 = vmul.f32 1.442695, %v118_v51  ;;  %vm184_vm12 = vcmp.gt.f32.partialorder %v563_v30, 0.0 }
  0x21   :  { %377 = vpow2.f32 %v213_v46  ;;  %v199_v59 = vmin.f32 %v592_v50, 0.0  ;;  %v119_v63 = vmin.f32 %v596_v52, 0.0  ;;  %v80_v15 = vmul.f32 %v432_v2, %v316_v55 }
  0x22   :  { %v368_v53 = vpop.eup %367  ;;  %379 = vpow2.f32 %v137_v47  ;;  %vm185_vm13 = vcmp.gt.f32.partialorder %v569_v35, 0.0  ;;  %vm186_vm14 = vcmp.gt.f32.partialorder %v581_v44, 0.0  ;;  %v336_v29 = vunpack.c.h.bf16 %v523_v60 }
  0x23   :  { %v370_v40 = vpop.eup %369  ;;  %v281_v58 = vadd.f32 -1.0, %v368_v53  ;;  %381 = vpow2.f32 %v215_v54  ;;  %v217_v5 = vmul.f32 1.442695, %v199_v59  ;;  %v141_v12 = vmul.f32 1.442695, %v119_v63 }
  0x24   :  { %v372_v61 = vpop.eup %371  ;;  %v282_v62 = vadd.f32 -1.0, %v370_v40  ;;  %383 = vpow2.f32 %v139_v56  ;;  %vm187_vm0 = vcmp.gt.f32.partialorder %v592_v50, 0.0  ;;  %vm107_vm1 = vcmp.gt.f32.partialorder %v596_v52, 0.0 }
  0x25   :  { %v374_v0 = vpop.eup %373  ;;  %v241_v1 = vsel %vm181_vm8, %v540_v8, %v281_v58  ;;  %v276_v6 = vadd.f32 -1.0, %v372_v61  ;;  %385 = vpow2.f32 %v217_v5 }
  0x26   :  { %v376_v7 = vpop.eup %375  ;;  %253 = vst [vmem:[%s682_s4] sm:$0xff] %v241_v1  ;;  %v242_v9 = vsel %vm182_vm10, %v546_v13, %v282_v62  ;;  %v283_v10 = vadd.f32 -1.0, %v374_v0  ;;  %387 = vpow2.f32 %v141_v12 }
  0x27   :  { %v378_v17 = vpop.eup %377  ;;  %254 = vst [vmem:[%s682_s4 + $0x8] sm:$0xff] %v242_v9  ;;  %v284_v8 = vadd.f32 -1.0, %v376_v7  ;;  %v164_v18 = vsel %vm104_vm7, %v517_v57, %v276_v6  ;;  %v96_v57 = vadd.f32 %v437_v3, %v80_v15 }
  0x28   :  { %v380_v19 = vpop.eup %379  ;;  %v243_v13 = vsel %vm183_vm11, %v558_v26, %v283_v10  ;;  %v285_v20 = vadd.f32 -1.0, %v378_v17  ;;  %v176_v2 = vadd.f32 %v332_v4, %v164_v18  ;;  %v350_v26 = vld [vmem:[%s681_s1 + $0x28] sm:$0xff]  }
  0x29   :  { %255 = vst [vmem:[%s682_s4 + $0x10] sm:$0xff] %v243_v13  ;;  %v244_v14 = vsel %vm184_vm12, %v563_v30, %v284_v8  ;;  %v277_v21 = vadd.f32 -1.0, %v380_v19  ;;  %v382_v22 = vpop.eup %381  ;;  %v120_v30 = vmin.f32 %v96_v57, 0.0  ;;  %v340_v51 = vunpack.c.h.bf16 %v350_v26 }
  0x2a   :  { %256 = vst [vmem:[%s682_s4 + $0x18] sm:$0xff] %v244_v14  ;;  %v245_v48 = vsel %vm185_vm13, %v569_v35, %v285_v20  ;;  %v200_v4 = vmin.f32 %v176_v2, 0.0  ;;  %v384_v27 = vpop.eup %383  ;;  %v286_v3 = vadd.f32 -1.0, %v382_v22  ;;  %v339_v35 = vunpack.c.l.bf16 %v350_v26 }
  0x2b   :  { %257 = vst [vmem:[%s682_s4 + $0x20] sm:$0xff] %v245_v48  ;;  %v165_v28 = vsel %vm105_vm9, %v549_v16, %v277_v21  ;;  %v278_v32 = vadd.f32 -1.0, %v384_v27  ;;  %v386_v33 = vpop.eup %385  ;;  %v143_v36 = vmul.f32 1.442695, %v120_v30  ;;  %vm188_vm2 = vcmp.gt.f32.partialorder %v176_v2, 0.0 }
  0x2c   :  { %v219_v31 = vmul.f32 1.442695, %v200_v4  ;;  %v177_v23 = vadd.f32 %v335_v11, %v165_v28  ;;  %v246_v34 = vsel %vm186_vm14, %v581_v44, %v286_v3  ;;  %v388_v24 = vpop.eup %387  ;;  %v287_v16 = vadd.f32 -1.0, %v386_v33 }
  0x2d   :  { %258 = vst [vmem:[%s682_s4 + $0x28] sm:$0xff] %v246_v34  ;;  %v166_v60 = vsel %vm106_vm15, %v577_v39, %v278_v32  ;;  %v279_v11 = vadd.f32 -1.0, %v388_v24  ;;  %vm108_vm3 = vcmp.gt.f32.partialorder %v96_v57, 0.0 }
  0x2e   :  { %389 = vpow2.f32 %v219_v31  ;;  %v201_v38 = vmin.f32 %v177_v23, 0.0  ;;  %v247_v25 = vsel %vm187_vm0, %v592_v50, %v287_v16  ;;  %v178_v42 = vadd.f32 %v336_v29, %v166_v60 }
  0x2f   :  { %391 = vpow2.f32 %v143_v36  ;;  %259 = vst [vmem:[%s682_s4 + $0x30] sm:$0xff] %v247_v25  ;;  %v167_v43 = vsel %vm107_vm1, %v596_v52, %v279_v11  ;;  %vm189_vm4 = vcmp.gt.f32.partialorder %v177_v23, 0.0 }
  0x30   :  { %v221_v41 = vmul.f32 1.442695, %v201_v38  ;;  %v202_v44 = vmin.f32 %v178_v42, 0.0  ;;  %v179_v45 = vadd.f32 %v339_v35, %v167_v43  ;;  %vm190_vm5 = vcmp.gt.f32.partialorder %v178_v42, 0.0 }
  0x32   :  { %393 = vpow2.f32 %v221_v41  ;;  %v223_v47 = vmul.f32 1.442695, %v202_v44  ;;  %v203_v37 = vmin.f32 %v179_v45, 0.0  ;;  %vm191_vm6 = vcmp.gt.f32.partialorder %v179_v45, 0.0 }
  0x34   :  { %v390_v46 = vpop.eup %389  ;;  %395 = vpow2.f32 %v223_v47  ;;  %v225_v50 = vmul.f32 1.442695, %v203_v37 }
  0x35   :  { %v392_v39 = vpop.eup %391  ;;  %v288_v49 = vadd.f32 -1.0, %v390_v46 }
  0x36   :  { %v280_v53 = vadd.f32 -1.0, %v392_v39  ;;  %397 = vpow2.f32 %v225_v50 }
  0x37   :  { %v248_v54 = vsel %vm188_vm2, %v176_v2, %v288_v49 }
  0x38   :  { %v394_v55 = vpop.eup %393  ;;  %260 = vst [vmem:[%s682_s4 + $0x38] sm:$0xff] %v248_v54  ;;  %v168_v52 = vsel %vm108_vm3, %v96_v57, %v280_v53 }
  0x39   :  { %v289_v40 = vadd.f32 -1.0, %v394_v55  ;;  %v180_v58 = vadd.f32 %v340_v51, %v168_v52 }
  0x3a   :  { %v396_v61 = vpop.eup %395 }
  0x3b   :  { %v249_v59 = vsel %vm189_vm4, %v177_v23, %v289_v40  ;;  %v204_v56 = vmin.f32 %v180_v58, 0.0  ;;  %v290_v62 = vadd.f32 -1.0, %v396_v61  ;;  %vm192_vm7 = vcmp.gt.f32.partialorder %v180_v58, 0.0 }
  0x3c   :  { %261 = vst [vmem:[%s682_s4 + $0x40] sm:$0xff] %v249_v59  ;;  %v398_v0 = vpop.eup %397 }
  0x3d   :  { %v227_v63 = vmul.f32 1.442695, %v204_v56  ;;  %v250_v1 = vsel %vm190_vm5, %v178_v42, %v290_v62  ;;  %v291_v5 = vadd.f32 -1.0, %v398_v0 }
  0x3e   :  { %262 = vst [vmem:[%s682_s4 + $0x48] sm:$0xff] %v250_v1 }
  0x3f   :  { %399 = vpow2.f32 %v227_v63  ;;  %v251_v6 = vsel %vm191_vm6, %v179_v45, %v291_v5 }
  0x40   :  { %263 = vst [vmem:[%s682_s4 + $0x50] sm:$0xff] %v251_v6 }
  0x45   :  { %v400_v7 = vpop.eup %399 }
  0x46   :  { %v292_v9 = vadd.f32 -1.0, %v400_v7 }
  0x48   :  { %v252_v10 = vsel %vm192_vm7, %v180_v58, %v292_v9 }
  0x49   :  { %264 = vst [vmem:[%s682_s4 + $0x58] sm:$0xff] %v252_v10 }

</bundles_post_ra>
